<compile_context>
chip_gen: v7x
topology: tpu7x:2x2x1
jax: 0.10.0
libtpu: 0.0.40
codegen_flags: <defaults>
</compile_context>

<pallas_src>
import jax
import jax.numpy as jnp
from jax.experimental import pallas as pl
from jax.experimental.pallas import tpu as pltpu


def convgru_kernel(hx_ref, w1_ref, b1_ref, w2_ref, out_ref,
                   pad_ref, col1_ref, col2_ref):
    _, H, W, Cin = hx_ref.shape
    Ch = out_ref.shape[3]
    Hp, Wp = H + 2, W + 2
    M = H * W
    f32 = jnp.float32
    bf16 = jnp.bfloat16

    # --- zero only the 1-pixel border of the halo scratch (cheap, per step;
    #     do NOT gate on program_id==0: unsafe with per-core scratch on v7x) ---
    zrow = jnp.zeros((1, Wp, Cin), f32)
    zcol = jnp.zeros((Hp, 1, Cin), f32)
    pad_ref[pl.ds(0, 1), :, :] = zrow
    pad_ref[pl.ds(Hp - 1, 1), :, :] = zrow
    pad_ref[:, pl.ds(0, 1), :] = zcol
    pad_ref[:, pl.ds(Wp - 1, 1), :] = zcol

    # --- interior fill with concat([h, x]) (bf16 in HBM, f32 inside the halo) --
    hx = hx_ref[0]                                          # (H, W, Cin) bf16
    hx_f32 = hx.astype(f32)
    pad_ref[pl.ds(1, H), pl.ds(1, W), :] = hx_f32
    h_flat = hx_f32[:, :, :Ch].reshape(M, Ch)               # hidden state, f32

    # --- im2col for the fused z / r / q_x conv: one matmul, K = 9*Cin ---------
    for kh in range(3):
        for kw in range(3):
            t = kh * 3 + kw
            patch = pad_ref[pl.ds(kh, H), pl.ds(kw, W), :]        # (H, W, Cin)
            col1_ref[:, pl.ds(t * Cin, Cin)] = (
                patch.reshape(M, Cin).astype(bf16))

    acc1 = jnp.dot(col1_ref[...], w1_ref[...],
                   preferred_element_type=f32) + b1_ref[...]      # (M, 3*Ch)
    zr = 1.0 / (1.0 + jnp.exp(-acc1[:, :2 * Ch]))                 # sigmoid, f32
    z = zr[:, :Ch]
    r = zr[:, Ch:]
    qx = acc1[:, 2 * Ch:]              # conv_q over the x channels, plus bq

    # --- q conv over r*h only (the x half of wq was folded above): K = 9*Ch ---
    rh = r * h_flat                                               # (M, Ch) f32
    pad_ref[pl.ds(1, H), pl.ds(1, W), pl.ds(0, Ch)] = rh.reshape(H, W, Ch)
    for kh in range(3):
        for kw in range(3):
            t = kh * 3 + kw
            patch = pad_ref[pl.ds(kh, H), pl.ds(kw, W), pl.ds(0, Ch)]
            col2_ref[:, pl.ds(t * Ch, Ch)] = (
                patch.reshape(M, Ch).astype(bf16))

    q = jnp.tanh(qx + jnp.dot(col2_ref[...], w2_ref[...],
                              preferred_element_type=f32))        # (M, Ch)

    # --- GRU combine in f32, single output store ------------------------------
    new_h = (1.0 - z) * h_flat + z * q
    out_ref[0] = new_h.reshape(H, W, Ch).astype(out_ref.dtype)


@jax.jit
def conv_gru(h, x, wz, bz, wr, br, wq, bq):
    N, H, W, Ch = h.shape
    Cx = x.shape[-1]
    Cin = Ch + Cx
    M = H * W
    bf16 = jnp.bfloat16

    # bf16 activations for DMA + MXU; gate math stays f32 inside the kernel.
    hx = jnp.concatenate([h, x], axis=-1).astype(bf16)            # (N,H,W,Cin)

    # Fused conv 1 weight: [wz | wr | wq_x] along Cout; wq_x gets zero rows for
    # the hidden input channels so the single K=9*Cin matmul also produces the
    # x-channel contribution of the q gate.
    wq_h = wq[:, :, :Ch, :]                                       # (3,3,Ch,Ch)
    wq_x = jnp.concatenate(
        [jnp.zeros((3, 3, Ch, Ch), wq.dtype), wq[:, :, Ch:, :]], axis=2)
    w1 = jnp.concatenate([wz, wr, wq_x], axis=-1)                 # (3,3,Cin,3Ch)
    w1 = w1.reshape(9 * Cin, 3 * Ch).astype(bf16)
    b1 = jnp.concatenate([bz, br, bq], axis=-1).astype(jnp.float32)   # (1,3Ch)
    w2 = wq_h.reshape(9 * Ch, Ch).astype(bf16)                    # (9*Ch, Ch)

    full2 = lambda n: (0, 0)
    return pl.pallas_call(
        convgru_kernel,
        out_shape=jax.ShapeDtypeStruct((N, H, W, Ch), h.dtype),
        grid_spec=pltpu.PrefetchScalarGridSpec(
            num_scalar_prefetch=0,
            grid=(N,),
            in_specs=[
                pl.BlockSpec((1, H, W, Cin), lambda n: (n, 0, 0, 0)),
                pl.BlockSpec((9 * Cin, 3 * Ch), full2),
                pl.BlockSpec((1, 3 * Ch), full2),
                pl.BlockSpec((9 * Ch, Ch), full2),
            ],
            out_specs=pl.BlockSpec((1, H, W, Ch), lambda n: (n, 0, 0, 0)),
            scratch_shapes=[
                pltpu.VMEM((H + 2, W + 2, Cin), jnp.float32),   # zero-halo buf
                pltpu.VMEM((M, 9 * Cin), bf16),                 # im2col, conv 1
                pltpu.VMEM((M, 9 * Ch), bf16),                  # im2col, conv 2
            ],
        ),
        compiler_params=pltpu.CompilerParams(
            dimension_semantics=("parallel",),
            # Usage is tiny at these shapes; raise on v6e / H-tile on v7x for
            # production-sized maps (see TODO above).
            vmem_limit_bytes=32 * 1024 * 1024),
    )(hx, w1, b1, w2)


# ---- pure-JAX reference for verification -----------------------------------
def _ref_conv(x, w, b):
    y = jax.lax.conv_general_dilated(
        x.astype(jnp.bfloat16), w.astype(jnp.bfloat16),
        window_strides=(1, 1), padding=((1, 1), (1, 1)),
        dimension_numbers=("NHWC", "HWIO", "NHWC"),
        preferred_element_type=jnp.float32)
    return y + b.reshape(1, 1, 1, -1)


def ref_convgru(h, x, wz, bz, wr, br, wq, bq):
    # Mirrors the kernel's precision: h/x ride in bf16 (quantized once), conv
    # operands are bf16 with f32 accumulation, gate math stays f32.
    h = h.astype(jnp.bfloat16).astype(jnp.float32)
    x = x.astype(jnp.bfloat16).astype(jnp.float32)
    hx = jnp.concatenate([h, x], axis=-1)
    z = jax.nn.sigmoid(_ref_conv(hx, wz, bz))
    r = jax.nn.sigmoid(_ref_conv(hx, wr, br))
    q = jnp.tanh(_ref_conv(jnp.concatenate([r * h, x], axis=-1), wq, bq))
    return (1.0 - z) * h + z * q


if __name__ == "__main__":
    key = jax.random.PRNGKey(0)
    N, H, W = 2, 16, 16
    hidden_dim, input_dim = 32, 32
    Cin = hidden_dim + input_dim

    ks = jax.random.split(key, 8)
    h0 = jax.random.normal(ks[0], (N, H, W, hidden_dim), jnp.float32)
    x0 = jax.random.normal(ks[1], (N, H, W, input_dim), jnp.float32)
    s = 0.1
    wz = s * jax.random.normal(ks[2], (3, 3, Cin, hidden_dim), jnp.float32)
    wr = s * jax.random.normal(ks[3], (3, 3, Cin, hidden_dim), jnp.float32)
    wq = s * jax.random.normal(ks[4], (3, 3, Cin, hidden_dim), jnp.float32)
    bz = s * jax.random.normal(ks[5], (1, hidden_dim), jnp.float32)
    br = s * jax.random.normal(ks[6], (1, hidden_dim), jnp.float32)
    bq = s * jax.random.normal(ks[7], (1, hidden_dim), jnp.float32)

    out = conv_gru(h0, x0, wz, bz, wr, br, wq, bq)
    jax.block_until_ready(out)

    ref = ref_convgru(h0, x0, wz, bz, wr, br, wq, bq)
    err = float(jnp.max(jnp.abs(out - ref)))
    assert jnp.allclose(out, ref, atol=5e-3, rtol=5e-3), f"max abs err {err}"
    print("KERNEL_OK")
</pallas_src>

<mosaic_0001>
module attributes {stable_mosaic.version = 11 : i64} {
  func.func @convgru_kernel(%arg0: i32, %arg1: memref<1x16x16x64xbf16, #tpu.memory_space<vmem>>, %arg2: memref<576x96xbf16, #tpu.memory_space<vmem>>, %arg3: memref<1x96xf32, #tpu.memory_space<vmem>>, %arg4: memref<288x32xbf16, #tpu.memory_space<vmem>>, %arg5: memref<1x16x16x32xf32, #tpu.memory_space<vmem>>, %arg6: memref<18x18x64xf32, #tpu.memory_space<vmem>>, %arg7: memref<256x576xbf16, #tpu.memory_space<vmem>>, %arg8: memref<256x288xbf16, #tpu.memory_space<vmem>>) attributes {dimension_semantics = [#tpu.dimension_semantics<parallel>], iteration_bounds = array<i64: 2>, scalar_prefetch = 0 : i64, scratch_operands = 3 : i64, tpu.core_type = #tpu.core_type<tc>, window_params = [{transform_indices = @transform_0, window_bounds = array<i64: 1, 16, 16, 64>}, {pipeline_mode = #tpu.pipeline_mode<synchronous>, transform_indices = @transform_1, window_bounds = array<i64: 576, 96>}, {pipeline_mode = #tpu.pipeline_mode<synchronous>, transform_indices = @transform_2, window_bounds = array<i64: 1, 96>}, {pipeline_mode = #tpu.pipeline_mode<synchronous>, transform_indices = @transform_3, window_bounds = array<i64: 288, 32>}, {transform_indices = @transform_4, window_bounds = array<i64: 1, 16, 16, 32>}]} {
    %cst = arith.constant 0.000000e+00 : f32
    %0 = vector.broadcast %cst : f32 to vector<1x18x64xf32>
    %cst_0 = arith.constant 0.000000e+00 : f32
    %1 = vector.broadcast %cst_0 : f32 to vector<18x1x64xf32>
    %c0 = arith.constant 0 : index
    %c0_1 = arith.constant 0 : index
    %c0_2 = arith.constant 0 : index
    %2 = vector.load %arg6[%c0, %c0_1, %c0_2] : memref<18x18x64xf32, #tpu.memory_space<vmem>>, vector<1x18x64xf32>
    tpu.vector_store %arg6[%c0, %c0_1, %c0_2], %0 {strides = array<i32>} : memref<18x18x64xf32, #tpu.memory_space<vmem>>, vector<1x18x64xf32>,
    %c17 = arith.constant 17 : index
    %c0_3 = arith.constant 0 : index
    %c0_4 = arith.constant 0 : index
    %3 = vector.load %arg6[%c17, %c0_3, %c0_4] : memref<18x18x64xf32, #tpu.memory_space<vmem>>, vector<1x18x64xf32>
    tpu.vector_store %arg6[%c17, %c0_3, %c0_4], %0 {strides = array<i32>} : memref<18x18x64xf32, #tpu.memory_space<vmem>>, vector<1x18x64xf32>,
    %c0_5 = arith.constant 0 : index
    %c0_6 = arith.constant 0 : index
    %c0_7 = arith.constant 0 : index
    %4 = vector.load %arg6[%c0_5, %c0_6, %c0_7] : memref<18x18x64xf32, #tpu.memory_space<vmem>>, vector<18x1x64xf32>
    tpu.vector_store %arg6[%c0_5, %c0_6, %c0_7], %1 {strides = array<i32>} : memref<18x18x64xf32, #tpu.memory_space<vmem>>, vector<18x1x64xf32>,
    %c0_8 = arith.constant 0 : index
    %c17_9 = arith.constant 17 : index
    %c0_10 = arith.constant 0 : index
    %5 = vector.load %arg6[%c0_8, %c17_9, %c0_10] : memref<18x18x64xf32, #tpu.memory_space<vmem>>, vector<18x1x64xf32>
    tpu.vector_store %arg6[%c0_8, %c17_9, %c0_10], %1 {strides = array<i32>} : memref<18x18x64xf32, #tpu.memory_space<vmem>>, vector<18x1x64xf32>,
    %c0_11 = arith.constant 0 : index
    %c0_12 = arith.constant 0 : index
    %c0_13 = arith.constant 0 : index
    %c0_14 = arith.constant 0 : index
    %6 = vector.load %arg1[%c0_11, %c0_12, %c0_13, %c0_14] : memref<1x16x16x64xbf16, #tpu.memory_space<vmem>>, vector<1x16x16x64xbf16>
    %7 = vector.shape_cast %6 : vector<1x16x16x64xbf16> to vector<16x16x64xbf16>
    %8 = arith.extf %7 : vector<16x16x64xbf16> to vector<16x16x64xf32>
    %c1 = arith.constant 1 : index
    %c1_15 = arith.constant 1 : index
    %c0_16 = arith.constant 0 : index
    %9 = vector.load %arg6[%c1, %c1_15, %c0_16] : memref<18x18x64xf32, #tpu.memory_space<vmem>>, vector<16x16x64xf32>
    tpu.vector_store %arg6[%c1, %c1_15, %c0_16], %8 {strides = array<i32>} : memref<18x18x64xf32, #tpu.memory_space<vmem>>, vector<16x16x64xf32>,
    %10 = vector.extract_strided_slice %8 {offsets = [0, 0, 0], sizes = [16, 16, 32], strides = [1, 1, 1]} : vector<16x16x64xf32> to vector<16x16x32xf32>
    %11 = vector.shape_cast %10 : vector<16x16x32xf32> to vector<256x32xf32>
    %c0_17 = arith.constant 0 : index
    %c0_18 = arith.constant 0 : index
    %c0_19 = arith.constant 0 : index
    %12 = vector.load %arg6[%c0_17, %c0_18, %c0_19] : memref<18x18x64xf32, #tpu.memory_space<vmem>>, vector<16x16x64xf32>
    %13 = vector.shape_cast %12 : vector<16x16x64xf32> to vector<256x64xf32>
    %14 = arith.truncf %13 : vector<256x64xf32> to vector<256x64xbf16>
    %c0_20 = arith.constant 0 : index
    %c0_21 = arith.constant 0 : index
    %15 = vector.load %arg7[%c0_20, %c0_21] : memref<256x576xbf16, #tpu.memory_space<vmem>>, vector<256x64xbf16>
    tpu.vector_store %arg7[%c0_20, %c0_21], %14 {strides = array<i32>} : memref<256x576xbf16, #tpu.memory_space<vmem>>, vector<256x64xbf16>,
    %c0_22 = arith.constant 0 : index
    %c1_23 = arith.constant 1 : index
    %c0_24 = arith.constant 0 : index
    %16 = vector.load %arg6[%c0_22, %c1_23, %c0_24] : memref<18x18x64xf32, #tpu.memory_space<vmem>>, vector<16x16x64xf32>
    %17 = vector.shape_cast %16 : vector<16x16x64xf32> to vector<256x64xf32>
    %18 = arith.truncf %17 : vector<256x64xf32> to vector<256x64xbf16>
    %c0_25 = arith.constant 0 : index
    %c64 = arith.constant 64 : index
    %19 = vector.load %arg7[%c0_25, %c64] : memref<256x576xbf16, #tpu.memory_space<vmem>>, vector<256x64xbf16>
    tpu.vector_store %arg7[%c0_25, %c64], %18 {strides = array<i32>} : memref<256x576xbf16, #tpu.memory_space<vmem>>, vector<256x64xbf16>,
    %c0_26 = arith.constant 0 : index
    %c2 = arith.constant 2 : index
    %c0_27 = arith.constant 0 : index
    %20 = vector.load %arg6[%c0_26, %c2, %c0_27] : memref<18x18x64xf32, #tpu.memory_space<vmem>>, vector<16x16x64xf32>
    %21 = vector.shape_cast %20 : vector<16x16x64xf32> to vector<256x64xf32>
    %22 = arith.truncf %21 : vector<256x64xf32> to vector<256x64xbf16>
    %c0_28 = arith.constant 0 : index
    %c128 = arith.constant 128 : index
    %23 = vector.load %arg7[%c0_28, %c128] : memref<256x576xbf16, #tpu.memory_space<vmem>>, vector<256x64xbf16>
    tpu.vector_store %arg7[%c0_28, %c128], %22 {strides = array<i32>} : memref<256x576xbf16, #tpu.memory_space<vmem>>, vector<256x64xbf16>,
    %c1_29 = arith.constant 1 : index
    %c0_30 = arith.constant 0 : index
    %c0_31 = arith.constant 0 : index
    %24 = vector.load %arg6[%c1_29, %c0_30, %c0_31] : memref<18x18x64xf32, #tpu.memory_space<vmem>>, vector<16x16x64xf32>
    %25 = vector.shape_cast %24 : vector<16x16x64xf32> to vector<256x64xf32>
    %26 = arith.truncf %25 : vector<256x64xf32> to vector<256x64xbf16>
    %c0_32 = arith.constant 0 : index
    %c192 = arith.constant 192 : index
    %27 = vector.load %arg7[%c0_32, %c192] : memref<256x576xbf16, #tpu.memory_space<vmem>>, vector<256x64xbf16>
    tpu.vector_store %arg7[%c0_32, %c192], %26 {strides = array<i32>} : memref<256x576xbf16, #tpu.memory_space<vmem>>, vector<256x64xbf16>,
    %c1_33 = arith.constant 1 : index
    %c1_34 = arith.constant 1 : index
    %c0_35 = arith.constant 0 : index
    %28 = vector.load %arg6[%c1_33, %c1_34, %c0_35] : memref<18x18x64xf32, #tpu.memory_space<vmem>>, vector<16x16x64xf32>
    %29 = vector.shape_cast %28 : vector<16x16x64xf32> to vector<256x64xf32>
    %30 = arith.truncf %29 : vector<256x64xf32> to vector<256x64xbf16>
    %c0_36 = arith.constant 0 : index
    %c256 = arith.constant 256 : index
    %31 = vector.load %arg7[%c0_36, %c256] : memref<256x576xbf16, #tpu.memory_space<vmem>>, vector<256x64xbf16>
    tpu.vector_store %arg7[%c0_36, %c256], %30 {strides = array<i32>} : memref<256x576xbf16, #tpu.memory_space<vmem>>, vector<256x64xbf16>,
    %c1_37 = arith.constant 1 : index
    %c2_38 = arith.constant 2 : index
    %c0_39 = arith.constant 0 : index
    %32 = vector.load %arg6[%c1_37, %c2_38, %c0_39] : memref<18x18x64xf32, #tpu.memory_space<vmem>>, vector<16x16x64xf32>
    %33 = vector.shape_cast %32 : vector<16x16x64xf32> to vector<256x64xf32>
    %34 = arith.truncf %33 : vector<256x64xf32> to vector<256x64xbf16>
    %c0_40 = arith.constant 0 : index
    %c320 = arith.constant 320 : index
    %35 = vector.load %arg7[%c0_40, %c320] : memref<256x576xbf16, #tpu.memory_space<vmem>>, vector<256x64xbf16>
    tpu.vector_store %arg7[%c0_40, %c320], %34 {strides = array<i32>} : memref<256x576xbf16, #tpu.memory_space<vmem>>, vector<256x64xbf16>,
    %c2_41 = arith.constant 2 : index
    %c0_42 = arith.constant 0 : index
    %c0_43 = arith.constant 0 : index
    %36 = vector.load %arg6[%c2_41, %c0_42, %c0_43] : memref<18x18x64xf32, #tpu.memory_space<vmem>>, vector<16x16x64xf32>
    %37 = vector.shape_cast %36 : vector<16x16x64xf32> to vector<256x64xf32>
    %38 = arith.truncf %37 : vector<256x64xf32> to vector<256x64xbf16>
    %c0_44 = arith.constant 0 : index
    %c384 = arith.constant 384 : index
    %39 = vector.load %arg7[%c0_44, %c384] : memref<256x576xbf16, #tpu.memory_space<vmem>>, vector<256x64xbf16>
    tpu.vector_store %arg7[%c0_44, %c384], %38 {strides = array<i32>} : memref<256x576xbf16, #tpu.memory_space<vmem>>, vector<256x64xbf16>,
    %c2_45 = arith.constant 2 : index
    %c1_46 = arith.constant 1 : index
    %c0_47 = arith.constant 0 : index
    %40 = vector.load %arg6[%c2_45, %c1_46, %c0_47] : memref<18x18x64xf32, #tpu.memory_space<vmem>>, vector<16x16x64xf32>
    %41 = vector.shape_cast %40 : vector<16x16x64xf32> to vector<256x64xf32>
    %42 = arith.truncf %41 : vector<256x64xf32> to vector<256x64xbf16>
    %c0_48 = arith.constant 0 : index
    %c448 = arith.constant 448 : index
    %43 = vector.load %arg7[%c0_48, %c448] : memref<256x576xbf16, #tpu.memory_space<vmem>>, vector<256x64xbf16>
    tpu.vector_store %arg7[%c0_48, %c448], %42 {strides = array<i32>} : memref<256x576xbf16, #tpu.memory_space<vmem>>, vector<256x64xbf16>,
    %c2_49 = arith.constant 2 : index
    %c2_50 = arith.constant 2 : index
    %c0_51 = arith.constant 0 : index
    %44 = vector.load %arg6[%c2_49, %c2_50, %c0_51] : memref<18x18x64xf32, #tpu.memory_space<vmem>>, vector<16x16x64xf32>
    %45 = vector.shape_cast %44 : vector<16x16x64xf32> to vector<256x64xf32>
    %46 = arith.truncf %45 : vector<256x64xf32> to vector<256x64xbf16>
    %c0_52 = arith.constant 0 : index
    %c512 = arith.constant 512 : index
    %47 = vector.load %arg7[%c0_52, %c512] : memref<256x576xbf16, #tpu.memory_space<vmem>>, vector<256x64xbf16>
    tpu.vector_store %arg7[%c0_52, %c512], %46 {strides = array<i32>} : memref<256x576xbf16, #tpu.memory_space<vmem>>, vector<256x64xbf16>,
    %c0_53 = arith.constant 0 : index
    %c0_54 = arith.constant 0 : index
    %48 = vector.load %arg7[%c0_53, %c0_54] : memref<256x576xbf16, #tpu.memory_space<vmem>>, vector<256x576xbf16>
    %c0_55 = arith.constant 0 : index
    %c0_56 = arith.constant 0 : index
    %49 = vector.load %arg2[%c0_55, %c0_56] : memref<576x96xbf16, #tpu.memory_space<vmem>>, vector<576x96xbf16>
    %cst_57 = arith.constant dense<0.000000e+00> : vector<256x96xf32>
    %50 = tpu.matmul %48, %49, %cst_57 {dimension_numbers = #tpu.dot_dimension_numbers<[1], [0], [0], [1], [0, 0, 1, 1], [], []>} : vector<256x576xbf16>, vector<576x96xbf16>, vector<256x96xf32> -> vector<256x96xf32>
    %c0_58 = arith.constant 0 : index
    %c0_59 = arith.constant 0 : index
    %51 = vector.load %arg3[%c0_58, %c0_59] : memref<1x96xf32, #tpu.memory_space<vmem>>, vector<1x96xf32>
    %52 = vector.broadcast %51 : vector<1x96xf32> to vector<256x96xf32>
    %53 = arith.addf %50, %52 : vector<256x96xf32>
    %54 = vector.extract_strided_slice %53 {offsets = [0, 0], sizes = [256, 64], strides = [1, 1]} : vector<256x96xf32> to vector<256x64xf32>
    %cst_60 = arith.constant 0.000000e+00 : f32
    %55 = vector.broadcast %cst_60 : f32 to vector<256x64xf32>
    %56 = arith.subf %55, %54 : vector<256x64xf32>
    %57 = math.exp %56 : vector<256x64xf32>
    %cst_61 = arith.constant 1.000000e+00 : f32
    %58 = vector.broadcast %cst_61 : f32 to vector<256x64xf32>
    %59 = arith.addf %58, %57 : vector<256x64xf32>
    %cst_62 = arith.constant 1.000000e+00 : f32
    %60 = vector.broadcast %cst_62 : f32 to vector<256x64xf32>
    %61 = arith.divf %60, %59 : vector<256x64xf32>
    %62 = vector.extract_strided_slice %61 {offsets = [0, 0], sizes = [256, 32], strides = [1, 1]} : vector<256x64xf32> to vector<256x32xf32>
    %63 = vector.extract_strided_slice %61 {offsets = [0, 32], sizes = [256, 32], strides = [1, 1]} : vector<256x64xf32> to vector<256x32xf32>
    %64 = vector.extract_strided_slice %53 {offsets = [0, 64], sizes = [256, 32], strides = [1, 1]} : vector<256x96xf32> to vector<256x32xf32>
    %65 = arith.mulf %63, %11 : vector<256x32xf32>
    %66 = vector.shape_cast %65 : vector<256x32xf32> to vector<16x16x32xf32>
    %c1_63 = arith.constant 1 : index
    %c1_64 = arith.constant 1 : index
    %c0_65 = arith.constant 0 : index
    %67 = vector.load %arg6[%c1_63, %c1_64, %c0_65] : memref<18x18x64xf32, #tpu.memory_space<vmem>>, vector<16x16x32xf32>
    tpu.vector_store %arg6[%c1_63, %c1_64, %c0_65], %66 {strides = array<i32>} : memref<18x18x64xf32, #tpu.memory_space<vmem>>, vector<16x16x32xf32>,
    %c0_66 = arith.constant 0 : index
    %c0_67 = arith.constant 0 : index
    %c0_68 = arith.constant 0 : index
    %68 = vector.load %arg6[%c0_66, %c0_67, %c0_68] : memref<18x18x64xf32, #tpu.memory_space<vmem>>, vector<16x16x32xf32>
    %69 = vector.shape_cast %68 : vector<16x16x32xf32> to vector<256x32xf32>
    %70 = arith.truncf %69 : vector<256x32xf32> to vector<256x32xbf16>
    %c0_69 = arith.constant 0 : index
    %c0_70 = arith.constant 0 : index
    %71 = vector.load %arg8[%c0_69, %c0_70] : memref<256x288xbf16, #tpu.memory_space<vmem>>, vector<256x32xbf16>
    tpu.vector_store %arg8[%c0_69, %c0_70], %70 {strides = array<i32>} : memref<256x288xbf16, #tpu.memory_space<vmem>>, vector<256x32xbf16>,
    %c0_71 = arith.constant 0 : index
    %c1_72 = arith.constant 1 : index
    %c0_73 = arith.constant 0 : index
    %72 = vector.load %arg6[%c0_71, %c1_72, %c0_73] : memref<18x18x64xf32, #tpu.memory_space<vmem>>, vector<16x16x32xf32>
    %73 = vector.shape_cast %72 : vector<16x16x32xf32> to vector<256x32xf32>
    %74 = arith.truncf %73 : vector<256x32xf32> to vector<256x32xbf16>
    %c0_74 = arith.constant 0 : index
    %c32 = arith.constant 32 : index
    %75 = vector.load %arg8[%c0_74, %c32] : memref<256x288xbf16, #tpu.memory_space<vmem>>, vector<256x32xbf16>
    tpu.vector_store %arg8[%c0_74, %c32], %74 {strides = array<i32>} : memref<256x288xbf16, #tpu.memory_space<vmem>>, vector<256x32xbf16>,
    %c0_75 = arith.constant 0 : index
    %c2_76 = arith.constant 2 : index
    %c0_77 = arith.constant 0 : index
    %76 = vector.load %arg6[%c0_75, %c2_76, %c0_77] : memref<18x18x64xf32, #tpu.memory_space<vmem>>, vector<16x16x32xf32>
    %77 = vector.shape_cast %76 : vector<16x16x32xf32> to vector<256x32xf32>
    %78 = arith.truncf %77 : vector<256x32xf32> to vector<256x32xbf16>
    %c0_78 = arith.constant 0 : index
    %c64_79 = arith.constant 64 : index
    %79 = vector.load %arg8[%c0_78, %c64_79] : memref<256x288xbf16, #tpu.memory_space<vmem>>, vector<256x32xbf16>
    tpu.vector_store %arg8[%c0_78, %c64_79], %78 {strides = array<i32>} : memref<256x288xbf16, #tpu.memory_space<vmem>>, vector<256x32xbf16>,
    %c1_80 = arith.constant 1 : index
    %c0_81 = arith.constant 0 : index
    %c0_82 = arith.constant 0 : index
    %80 = vector.load %arg6[%c1_80, %c0_81, %c0_82] : memref<18x18x64xf32, #tpu.memory_space<vmem>>, vector<16x16x32xf32>
    %81 = vector.shape_cast %80 : vector<16x16x32xf32> to vector<256x32xf32>
    %82 = arith.truncf %81 : vector<256x32xf32> to vector<256x32xbf16>
    %c0_83 = arith.constant 0 : index
    %c96 = arith.constant 96 : index
    %83 = vector.load %arg8[%c0_83, %c96] : memref<256x288xbf16, #tpu.memory_space<vmem>>, vector<256x32xbf16>
    tpu.vector_store %arg8[%c0_83, %c96], %82 {strides = array<i32>} : memref<256x288xbf16, #tpu.memory_space<vmem>>, vector<256x32xbf16>,
    %c1_84 = arith.constant 1 : index
    %c1_85 = arith.constant 1 : index
    %c0_86 = arith.constant 0 : index
    %84 = vector.load %arg6[%c1_84, %c1_85, %c0_86] : memref<18x18x64xf32, #tpu.memory_space<vmem>>, vector<16x16x32xf32>
    %85 = vector.shape_cast %84 : vector<16x16x32xf32> to vector<256x32xf32>
    %86 = arith.truncf %85 : vector<256x32xf32> to vector<256x32xbf16>
    %c0_87 = arith.constant 0 : index
    %c128_88 = arith.constant 128 : index
    %87 = vector.load %arg8[%c0_87, %c128_88] : memref<256x288xbf16, #tpu.memory_space<vmem>>, vector<256x32xbf16>
    tpu.vector_store %arg8[%c0_87, %c128_88], %86 {strides = array<i32>} : memref<256x288xbf16, #tpu.memory_space<vmem>>, vector<256x32xbf16>,
    %c1_89 = arith.constant 1 : index
    %c2_90 = arith.constant 2 : index
    %c0_91 = arith.constant 0 : index
    %88 = vector.load %arg6[%c1_89, %c2_90, %c0_91] : memref<18x18x64xf32, #tpu.memory_space<vmem>>, vector<16x16x32xf32>
    %89 = vector.shape_cast %88 : vector<16x16x32xf32> to vector<256x32xf32>
    %90 = arith.truncf %89 : vector<256x32xf32> to vector<256x32xbf16>
    %c0_92 = arith.constant 0 : index
    %c160 = arith.constant 160 : index
    %91 = vector.load %arg8[%c0_92, %c160] : memref<256x288xbf16, #tpu.memory_space<vmem>>, vector<256x32xbf16>
    tpu.vector_store %arg8[%c0_92, %c160], %90 {strides = array<i32>} : memref<256x288xbf16, #tpu.memory_space<vmem>>, vector<256x32xbf16>,
    %c2_93 = arith.constant 2 : index
    %c0_94 = arith.constant 0 : index
    %c0_95 = arith.constant 0 : index
    %92 = vector.load %arg6[%c2_93, %c0_94, %c0_95] : memref<18x18x64xf32, #tpu.memory_space<vmem>>, vector<16x16x32xf32>
    %93 = vector.shape_cast %92 : vector<16x16x32xf32> to vector<256x32xf32>
    %94 = arith.truncf %93 : vector<256x32xf32> to vector<256x32xbf16>
    %c0_96 = arith.constant 0 : index
    %c192_97 = arith.constant 192 : index
    %95 = vector.load %arg8[%c0_96, %c192_97] : memref<256x288xbf16, #tpu.memory_space<vmem>>, vector<256x32xbf16>
    tpu.vector_store %arg8[%c0_96, %c192_97], %94 {strides = array<i32>} : memref<256x288xbf16, #tpu.memory_space<vmem>>, vector<256x32xbf16>,
    %c2_98 = arith.constant 2 : index
    %c1_99 = arith.constant 1 : index
    %c0_100 = arith.constant 0 : index
    %96 = vector.load %arg6[%c2_98, %c1_99, %c0_100] : memref<18x18x64xf32, #tpu.memory_space<vmem>>, vector<16x16x32xf32>
    %97 = vector.shape_cast %96 : vector<16x16x32xf32> to vector<256x32xf32>
    %98 = arith.truncf %97 : vector<256x32xf32> to vector<256x32xbf16>
    %c0_101 = arith.constant 0 : index
    %c224 = arith.constant 224 : index
    %99 = vector.load %arg8[%c0_101, %c224] : memref<256x288xbf16, #tpu.memory_space<vmem>>, vector<256x32xbf16>
    tpu.vector_store %arg8[%c0_101, %c224], %98 {strides = array<i32>} : memref<256x288xbf16, #tpu.memory_space<vmem>>, vector<256x32xbf16>,
    %c2_102 = arith.constant 2 : index
    %c2_103 = arith.constant 2 : index
    %c0_104 = arith.constant 0 : index
    %100 = vector.load %arg6[%c2_102, %c2_103, %c0_104] : memref<18x18x64xf32, #tpu.memory_space<vmem>>, vector<16x16x32xf32>
    %101 = vector.shape_cast %100 : vector<16x16x32xf32> to vector<256x32xf32>
    %102 = arith.truncf %101 : vector<256x32xf32> to vector<256x32xbf16>
    %c0_105 = arith.constant 0 : index
    %c256_106 = arith.constant 256 : index
    %103 = vector.load %arg8[%c0_105, %c256_106] : memref<256x288xbf16, #tpu.memory_space<vmem>>, vector<256x32xbf16>
    tpu.vector_store %arg8[%c0_105, %c256_106], %102 {strides = array<i32>} : memref<256x288xbf16, #tpu.memory_space<vmem>>, vector<256x32xbf16>,
    %c0_107 = arith.constant 0 : index
    %c0_108 = arith.constant 0 : index
    %104 = vector.load %arg8[%c0_107, %c0_108] : memref<256x288xbf16, #tpu.memory_space<vmem>>, vector<256x288xbf16>
    %c0_109 = arith.constant 0 : index
    %c0_110 = arith.constant 0 : index
    %105 = vector.load %arg4[%c0_109, %c0_110] : memref<288x32xbf16, #tpu.memory_space<vmem>>, vector<288x32xbf16>
    %cst_111 = arith.constant dense<0.000000e+00> : vector<256x32xf32>
    %106 = tpu.matmul %104, %105, %cst_111 {dimension_numbers = #tpu.dot_dimension_numbers<[1], [0], [0], [1], [0, 0, 1, 1], [], []>} : vector<256x288xbf16>, vector<288x32xbf16>, vector<256x32xf32> -> vector<256x32xf32>
    %107 = arith.addf %64, %106 : vector<256x32xf32>
    %108 = math.tanh %107 : vector<256x32xf32>
    %cst_112 = arith.constant 1.000000e+00 : f32
    %109 = vector.broadcast %cst_112 : f32 to vector<256x32xf32>
    %110 = arith.subf %109, %62 : vector<256x32xf32>
    %111 = arith.mulf %110, %11 : vector<256x32xf32>
    %112 = arith.mulf %62, %108 : vector<256x32xf32>
    %113 = arith.addf %111, %112 : vector<256x32xf32>
    %114 = vector.shape_cast %113 : vector<256x32xf32> to vector<16x16x32xf32>
    %c0_113 = arith.constant 0 : index
    %c0_114 = arith.constant 0 : index
    %c0_115 = arith.constant 0 : index
    %c0_116 = arith.constant 0 : index
    %115 = vector.load %arg5[%c0_113, %c0_114, %c0_115, %c0_116] : memref<1x16x16x32xf32, #tpu.memory_space<vmem>>, vector<1x16x16x32xf32>
    %116 = vector.shape_cast %115 : vector<1x16x16x32xf32> to vector<16x16x32xf32>
    %117 = vector.shape_cast %114 : vector<16x16x32xf32> to vector<1x16x16x32xf32>
    tpu.vector_store %arg5[%c0_113, %c0_114, %c0_115, %c0_116], %117 {strides = array<i32>} : memref<1x16x16x32xf32, #tpu.memory_space<vmem>>, vector<1x16x16x32xf32>,
    return
  }
  func.func @transform_0(%arg0: i32) -> (i32, i32, i32, i32) {
    %c0_i32 = arith.constant 0 : i32
    %c0_i32_0 = arith.constant 0 : i32
    %c0_i32_1 = arith.constant 0 : i32
    %c0_i32_2 = arith.constant 0 : i32
    return %arg0, %c0_i32, %c0_i32_0, %c0_i32_1 : i32, i32, i32, i32
  }
  func.func @transform_1(%arg0: i32) -> (i32, i32) {
    %c0_i32 = arith.constant 0 : i32
    %c0_i32_0 = arith.constant 0 : i32
    %c0_i32_1 = arith.constant 0 : i32
    return %c0_i32, %c0_i32_0 : i32, i32
  }
  func.func @transform_2(%arg0: i32) -> (i32, i32) {
    %c0_i32 = arith.constant 0 : i32
    %c0_i32_0 = arith.constant 0 : i32
    %c0_i32_1 = arith.constant 0 : i32
    return %c0_i32, %c0_i32_0 : i32, i32
  }
  func.func @transform_3(%arg0: i32) -> (i32, i32) {
    %c0_i32 = arith.constant 0 : i32
    %c0_i32_0 = arith.constant 0 : i32
    %c0_i32_1 = arith.constant 0 : i32
    return %c0_i32, %c0_i32_0 : i32, i32
  }
  func.func @transform_4(%arg0: i32) -> (i32, i32, i32, i32) {
    %c0_i32 = arith.constant 0 : i32
    %c0_i32_0 = arith.constant 0 : i32
    %c0_i32_1 = arith.constant 0 : i32
    %c0_i32_2 = arith.constant 0 : i32
    return %arg0, %c0_i32, %c0_i32_0, %c0_i32_1 : i32, i32, i32, i32
  }
}

</mosaic_0001>

<bundles_post_ra>
// kernel: conv_gru.1
= control target key start
LH: loop header
LB: loop body
LE: loop exit
PB: predicated region body
PF: predicated region fallthrough
CT: control target
= control target key end

     0   :  { %9 = vsyncpa [#allocation6], 0  ;;  %s8046_s0 = inlined_call_operand.vmem [shape: bf16[2,16,16,64], index: 0, kind: input, shape index: {}]   ;;  %s8047_s1 = inlined_call_operand.vmem [shape: bf16[576,96], index: 1, kind: input, shape index: {}]   ;;  %s8048_s2 = inlined_call_operand.vmem [shape: f32[1,96], index: 2, kind: input, shape index: {}]   ;;  %s8049_s3 = inlined_call_operand.vmem [shape: bf16[288,32], index: 3, kind: input, shape index: {}]   ;;  %s8050_s4 = inlined_call_operand.hbm [shape: f32[2,16,16,32], index: 4, kind: output, shape index: {}]  }
   0x1   :  { %11 = vsyncpa [#allocation6 + $0x1], 0  ;;  %s5771_s15 = smov 0   ;;  %s5773_s16 = smov 0  }
   0x2   :  { %s5775_s17 = smov 0   ;;  %s5777_s18 = smov 0  }
   0x3 LB: > { %s5792_s19 = sadd.s32 4294967295, %s5737_s18   ;;  %s4674_s20 = sadd.s32 4294967294, %s5737_s18   ;;  %s5737_s18 = sphi %s5777_s18, %s8365_s18   ;;  %s5733_s17 = sphi %s5775_s17, %s8364_s17   ;;  %s5729_s16 = sphi %s5773_s16, %s8363_s16   ;;  %s5725_s15 = sphi %s5771_s15, %s8362_s15  }
   0x4   : > { %s5796_s21 = sadd.s32 1, %s5737_s18   ;;  %s113_s22 = sadd.s32 1, %s5733_s17 }
   0x5   : > { %s110_s23 = ssub.s32 %s5737_s18, %s5796_s21  ;;  %p123_p0 = scmp.ne.s32.totalorder %s5733_s17, %s5729_s16 }
   0x6   : > { %p111_p1 = scmp.eq.s32.totalorder %s110_s23, 0  ;;  %p124_p2 = scmp.eq.s32.totalorder %s5792_s19, 1 }
   0x7   : > { %p129_p3 = scmp.ne.s32.totalorder %s5729_s16, %s5725_s15  ;;  %p130_p4 = scmp.eq.s32.totalorder %s4674_s20, 1 }
   0x8   : > { %s5807_s24 = scalar_select %p111_p1, %s5733_s17, %s113_s22  }
   0x9   : > { %p5809_p5 = por %p124_p2, %p123_p0  ;;  %p5813_p6 = por %p130_p4, %p129_p3 }
   0xa   : > { %p4677_p7 = scmp.ge.s32.totalorder %s5737_s18, 1  ;;  %p165_p8 = scmp.lt.s32.totalorder %s5737_s18, 3 }
   0xc   : > { %p166_p9 = pnand %p4677_p7, %p165_p8 }
   0xe   : > { %169 = sbr.rel (%p166_p9) target bundleno = 1480 (0x5c8), region = 36 }
  0x15   : > { %p191_p10 = scmp.lt.s32.totalorder %s5792_s19, 1  ;;  %vm197_vm0 = vcmask 523264   ;;  %vm206_vm1 = vcmask 516096   ;;  %vm200_vm2 = vcmask 517120   ;;  %v5739_v0 = vmov 0.0   ;;  %v5429_v1 = vld [vmem:[%s8047_s1 + $0x40] sm:$0xff]  }
  0x16   : > { %208 = vst.msk [vmem:[#allocation2 + $0x18] sm:$0x1] %vm206_vm1, %v5739_v0  ;;  %209 = vst.msk [vmem:[#allocation2 + $0x30] sm:$0x1] %vm206_vm1, %v5739_v0  ;;  %v5430_v2 = vld [vmem:[%s8047_s1] sm:$0xff]   ;;  %4854 = vmatprep.subr.bf16.mxu0 %v5429_v1  ;;  %v5431_v3 = vld [vmem:[%s8047_s1 + $0x48] sm:$0xff]  }
  0x17   : > { %198 = vst.msk [vmem:[#allocation2] sm:$0xff] %vm197_vm0, %v5739_v0  ;;  %199 = vst.msk [vmem:[#allocation2 + $0x8] sm:$0xff] %vm197_vm0, %v5739_v0  ;;  %s192_s29 = scalar_select %p191_p10, %s5792_s19, 1  ;;  %4855 = vmatpush3.bf16.msra.mxu0 %v5430_v2  ;;  %v5432_v4 = vld [vmem:[%s8047_s1 + $0x8] sm:$0xff]   ;;  %v5433_v5 = vld [vmem:[%s8047_s1 + $0x50] sm:$0xff]   ;;  %vm516_vm3 = vcmask 1048064  }
  0x18   : > { %203 = vst.msk [vmem:[#allocation2 + $0x198] sm:$0xff] %vm197_vm0, %v5739_v0  ;;  %204 = vst.msk [vmem:[#allocation2 + $0x1a0] sm:$0xff] %vm197_vm0, %v5739_v0  ;;  %4856 = vmatprep.subr.bf16.mxu0 %v5431_v3  ;;  %v5434_v45 = vld [vmem:[%s8047_s1 + $0x10] sm:$0xff]   ;;  %v5435_v50 = vld [vmem:[%s8047_s1 + $0x58] sm:$0xff]   ;;  %s5740_s7 = smov 64   ;;  %s5741_s14 = smov 32  }
  0x19   : > { %210 = vst.msk [vmem:[#allocation2 + $0x48] sm:$0x1] %vm206_vm1, %v5739_v0  ;;  %211 = vst.msk [vmem:[#allocation2 + $0x60] sm:$0x1] %vm206_vm1, %v5739_v0  ;;  %s4773_s8 = sshll.u32 %s192_s29, 7  ;;  %v5436_v57 = vld [vmem:[%s8047_s1 + $0x18] sm:$0xff]  }
  0x1a   : > { %212 = vst.msk [vmem:[#allocation2 + $0x78] sm:$0x1] %vm206_vm1, %v5739_v0  ;;  %213 = vst.msk [vmem:[#allocation2 + $0x90] sm:$0x1] %vm206_vm1, %v5739_v0  ;;  %s5880_s13 = scalar_lea.vmem %s8046_s0, %s4773_s8  ;;  %v5437_v59 = vld [vmem:[%s8047_s1 + $0x60] sm:$0xff]   ;;  %vm2560_vm4 = vcmask 261120  }
  0x1b   : > { %214 = vst.msk [vmem:[#allocation2 + $0xa8] sm:$0x1] %vm206_vm1, %v5739_v0  ;;  %215 = vst.msk [vmem:[#allocation2 + $0xc0] sm:$0x1] %vm206_vm1, %v5739_v0  ;;  %v4776_v6 = vld [vmem:[%s5880_s13] sm:$0xff]   ;;  %v4839_v7 = vld [vmem:[%s5880_s13 + $0x8] sm:$0xff]   ;;  %4857 = vmatpush3.bf16.msra.mxu0 %v5432_v4 }
  0x1c   : > { %216 = vst.msk [vmem:[#allocation2 + $0xd8] sm:$0x1] %vm206_vm1, %v5739_v0  ;;  %217 = vst.msk [vmem:[#allocation2 + $0xf0] sm:$0x1] %vm206_vm1, %v5739_v0  ;;  %v4840_v8 = vld [vmem:[%s5880_s13 + $0x10] sm:$0xff]   ;;  %v5888_v9 = vunpack.c.l.bf16 %v4776_v6  ;;  %v5890_v10 = vunpack.c.h.bf16 %v4776_v6  ;;  %v5892_v11 = vunpack.c.l.bf16 %v4839_v7  ;;  %v5894_v12 = vunpack.c.h.bf16 %v4839_v7  ;;  %v4841_v13 = vld [vmem:[%s5880_s13 + $0x18] sm:$0xff]   ;;  %4858 = vmatprep.subr.bf16.mxu0 %v5433_v5 }
  0x1d   : > { %218 = vst.msk [vmem:[#allocation2 + $0x108] sm:$0x1] %vm206_vm1, %v5739_v0  ;;  %219 = vst.msk [vmem:[#allocation2 + $0x120] sm:$0x1] %vm206_vm1, %v5739_v0  ;;  %v4842_v14 = vld [vmem:[%s5880_s13 + $0x20] sm:$0xff]   ;;  %v4843_v15 = vld [vmem:[%s5880_s13 + $0x28] sm:$0xff]   ;;  %v5899_v16 = vunpack.c.l.bf16 %v4840_v8  ;;  %v5901_v17 = vunpack.c.h.bf16 %v4840_v8  ;;  %v5903_v18 = vunpack.c.l.bf16 %v4841_v13  ;;  %v5905_v19 = vunpack.c.h.bf16 %v4841_v13 }
  0x1e   : > { %220 = vst.msk [vmem:[#allocation2 + $0x138] sm:$0x1] %vm206_vm1, %v5739_v0  ;;  %221 = vst.msk [vmem:[#allocation2 + $0x150] sm:$0x1] %vm206_vm1, %v5739_v0  ;;  %v4844_v20 = vld [vmem:[%s5880_s13 + $0x30] sm:$0xff]   ;;  %v5916_v21 = vunpack.c.l.bf16 %v4842_v14  ;;  %v5918_v22 = vunpack.c.h.bf16 %v4842_v14  ;;  %v5920_v23 = vunpack.c.l.bf16 %v4843_v15  ;;  %v4845_v24 = vld [vmem:[%s5880_s13 + $0x38] sm:$0xff]   ;;  %v5933_v27 = vunpack.c.h.bf16 %v4843_v15 }
  0x1f   : > { %222 = vst.msk [vmem:[#allocation2 + $0x168] sm:$0x1] %vm206_vm1, %v5739_v0  ;;  %223 = vst.msk [vmem:[#allocation2 + $0x180] sm:$0x1] %vm206_vm1, %v5739_v0  ;;  %v4846_v25 = vld [vmem:[%s5880_s13 + $0x40] sm:$0xff]   ;;  %v4847_v26 = vld [vmem:[%s5880_s13 + $0x48] sm:$0xff]   ;;  %v5935_v28 = vunpack.c.l.bf16 %v4844_v20  ;;  %v5937_v29 = vunpack.c.h.bf16 %v4844_v20  ;;  %v5939_v30 = vunpack.c.l.bf16 %v4845_v24  ;;  %v5950_v34 = vunpack.c.h.bf16 %v4845_v24  ;;  %4859 = vmatpush3.bf16.msra.mxu0 %v5434_v45 }
  0x20   : > { %226 = vst.msk [vmem:[#allocation2 + $0x29] sm:$0x1] %vm206_vm1, %v5739_v0  ;;  %227 = vst.msk [vmem:[#allocation2 + $0x41] sm:$0x1] %vm206_vm1, %v5739_v0  ;;  %v4848_v31 = vld [vmem:[%s5880_s13 + $0x50] sm:$0xff]   ;;  %v4849_v32 = vld [vmem:[%s5880_s13 + $0x58] sm:$0xff]   ;;  %v5952_v35 = vunpack.c.l.bf16 %v4846_v25  ;;  %v5954_v36 = vunpack.c.h.bf16 %v4846_v25  ;;  %v5956_v37 = vunpack.c.l.bf16 %v4847_v26  ;;  %v5969_v41 = vunpack.c.h.bf16 %v4847_v26  ;;  %4860 = vmatprep.subr.bf16.mxu0 %v5435_v50 }
  0x21   : > { %228 = vst.msk [vmem:[#allocation2 + $0x59] sm:$0x1] %vm206_vm1, %v5739_v0  ;;  %229 = vst.msk [vmem:[#allocation2 + $0x71] sm:$0x1] %vm206_vm1, %v5739_v0  ;;  %v4850_v33 = vld [vmem:[%s5880_s13 + $0x60] sm:$0xff]   ;;  %v4851_v38 = vld [vmem:[%s5880_s13 + $0x68] sm:$0xff]   ;;  %v5971_v42 = vunpack.c.l.bf16 %v4848_v31  ;;  %v5973_v43 = vunpack.c.h.bf16 %v4848_v31  ;;  %v5975_v44 = vunpack.c.l.bf16 %v4849_v32  ;;  %v5988_v46 = vunpack.c.h.bf16 %v4849_v32 }
  0x22   : > { %230 = vst.msk [vmem:[#allocation2 + $0x89] sm:$0x1] %vm206_vm1, %v5739_v0  ;;  %231 = vst.msk [vmem:[#allocation2 + $0xa1] sm:$0x1] %vm206_vm1, %v5739_v0  ;;  %v4852_v39 = vld [vmem:[%s5880_s13 + $0x70] sm:$0xff]   ;;  %v4853_v40 = vld [vmem:[%s5880_s13 + $0x78] sm:$0xff]   ;;  %v5990_v47 = vunpack.c.l.bf16 %v4850_v33  ;;  %v5992_v48 = vunpack.c.h.bf16 %v4850_v33  ;;  %v5994_v49 = vunpack.c.l.bf16 %v4851_v38  ;;  %v6007_v53 = vunpack.c.h.bf16 %v4851_v38 }
  0x23   : > { %232 = vst.msk [vmem:[#allocation2 + $0xb9] sm:$0x1] %vm206_vm1, %v5739_v0  ;;  %233 = vst.msk [vmem:[#allocation2 + $0xd1] sm:$0x1] %vm206_vm1, %v5739_v0  ;;  %v404_v51 = vld [vmem:[#allocation2 + $0x1] sm:$0xff]  ;;  %v6009_v54 = vunpack.c.l.bf16 %v4852_v39  ;;  %v6011_v55 = vunpack.c.h.bf16 %v4852_v39  ;;  %v6013_v56 = vunpack.c.l.bf16 %v4853_v40  ;;  %v6026_v58 = vunpack.c.h.bf16 %v4853_v40  ;;  %4861 = vmatpush3.bf16.msra.mxu0 %v5436_v57  ;;  %s5742_s23 = smov 96  }
  0x24   : > { %234 = vst.msk [vmem:[#allocation2 + $0xe9] sm:$0x1] %vm206_vm1, %v5739_v0  ;;  %235 = vst.msk [vmem:[#allocation2 + $0x101] sm:$0x1] %vm206_vm1, %v5739_v0  ;;  %4862 = vmatprep.subr.bf16.mxu0 %v5437_v59  ;;  %vm2769_vm5 = vcmask 523520   ;;  %vm2898_vm6 = vcmask 785920  }
  0x25   : > { %236 = vst.msk [vmem:[#allocation2 + $0x119] sm:$0x1] %vm206_vm1, %v5739_v0  ;;  %237 = vst.msk [vmem:[#allocation2 + $0x131] sm:$0x1] %vm206_vm1, %v5739_v0  ;;  %vm3027_vm7 = vcmask 1048320   ;;  %s5743_s27 = smov [#allocation5]  }
  0x26   : > { %238 = vst.msk [vmem:[#allocation2 + $0x149] sm:$0x1] %vm206_vm1, %v5739_v0  ;;  %239 = vst.msk [vmem:[#allocation2 + $0x161] sm:$0x1] %vm206_vm1, %v5739_v0  ;;  %s5679_s28 = sshll.u32 %s5743_s27, 4  ;;  %s5680_s28 = int_to_ptr.vmem [resolvable:$false] %s5679_s28 }
  0x27   : > { %240 = vst.msk [vmem:[#allocation2 + $0x179] sm:$0x1] %vm206_vm1, %v5739_v0  ;;  %241 = vst.msk [vmem:[#allocation2 + $0x191] sm:$0x1] %vm206_vm1, %v5739_v0  ;;  %s5681_s29 = scalar_lea.vmem %s5680_s28, 8192 }
  0x28   : > { %201 = vst.msk [vmem:[#allocation2 + $0x10] sm:$0x3] %vm200_vm2, %v5739_v0  ;;  %205 = vst.msk [vmem:[#allocation2 + $0x1a8] sm:$0x3] %vm200_vm2, %v5739_v0 }
  0x29   : > { %207 = vst.msk [vmem:[#allocation2] sm:$0x1] %vm206_vm1, %v5739_v0  ;;  %224 = vst.msk [vmem:[#allocation2 + $0x198] sm:$0x1] %vm206_vm1, %v5739_v0 }
  0x2a   : > { %225 = vst.msk [vmem:[#allocation2 + $0x11] sm:$0x1] %vm206_vm1, %v5739_v0  ;;  %242 = vst.msk [vmem:[#allocation2 + $0x1a9] sm:$0x1] %vm206_vm1, %v5739_v0 }
  0x2b   : > { %8178 = vst [vmem:[#allocation8_spill] sm:$0xff] %v5888_v9  ;;  %8179 = vst [vmem:[#allocation9_spill] sm:$0xff] %v5890_v10 }
  0x2c   : > { %8180 = vst [vmem:[#allocation10_spill] sm:$0xff] %v5892_v11  ;;  %8181 = vst [vmem:[#allocation11_spill] sm:$0xff] %v5894_v12 }
  0x2d   : > { %8182 = vst [vmem:[#allocation12_spill] sm:$0xff] %v5899_v16  ;;  %8183 = vst [vmem:[#allocation13_spill] sm:$0xff] %v5901_v17 }
  0x2e   : > { %8184 = vst [vmem:[#allocation14_spill] sm:$0xff] %v5903_v18  ;;  %8185 = vst [vmem:[#allocation15_spill] sm:$0xff] %v5905_v19 }
  0x2f   : > { %308 = vst.msk [vmem:[#allocation2 + $0x19] sm:$0xff] %vm197_vm0, %v5888_v9  ;;  %309 = vst.msk [vmem:[#allocation2 + $0x21] sm:$0xff] %vm197_vm0, %v5890_v10  ;;  %v405_v52 = vld [vmem:[#allocation2 + $0x9] sm:$0xff] }
  0x30   : > { %310 = vst.msk [vmem:[#allocation2 + $0x31] sm:$0xff] %vm197_vm0, %v5892_v11  ;;  %311 = vst.msk [vmem:[#allocation2 + $0x39] sm:$0xff] %vm197_vm0, %v5894_v12  ;;  %v436_v6 = vpack.c.bf16 %v405_v52, %v404_v51 }
  0x31   : > { %8186 = vst [vmem:[#allocation16_spill] sm:$0xff] %v5916_v21  ;;  %8187 = vst [vmem:[#allocation17_spill] sm:$0xff] %v5918_v22 }
  0x32   : > { %8188 = vst [vmem:[#allocation18_spill] sm:$0xff] %v5920_v23  ;;  %312 = vst.msk [vmem:[#allocation2 + $0x49] sm:$0xff] %vm197_vm0, %v5899_v16 }
  0x33   : > { %313 = vst.msk [vmem:[#allocation2 + $0x51] sm:$0xff] %vm197_vm0, %v5901_v17  ;;  %314 = vst.msk [vmem:[#allocation2 + $0x61] sm:$0xff] %vm197_vm0, %v5903_v18 }
  0x34   : > { %315 = vst.msk [vmem:[#allocation2 + $0x69] sm:$0xff] %vm197_vm0, %v5905_v19  ;;  %8189 = vst [vmem:[#allocation19_spill] sm:$0xff] %v5933_v27 }
  0x35   : > { %8190 = vst [vmem:[#allocation20_spill] sm:$0xff] %v5935_v28  ;;  %8191 = vst [vmem:[#allocation21_spill] sm:$0xff] %v5937_v29 }
  0x36   : > { %8192 = vst [vmem:[#allocation22_spill] sm:$0xff] %v5939_v30  ;;  %316 = vst.msk [vmem:[#allocation2 + $0x79] sm:$0xff] %vm197_vm0, %v5916_v21  ;;  %v597_v60 = vld [vmem:[#allocation2 + $0x18] sm:$0xff]  ;;  %v598_v61 = vld [vmem:[#allocation2 + $0x20] sm:$0xff] }
  0x37   : > { %317 = vst.msk [vmem:[#allocation2 + $0x81] sm:$0xff] %vm197_vm0, %v5918_v22  ;;  %318 = vst.msk [vmem:[#allocation2 + $0x91] sm:$0xff] %vm197_vm0, %v5920_v23  ;;  %v599_v62 = vld [vmem:[#allocation2 + $0x30] sm:$0xff]  ;;  %v629_v63 = vpack.c.bf16 %v598_v61, %v597_v60  ;;  %v600_v0 = vld [vmem:[#allocation2 + $0x38] sm:$0xff] }
  0x38   : > { %8193 = vst [vmem:[#allocation23_spill] sm:$0xff] %v5950_v34  ;;  %8194 = vst [vmem:[#allocation24_spill] sm:$0xff] %v5952_v35  ;;  %v406_v1 = vld [vmem:[#allocation2 + $0x19] sm:$0xff]  ;;  %v407_v2 = vld [vmem:[#allocation2 + $0x21] sm:$0xff]  ;;  %v630_v3 = vpack.c.bf16 %v600_v0, %v599_v62 }
  0x39   : > { %8195 = vst [vmem:[#allocation25_spill] sm:$0xff] %v5954_v36  ;;  %8196 = vst [vmem:[#allocation26_spill] sm:$0xff] %v5956_v37  ;;  %v601_v4 = vld [vmem:[#allocation2 + $0x48] sm:$0xff]  ;;  %661 = vrot.lane.b32.xlu0 %v629_v63, %s5740_s7  ;;  %v437_v14 = vpack.c.bf16 %v407_v2, %v406_v1  ;;  %v408_v24 = vld [vmem:[#allocation2 + $0x31] sm:$0xff] }
  0x3a   : > { %319 = vst.msk [vmem:[#allocation2 + $0x99] sm:$0xff] %vm197_vm0, %v5933_v27  ;;  %320 = vst.msk [vmem:[#allocation2 + $0xa9] sm:$0xff] %vm197_vm0, %v5935_v28  ;;  %v602_v5 = vld [vmem:[#allocation2 + $0x50] sm:$0xff]  ;;  %v603_v8 = vld [vmem:[#allocation2 + $0x60] sm:$0xff]  ;;  %663 = vrot.lane.b32.xlu1 %v630_v3, %s5740_s7 }
  0x3b   : > { %321 = vst.msk [vmem:[#allocation2 + $0xb1] sm:$0xff] %vm197_vm0, %v5937_v29  ;;  %322 = vst.msk [vmem:[#allocation2 + $0xc1] sm:$0xff] %vm197_vm0, %v5939_v30  ;;  %v631_v7 = vpack.c.bf16 %v602_v5, %v601_v4  ;;  %v604_v13 = vld [vmem:[#allocation2 + $0x68] sm:$0xff]  ;;  %v409_v25 = vld [vmem:[#allocation2 + $0x39] sm:$0xff] }
  0x3c   : > { %8197 = vst [vmem:[#allocation27_spill] sm:$0xff] %v5969_v41  ;;  %8198 = vst [vmem:[#allocation28_spill] sm:$0xff] %v5971_v42  ;;  %v632_v15 = vpack.c.bf16 %v604_v13, %v603_v8  ;;  %v6051_v45 = vpack.c.bf16 %v409_v25, %v408_v24  ;;  %v410_v52 = vld [vmem:[#allocation2 + $0x49] sm:$0xff]  ;;  %v411_v57 = vld [vmem:[#allocation2 + $0x51] sm:$0xff] }
  0x3d   : > { %8199 = vst [vmem:[#allocation29_spill] sm:$0xff] %v5973_v43  ;;  %8200 = vst [vmem:[#allocation30_spill] sm:$0xff] %v5975_v44  ;;  %v605_v20 = vld [vmem:[#allocation2 + $0x78] sm:$0xff]  ;;  %468 = vrot.lane.b32.xlu0 %v436_v6, %s5740_s7  ;;  %v6067_v2 = vpack.c.bf16 %v411_v57, %v410_v52  ;;  %v412_v5 = vld [vmem:[#allocation2 + $0x61] sm:$0xff] }
  0x3e   : > { %323 = vst.msk [vmem:[#allocation2 + $0xc9] sm:$0xff] %vm197_vm0, %v5950_v34  ;;  %324 = vst.msk [vmem:[#allocation2 + $0xd9] sm:$0xff] %vm197_vm0, %v5952_v35  ;;  %v606_v26 = vld [vmem:[#allocation2 + $0x80] sm:$0xff]  ;;  %v607_v32 = vld [vmem:[#allocation2 + $0x90] sm:$0xff]  ;;  %470 = vrot.lane.b32.xlu1 %v437_v14, %s5740_s7 }
  0x3f   : > { %325 = vst.msk [vmem:[#allocation2 + $0xe1] sm:$0xff] %vm197_vm0, %v5954_v36  ;;  %326 = vst.msk [vmem:[#allocation2 + $0xf1] sm:$0xff] %vm197_vm0, %v5956_v37  ;;  %v633_v31 = vpack.c.bf16 %v606_v26, %v605_v20  ;;  %v413_v6 = vld [vmem:[#allocation2 + $0x69] sm:$0xff]  ;;  %v725_v36 = vld [vmem:[#allocation2 + $0x19] sm:$0xff] }
  0x40   : > { %8201 = vst [vmem:[#allocation31_spill] sm:$0xff] %v5988_v46  ;;  %8202 = vst [vmem:[#allocation32_spill] sm:$0xff] %v5990_v47  ;;  %v6084_v26 = vpack.c.bf16 %v413_v6, %v412_v5  ;;  %v791_v6 = vld [vmem:[#allocation2 + $0x32] sm:$0xff]  ;;  %v726_v35 = vld [vmem:[#allocation2 + $0x21] sm:$0xff] }
  0x41   : > { %8203 = vst [vmem:[#allocation33_spill] sm:$0xff] %v5992_v48  ;;  %8204 = vst [vmem:[#allocation34_spill] sm:$0xff] %v5994_v49  ;;  %v608_v33 = vld [vmem:[#allocation2 + $0x98] sm:$0xff]  ;;  %v609_v39 = vld [vmem:[#allocation2 + $0xa8] sm:$0xff]  ;;  %665 = vrot.lane.b32.xlu0 %v631_v7, %s5740_s7 }
  0x42   : > { %327 = vst.msk [vmem:[#allocation2 + $0xf9] sm:$0xff] %vm197_vm0, %v5969_v41  ;;  %328 = vst.msk [vmem:[#allocation2 + $0x109] sm:$0xff] %vm197_vm0, %v5971_v42  ;;  %v6048_v38 = vpack.c.bf16 %v608_v33, %v607_v32  ;;  %v610_v40 = vld [vmem:[#allocation2 + $0xb0] sm:$0xff]  ;;  %v611_v51 = vld [vmem:[#allocation2 + $0xc0] sm:$0xff]  ;;  %472 = vrot.lane.b32.xlu1 %v6051_v45, %s5740_s7 }
  0x43   : > { %329 = vst.msk [vmem:[#allocation2 + $0x111] sm:$0xff] %vm197_vm0, %v5973_v43  ;;  %330 = vst.msk [vmem:[#allocation2 + $0x121] sm:$0xff] %vm197_vm0, %v5975_v44  ;;  %v6053_v50 = vpack.c.bf16 %v610_v40, %v609_v39  ;;  %v414_v39 = vld [vmem:[#allocation2 + $0x79] sm:$0xff]  ;;  %v415_v40 = vld [vmem:[#allocation2 + $0x81] sm:$0xff] }
  0x44   : > { %8205 = vst [vmem:[#allocation35_spill] sm:$0xff] %v6007_v53  ;;  %8206 = vst [vmem:[#allocation36_spill] sm:$0xff] %v6009_v54  ;;  %v417_v5 = vld [vmem:[#allocation2 + $0x99] sm:$0xff]  ;;  %v918_v42 = vld [vmem:[#allocation2 + $0x30] sm:$0xff] }
  0x45   : > { %8207 = vst [vmem:[#allocation37_spill] sm:$0xff] %v6011_v55  ;;  %8208 = vst [vmem:[#allocation38_spill] sm:$0xff] %v6013_v56  ;;  %v612_v59 = vld [vmem:[#allocation2 + $0xc8] sm:$0xff]  ;;  %v613_v61 = vld [vmem:[#allocation2 + $0xd8] sm:$0xff]  ;;  %667 = vrot.lane.b32.xlu0 %v632_v15, %s5740_s7 }
  0x46   : > { %331 = vst.msk [vmem:[#allocation2 + $0x129] sm:$0xff] %vm197_vm0, %v5988_v46  ;;  %332 = vst.msk [vmem:[#allocation2 + $0x139] sm:$0xff] %vm197_vm0, %v5990_v47  ;;  %v6058_v60 = vpack.c.bf16 %v612_v59, %v611_v51  ;;  %v614_v62 = vld [vmem:[#allocation2 + $0xe0] sm:$0xff]  ;;  %v615_v0 = vld [vmem:[#allocation2 + $0xf0] sm:$0xff]  ;;  %474 = vrot.lane.b32.xlu1 %v6067_v2, %s5740_s7 }
  0x47   : > { %333 = vst.msk [vmem:[#allocation2 + $0x141] sm:$0xff] %vm197_vm0, %v5992_v48  ;;  %334 = vst.msk [vmem:[#allocation2 + $0x151] sm:$0xff] %vm197_vm0, %v5994_v49  ;;  %v919_v44 = vld [vmem:[#allocation2 + $0x38] sm:$0xff]  ;;  %v922_v37 = vld [vmem:[#allocation2 + $0x60] sm:$0xff] }
  0x48   : > { %8209 = vst [vmem:[#allocation39_spill] sm:$0xff] %v6026_v58  ;;  %335 = vst.msk [vmem:[#allocation2 + $0x159] sm:$0xff] %vm197_vm0, %v6007_v53  ;;  %v923_v28 = vld [vmem:[#allocation2 + $0x68] sm:$0xff] }
  0x49   : > { %336 = vst.msk [vmem:[#allocation2 + $0x169] sm:$0xff] %vm197_vm0, %v6009_v54  ;;  %337 = vst.msk [vmem:[#allocation2 + $0x171] sm:$0xff] %vm197_vm0, %v6011_v55  ;;  %v616_v1 = vld [vmem:[#allocation2 + $0xf8] sm:$0xff]  ;;  %v617_v4 = vld [vmem:[#allocation2 + $0x108] sm:$0xff]  ;;  %669 = vrot.lane.b32.xlu0 %v633_v31, %s5740_s7 }
  0x4a   : > { %338 = vst.msk [vmem:[#allocation2 + $0x181] sm:$0xff] %vm197_vm0, %v6013_v56  ;;  %339 = vst.msk [vmem:[#allocation2 + $0x189] sm:$0xff] %vm197_vm0, %v6026_v58  ;;  %v618_v8 = vld [vmem:[#allocation2 + $0x110] sm:$0xff]  ;;  %v619_v13 = vld [vmem:[#allocation2 + $0x120] sm:$0xff]  ;;  %476 = vrot.lane.b32.xlu1 %v6084_v26, %s5740_s7 }
  0x4b   : > { %389 = vst.msk [vmem:[#allocation3 + $0x28] sm:$0xff] %vm197_vm0, %v629_v63  ;;  %390 = vst.msk [vmem:[#allocation3 + $0x50] sm:$0xff] %vm197_vm0, %v630_v3  ;;  %v6063_v63 = vpack.c.bf16 %v614_v62, %v613_v61  ;;  %v6069_v3 = vpack.c.bf16 %v616_v1, %v615_v0  ;;  %v789_v61 = vld [vmem:[#allocation2 + $0x1a] sm:$0xff]  ;;  %v790_v62 = vld [vmem:[#allocation2 + $0x22] sm:$0xff]  ;;  %v6101_v0 = vpack.c.bf16 %v415_v40, %v414_v39 }
  0x4c   : > { %391 = vst.msk [vmem:[#allocation3 + $0x78] sm:$0xff] %vm197_vm0, %v631_v7  ;;  %392 = vst.msk [vmem:[#allocation3 + $0xa0] sm:$0xff] %vm197_vm0, %v632_v15  ;;  %v6075_v7 = vpack.c.bf16 %v618_v8, %v617_v4  ;;  %v416_v1 = vld [vmem:[#allocation2 + $0x91] sm:$0xff]  ;;  %v6103_v4 = vpack.c.bf16 %v790_v62, %v789_v61  ;;  %v792_v8 = vld [vmem:[#allocation2 + $0x3a] sm:$0xff] }
  0x4d   : > { %393 = vst.msk [vmem:[#allocation3 + $0xc8] sm:$0xff] %vm197_vm0, %v633_v31  ;;  %394 = vst.msk [vmem:[#allocation3 + $0xf0] sm:$0xff] %vm197_vm0, %v6048_v38  ;;  %v620_v14 = vld [vmem:[#allocation2 + $0x128] sm:$0xff]  ;;  %v621_v24 = vld [vmem:[#allocation2 + $0x138] sm:$0xff]  ;;  %v6109_v31 = vpack.c.bf16 %v792_v8, %v791_v6  ;;  %671 = vrot.lane.b32.xlu0 %v6048_v38, %s5740_s7 }
  0x4e   : > { %395 = vst.msk [vmem:[#allocation3 + $0x118] sm:$0xff] %vm197_vm0, %v6053_v50  ;;  %396 = vst.msk [vmem:[#allocation3 + $0x140] sm:$0xff] %vm197_vm0, %v6058_v60  ;;  %v6080_v20 = vpack.c.bf16 %v620_v14, %v619_v13  ;;  %v622_v25 = vld [vmem:[#allocation2 + $0x140] sm:$0xff]  ;;  %v623_v33 = vld [vmem:[#allocation2 + $0x150] sm:$0xff]  ;;  %478 = vrot.lane.b32.xlu1 %v6101_v0, %s5740_s7 }
  0x4f   : > { %397 = vst.msk [vmem:[#allocation3 + $0x168] sm:$0xff] %vm197_vm0, %v6063_v63  ;;  %398 = vst.msk [vmem:[#allocation3 + $0x190] sm:$0xff] %vm197_vm0, %v6069_v3  ;;  %v6086_v32 = vpack.c.bf16 %v622_v25, %v621_v24  ;;  %v624_v51 = vld [vmem:[#allocation2 + $0x158] sm:$0xff]  ;;  %v793_v13 = vld [vmem:[#allocation2 + $0x4a] sm:$0xff] }
  0x50   : > { %399 = vst.msk [vmem:[#allocation3 + $0x1b8] sm:$0xff] %vm197_vm0, %v6075_v7  ;;  %400 = vst.msk [vmem:[#allocation3 + $0x1e0] sm:$0xff] %vm197_vm0, %v6080_v20  ;;  %v6092_v15 = vpack.c.bf16 %v624_v51, %v623_v33  ;;  %v625_v52 = vld [vmem:[#allocation2 + $0x168] sm:$0xff]  ;;  %v626_v57 = vld [vmem:[#allocation2 + $0x170] sm:$0xff] }
  0x51   : > { %401 = vst.msk [vmem:[#allocation3 + $0x208] sm:$0xff] %vm197_vm0, %v6086_v32  ;;  %v6097_v59 = vpack.c.bf16 %v626_v57, %v625_v52  ;;  %v794_v14 = vld [vmem:[#allocation2 + $0x52] sm:$0xff]  ;;  %v795_v24 = vld [vmem:[#allocation2 + $0x62] sm:$0xff]  ;;  %582 = vst.msk [vmem:[#allocation3 + $0x30] sm:$0xff] %vm197_vm0, %v6103_v4  ;;  %v6119_v57 = vpack.c.bf16 %v417_v5, %v416_v1  ;;  %673 = vrot.lane.b32.xlu0 %v6053_v50, %s5740_s7 }
  0x52   : > { %402 = vst.msk [vmem:[#allocation3 + $0x230] sm:$0xff] %vm197_vm0, %v6092_v15  ;;  %v418_v25 = vld [vmem:[#allocation2 + $0xa9] sm:$0xff]  ;;  %v419_v33 = vld [vmem:[#allocation2 + $0xb1] sm:$0xff]  ;;  %v6115_v39 = vpack.c.bf16 %v794_v14, %v793_v13  ;;  %v797_v51 = vld [vmem:[#allocation2 + $0x7a] sm:$0xff] }
  0x53   : > { %403 = vst.msk [vmem:[#allocation3 + $0x258] sm:$0xff] %vm197_vm0, %v6097_v59  ;;  %v796_v40 = vld [vmem:[#allocation2 + $0x6a] sm:$0xff]  ;;  %v798_v52 = vld [vmem:[#allocation2 + $0x82] sm:$0xff]  ;;  %v799_v6 = vld [vmem:[#allocation2 + $0x92] sm:$0xff]  ;;  %480 = vrot.lane.b32.xlu1 %v6119_v57, %s5740_s7 }
  0x54   : > { %v6121_v61 = vpack.c.bf16 %v796_v40, %v795_v24  ;;  %v6123_v62 = vpack.c.bf16 %v798_v52, %v797_v51  ;;  %v800_v8 = vld [vmem:[#allocation2 + $0x9a] sm:$0xff]  ;;  %v801_v55 = vld [vmem:[#allocation2 + $0xaa] sm:$0xff]  ;;  %583 = vst.msk [vmem:[#allocation3 + $0x58] sm:$0xff] %vm197_vm0, %v6109_v31  ;;  %v802_v13 = vld [vmem:[#allocation2 + $0xb2] sm:$0xff]  ;;  %v6149_v52 = vpack.c.bf16 %v419_v33, %v418_v25 }
  0x55   : > { %v6127_v38 = vpack.c.bf16 %v800_v8, %v799_v6  ;;  %584 = vst.msk [vmem:[#allocation3 + $0x80] sm:$0xff] %vm197_vm0, %v6115_v39  ;;  %v6131_v14 = vpack.c.bf16 %v802_v13, %v801_v55  ;;  %v5438_v1 = vld [vmem:[%s8047_s1 + $0x20] sm:$0xff]   ;;  %v421_v24 = vld [vmem:[#allocation2 + $0xc9] sm:$0xff]  ;;  %675 = vrot.lane.b32.xlu0 %v6058_v60, %s5740_s7  ;;  %v5443_v60 = vld [vmem:[%s8047_s1 + $0x78] sm:$0xff]  }
  0x56   : > { %585 = vst.msk [vmem:[#allocation3 + $0xa8] sm:$0xff] %vm197_vm0, %v6121_v61  ;;  %586 = vst.msk [vmem:[#allocation3 + $0xd0] sm:$0xff] %vm197_vm0, %v6123_v62  ;;  %v420_v5 = vld [vmem:[#allocation2 + $0xc1] sm:$0xff]  ;;  %v534_v51 = vld [vmem:[#allocation2 + $0xa] sm:$0xff]  ;;  %4863 = vmatpush3.bf16.msra.mxu0 %v5438_v1 }
  0x57   : > { %v5439_v55 = vld [vmem:[%s8047_s1 + $0x68] sm:$0xff]   ;;  %587 = vst.msk [vmem:[#allocation3 + $0xf8] sm:$0xff] %vm197_vm0, %v6127_v38  ;;  %588 = vst.msk [vmem:[#allocation3 + $0x120] sm:$0xff] %vm197_vm0, %v6131_v14  ;;  %v5441_v25 = vld [vmem:[%s8047_s1 + $0x70] sm:$0xff]   ;;  %482 = vrot.lane.b32.xlu1 %v6149_v52, %s5740_s7 }
  0x58   : > { %v533_v40 = vld [vmem:[#allocation2 + $0x2] sm:$0xff]  ;;  %4864 = vmatprep.subr.bf16.mxu0 %v5439_v55  ;;  %v804_v13 = vld [vmem:[#allocation2 + $0xca] sm:$0xff]  ;;  %v422_v1 = vld [vmem:[#allocation2 + $0xd9] sm:$0xff]  ;;  %v6166_v55 = vpack.c.bf16 %v421_v24, %v420_v5 }
  0x59   : > { %v565_v6 = vpack.c.bf16 %v534_v51, %v533_v40  ;;  %v5440_v50 = vld [vmem:[%s8047_s1 + $0x28] sm:$0xff]   ;;  %v340_v33 = vld [vmem:[#allocation2] sm:$0xff]  ;;  %v5444_v5 = vld [vmem:[%s8047_s1 + $0x38] sm:$0xff]   ;;  %677 = vrot.lane.b32.xlu0 %v6063_v63, %s5740_s7 }
  0x5a   : > { %v803_v8 = vld [vmem:[#allocation2 + $0xc2] sm:$0xff]  ;;  %4865 = vmatpush3.bf16.msra.mxu0 %v5440_v50  ;;  %v805_v24 = vld [vmem:[#allocation2 + $0xda] sm:$0xff]  ;;  %v807_v58 = vld [vmem:[#allocation2 + $0xf2] sm:$0xff] }
  0x5b   : > { %581 = vst.msk [vmem:[#allocation3 + $0x8] sm:$0xff] %vm197_vm0, %v565_v6  ;;  %v6157_v54 = vpack.c.bf16 %v804_v13, %v803_v8  ;;  %v423_v40 = vld [vmem:[#allocation2 + $0xe1] sm:$0xff]  ;;  %v5442_v8 = vld [vmem:[%s8047_s1 + $0x30] sm:$0xff]   ;;  %4866 = vmatprep.subr.bf16.mxu0 %v5441_v25  ;;  %484 = vrot.lane.b32.xlu1 %v6166_v55, %s5740_s7 }
  0x5c   : > { %v341_v51 = vld [vmem:[#allocation2 + $0x8] sm:$0xff]  ;;  %v424_v13 = vld [vmem:[#allocation2 + $0xf1] sm:$0xff]  ;;  %v6187_v25 = vld [vmem:[%s8047_s1 + $0x100] sm:$0xff]  }
  0x5d   : > { %v372_v6 = vpack.c.bf16 %v341_v51, %v340_v33  ;;  %589 = vst.msk [vmem:[#allocation3 + $0x148] sm:$0xff] %vm197_vm0, %v6157_v54  ;;  %v806_v50 = vld [vmem:[#allocation2 + $0xe2] sm:$0xff]  ;;  %v425_v33 = vld [vmem:[#allocation2 + $0xf9] sm:$0xff]  ;;  %v809_v48 = vld [vmem:[#allocation2 + $0x10a] sm:$0xff]  ;;  %679 = vrot.lane.b32.xlu0 %v6069_v3, %s5740_s7 }
  0x5e   : > { %v6182_v51 = vpack.c.bf16 %v806_v50, %v805_v24  ;;  %4867 = vmatpush3.bf16.msra.mxu0 %v5442_v8  ;;  %v808_v56 = vld [vmem:[#allocation2 + $0xfa] sm:$0xff]  ;;  %v810_v47 = vld [vmem:[#allocation2 + $0x112] sm:$0xff]  ;;  %v811_v24 = vld [vmem:[#allocation2 + $0x122] sm:$0xff] }
  0x5f   : > { %388 = vst.msk [vmem:[#allocation3] sm:$0xff] %vm197_vm0, %v372_v6  ;;  %v6191_v6 = vpack.c.bf16 %v423_v40, %v422_v1  ;;  %4868 = vmatprep.subr.bf16.mxu0 %v5443_v60  ;;  %v6193_v63 = vpack.c.bf16 %v808_v56, %v807_v58  ;;  %v812_v50 = vld [vmem:[#allocation2 + $0x12a] sm:$0xff]  ;;  %v6197_v53 = vpack.c.bf16 %v810_v47, %v809_v48  ;;  %v5446_v1 = vld [vmem:[%s8047_s1 + $0xc0] sm:$0xff]   ;;  %v818_v43 = vld [vmem:[#allocation2 + $0x172] sm:$0xff] }
  0x60   : > { %590 = vst.msk [vmem:[#allocation3 + $0x170] sm:$0xff] %vm197_vm0, %v6182_v51  ;;  %v6199_v49 = vpack.c.bf16 %v812_v50, %v811_v24  ;;  %v426_v40 = vld [vmem:[#allocation2 + $0x109] sm:$0xff]  ;;  %v427_v56 = vld [vmem:[#allocation2 + $0x111] sm:$0xff]  ;;  %v5447_v58 = vld [vmem:[%s8047_s1 + $0x80] sm:$0xff]   ;;  %v6213_v47 = vpack.c.bf16 %v425_v33, %v424_v13  ;;  %4966 = vmatprep.subr.bf16.mxu1 %v5446_v1 }
  0x61   : > { %591 = vst.msk [vmem:[#allocation3 + $0x198] sm:$0xff] %vm197_vm0, %v6193_v63  ;;  %486 = vrot.lane.b32.xlu1 %v6191_v6, %s5740_s7  ;;  %v5448_v48 = vld [vmem:[%s8047_s1 + $0xc8] sm:$0xff]   ;;  %592 = vst.msk [vmem:[#allocation3 + $0x1c0] sm:$0xff] %vm197_vm0, %v6197_v53  ;;  %4967 = vmatpush3.bf16.msra.mxu1 %v5447_v58  ;;  %v813_v8 = vld [vmem:[#allocation2 + $0x13a] sm:$0xff]  ;;  %v6232_v33 = vpack.c.bf16 %v427_v56, %v426_v40 }
  0x62   : > { %4869 = vmatpush3.bf16.msra.mxu0 %v5444_v5  ;;  %593 = vst.msk [vmem:[#allocation3 + $0x1e8] sm:$0xff] %vm197_vm0, %v6199_v49  ;;  %v5449_v3 = vld [vmem:[%s8047_s1 + $0x88] sm:$0xff]   ;;  %681 = vrot.lane.b32.xlu0 %v6075_v7, %s5740_s7  ;;  %v5451_v24 = vld [vmem:[%s8047_s1 + $0xd0] sm:$0xff]   ;;  %v430_v1 = vld [vmem:[#allocation2 + $0x139] sm:$0xff] }
  0x63   : > { %5228 = vmatprep.subr.bf16.mxu0 %v6187_v25  ;;  %v814_v60 = vld [vmem:[#allocation2 + $0x142] sm:$0xff]  ;;  %4968 = vmatprep.subr.bf16.mxu1 %v5448_v48  ;;  %v5452_v7 = vld [vmem:[%s8047_s1 + $0x90] sm:$0xff]   ;;  %v5453_v40 = vld [vmem:[%s8047_s1 + $0xd8] sm:$0xff]  }
  0x64   : > { %v428_v5 = vld [vmem:[#allocation2 + $0x121] sm:$0xff]  ;;  %v6228_v13 = vpack.c.bf16 %v814_v60, %v813_v8  ;;  %v429_v50 = vld [vmem:[#allocation2 + $0x129] sm:$0xff]  ;;  %v815_v56 = vld [vmem:[#allocation2 + $0x152] sm:$0xff] }
  0x65   : > { %488 = vrot.lane.b32.xlu1 %v6213_v47, %s5740_s7  ;;  %4969 = vmatpush3.bf16.msra.mxu1 %v5449_v3  ;;  %v6249_v58 = vpack.c.bf16 %v429_v50, %v428_v5  ;;  %v816_v48 = vld [vmem:[#allocation2 + $0x15a] sm:$0xff]  ;;  %v432_v60 = vld [vmem:[#allocation2 + $0x151] sm:$0xff] }
  0x66   : > { %594 = vst.msk [vmem:[#allocation3 + $0x210] sm:$0xff] %vm197_vm0, %v6228_v13  ;;  %683 = vrot.lane.b32.xlu0 %v6080_v20, %s5740_s7  ;;  %4970 = vmatprep.subr.bf16.mxu1 %v5451_v24  ;;  %v431_v3 = vld [vmem:[#allocation2 + $0x141] sm:$0xff]  ;;  %v6251_v8 = vpack.c.bf16 %v816_v48, %v815_v56  ;;  %v5454_v20 = vld [vmem:[%s8047_s1 + $0x98] sm:$0xff]   ;;  %v1011_v56 = vld [vmem:[#allocation2 + $0x189] sm:$0xff] }
  0x67   : > { %v433_v24 = vld [vmem:[#allocation2 + $0x159] sm:$0xff]  ;;  %v1010_v50 = vld [vmem:[#allocation2 + $0x181] sm:$0xff]  ;;  %v817_v48 = vld [vmem:[#allocation2 + $0x16a] sm:$0xff] }
  0x68   : > { %v5455_v5 = vld [vmem:[%s8047_s1 + $0xe0] sm:$0xff]   ;;  %595 = vst.msk [vmem:[#allocation3 + $0x238] sm:$0xff] %vm197_vm0, %v6251_v8  ;;  %1170 = vst.msk [vmem:[#allocation3 + $0x200] sm:$0xff] %vm197_vm0, %v6251_v8  ;;  %v6274_v46 = vpack.c.bf16 %v818_v43, %v817_v48  ;;  %v6285_v43 = vpack.c.bf16 %v433_v24, %v432_v60  ;;  %v5460_v24 = vld [vmem:[%s8047_s1 + $0xb0] sm:$0xff]  }
  0x69   : > { %490 = vrot.lane.b32.xlu1 %v6232_v33, %s5740_s7  ;;  %4971 = vmatpush3.bf16.msra.mxu1 %v5452_v7  ;;  %v6267_v7 = vpack.c.bf16 %v431_v3, %v430_v1  ;;  %v5457_v1 = vld [vmem:[%s8047_s1 + $0xe8] sm:$0xff]   ;;  %v950_v3 = vpack.c.bf16 %v919_v44, %v918_v42  ;;  %v435_v42 = vld [vmem:[#allocation2 + $0x171] sm:$0xff] }
  0x6a   : > { %685 = vrot.lane.b32.xlu0 %v6086_v32, %s5740_s7  ;;  %4972 = vmatprep.subr.bf16.mxu1 %v5453_v40  ;;  %v5456_v32 = vld [vmem:[%s8047_s1 + $0xa0] sm:$0xff]   ;;  %v6272_v40 = vpack.c.bf16 %v1011_v56, %v1010_v50  ;;  %v757_v50 = vpack.c.bf16 %v726_v35, %v725_v36  ;;  %596 = vst.msk [vmem:[#allocation3 + $0x260] sm:$0xff] %vm197_vm0, %v6274_v46  ;;  %1171 = vst.msk [vmem:[#allocation3 + $0x228] sm:$0xff] %vm197_vm0, %v6274_v46  ;;  %v5458_v35 = vld [vmem:[%s8047_s1 + $0xa8] sm:$0xff]  }
  0x6b   : > { %966 = vst.msk [vmem:[#allocation3 + $0x18] sm:$0xff] %vm197_vm0, %v950_v3  ;;  %v434_v36 = vld [vmem:[#allocation2 + $0x169] sm:$0xff]  ;;  %v727_v3 = vld [vmem:[#allocation2 + $0x31] sm:$0xff] }
  0x6c   : > { %788 = vst.msk [vmem:[#allocation3 + $0x268] sm:$0xff] %vm197_vm0, %v6272_v40  ;;  %773 = vst.msk [vmem:[#allocation3 + $0x10] sm:$0xff] %vm197_vm0, %v757_v50  ;;  %v5459_v44 = vld [vmem:[%s8047_s1 + $0xf0] sm:$0xff]   ;;  %v819_v60 = vld [vmem:[#allocation2 + $0x182] sm:$0xff] }
  0x6d   : > { %492 = vrot.lane.b32.xlu1 %v6249_v58, %s5740_s7  ;;  %4973 = vmatpush3.bf16.msra.mxu1 %v5454_v20  ;;  %v628_v20 = vld [vmem:[#allocation2 + $0x188] sm:$0xff]  ;;  %v5461_v50 = vld [vmem:[%s8047_s1 + $0xf8] sm:$0xff]  }
  0x6e   : > { %687 = vrot.lane.b32.xlu0 %v6092_v15, %s5740_s7  ;;  %4974 = vmatprep.subr.bf16.mxu1 %v5455_v5  ;;  %v627_v15 = vld [vmem:[#allocation2 + $0x180] sm:$0xff]  ;;  %v820_v5 = vld [vmem:[#allocation2 + $0x18a] sm:$0xff] }
  0x6f   : > { %v920_v56 = vld [vmem:[#allocation2 + $0x48] sm:$0xff]  ;;  %v6306_v48 = vpack.c.bf16 %v820_v5, %v819_v60  ;;  %v644_v29 = vpack.c.bf16 %v628_v20, %v627_v15  ;;  %v730_v5 = vld [vmem:[#allocation2 + $0x51] sm:$0xff] }
  0x70   : > { %v729_v60 = vld [vmem:[#allocation2 + $0x49] sm:$0xff]  ;;  %v924_v20 = vld [vmem:[#allocation2 + $0x78] sm:$0xff] }
  0x71   : > { %494 = vrot.lane.b32.xlu1 %v6267_v7, %s5740_s7  ;;  %4975 = vmatpush3.bf16.msra.mxu1 %v5456_v32  ;;  %v921_v32 = vld [vmem:[#allocation2 + $0x50] sm:$0xff]  ;;  %1172 = vst.msk [vmem:[#allocation3 + $0x250] sm:$0xff] %vm197_vm0, %v6306_v48  ;;  %v759_v15 = vpack.c.bf16 %v730_v5, %v729_v60 }
  0x72   : > { %689 = vrot.lane.b32.xlu0 %v6097_v59, %s5740_s7  ;;  %4976 = vmatprep.subr.bf16.mxu1 %v5457_v1  ;;  %v951_v59 = vpack.c.bf16 %v921_v32, %v920_v56  ;;  %v728_v1 = vld [vmem:[#allocation2 + $0x39] sm:$0xff]  ;;  %v734_v32 = vld [vmem:[#allocation2 + $0x81] sm:$0xff]  ;;  %v740_v5 = vld [vmem:[#allocation2 + $0xc9] sm:$0xff] }
  0x73   : > { %v758_v41 = vpack.c.bf16 %v728_v1, %v727_v3  ;;  %v5462_v56 = vld [vmem:[%s8047_s1 + $0xb8] sm:$0xff]   ;;  %775 = vst.msk [vmem:[#allocation3 + $0x60] sm:$0xff] %vm197_vm0, %v759_v15 }
  0x74   : > { %967 = vst.msk [vmem:[#allocation3 + $0x40] sm:$0xff] %vm197_vm0, %v951_v59  ;;  %v736_v3 = vld [vmem:[#allocation2 + $0x99] sm:$0xff] }
  0x75   : > { %496 = vrot.lane.b32.xlu1 %v6285_v43, %s5740_s7  ;;  %4977 = vmatpush3.bf16.msra.mxu1 %v5458_v35  ;;  %v6318_v35 = vpack.c.bf16 %v435_v42, %v434_v36  ;;  %774 = vst.msk [vmem:[#allocation3 + $0x38] sm:$0xff] %vm197_vm0, %v758_v41  ;;  %v731_v41 = vld [vmem:[#allocation2 + $0x61] sm:$0xff]  ;;  %v927_v42 = vld [vmem:[#allocation2 + $0x98] sm:$0xff] }
  0x76   : > { %1046 = vrot.lane.b32.xlu0 %v6051_v45, %s5740_s7  ;;  %4978 = vmatprep.subr.bf16.mxu1 %v5459_v44  ;;  %v952_v45 = vpack.c.bf16 %v923_v28, %v922_v37  ;;  %v732_v28 = vld [vmem:[#allocation2 + $0x69] sm:$0xff] }
  0x77   : > { %v760_v37 = vpack.c.bf16 %v732_v28, %v731_v41  ;;  %v1111_v41 = vld [vmem:[#allocation2 + $0x3a] sm:$0xff]  ;;  %v1113_v28 = vld [vmem:[#allocation2 + $0x52] sm:$0xff] }
  0x78   : > { %968 = vst.msk [vmem:[#allocation3 + $0x68] sm:$0xff] %vm197_vm0, %v952_v45  ;;  %v742_v45 = vld [vmem:[#allocation2 + $0xe1] sm:$0xff] }
  0x79   : > { %853 = vrot.lane.b32.xlu1 %v6103_v4, %s5740_s7  ;;  %4979 = vmatpush3.bf16.msra.mxu1 %v5460_v24  ;;  %v925_v4 = vld [vmem:[#allocation2 + $0x80] sm:$0xff]  ;;  %776 = vst.msk [vmem:[#allocation3 + $0x88] sm:$0xff] %vm197_vm0, %v760_v37 }
  0x7a   : > { %691 = vrot.lane.b32.xlu0 %v644_v29, %s5740_s7  ;;  %4980 = vmatprep.subr.bf16.mxu1 %v5461_v50  ;;  %v953_v36 = vpack.c.bf16 %v925_v4, %v924_v20  ;;  %v926_v29 = vld [vmem:[#allocation2 + $0x90] sm:$0xff]  ;;  %v733_v24 = vld [vmem:[#allocation2 + $0x79] sm:$0xff] }
  0x7b   : > { %v954_v44 = vpack.c.bf16 %v927_v42, %v926_v29  ;;  %v761_v59 = vpack.c.bf16 %v734_v32, %v733_v24  ;;  %v738_v50 = vld [vmem:[#allocation2 + $0xb1] sm:$0xff]  ;;  %v744_v20 = vld [vmem:[#allocation2 + $0xf9] sm:$0xff]  ;;  %v1013_v29 = vld [vmem:[#allocation2 + $0x1a1] sm:$0xff] }
  0x7c   : > { %969 = vst.msk [vmem:[#allocation3 + $0x90] sm:$0xff] %vm197_vm0, %v953_v36  ;;  %v1012_v37 = vld [vmem:[#allocation2 + $0x199] sm:$0xff] }
  0x7d   : > { %498 = vrot.lane.b32.xlu1 %v6318_v35, %s5740_s7  ;;  %4981 = vmatpush3.bf16.msra.mxu1 %v5462_v56  ;;  %970 = vst.msk [vmem:[#allocation3 + $0xb8] sm:$0xff] %vm197_vm0, %v954_v44  ;;  %777 = vst.msk [vmem:[#allocation3 + $0xb0] sm:$0xff] %vm197_vm0, %v761_v59  ;;  %v938_v32 = vld [vmem:[#allocation2 + $0x120] sm:$0xff]  ;;  %v939_v59 = vld [vmem:[#allocation2 + $0x128] sm:$0xff] }
  0x7e   : > { %1048 = vrot.lane.b32.xlu0 %v6067_v2, %s5740_s7  ;;  %v928_v2 = vld [vmem:[#allocation2 + $0xa8] sm:$0xff] }
  0x81   : > { %855 = vrot.lane.b32.xlu1 %v6109_v31, %s5740_s7 }
  0x82   : > { %1050 = vrot.lane.b32.xlu0 %v6084_v26, %s5740_s7  ;;  %v929_v26 = vld [vmem:[#allocation2 + $0xb0] sm:$0xff] }
  0x83   : > { %v955_v31 = vpack.c.bf16 %v929_v26, %v928_v2  ;;  %v745_v2 = vld [vmem:[#allocation2 + $0x109] sm:$0xff]  ;;  %v746_v26 = vld [vmem:[#allocation2 + $0x111] sm:$0xff] }
  0x85   : > { %857 = vrot.lane.b32.xlu1 %v6115_v39, %s5740_s7  ;;  %v735_v39 = vld [vmem:[#allocation2 + $0x91] sm:$0xff]  ;;  %971 = vst.msk [vmem:[#allocation3 + $0xe0] sm:$0xff] %vm197_vm0, %v955_v31 }
  0x86   : > { %1052 = vrot.lane.b32.xlu0 %v6101_v0, %s5740_s7  ;;  %v762_v1 = vpack.c.bf16 %v736_v3, %v735_v39  ;;  %v930_v0 = vld [vmem:[#allocation2 + $0xc0] sm:$0xff]  ;;  %v767_v3 = vpack.c.bf16 %v746_v26, %v745_v2 }
  0x87   : > { %v1125_v2 = vld [vmem:[#allocation2 + $0xe2] sm:$0xff] }
  0x88   : > { %778 = vst.msk [vmem:[#allocation3 + $0xd8] sm:$0xff] %vm197_vm0, %v762_v1  ;;  %783 = vst.msk [vmem:[#allocation3 + $0x1a0] sm:$0xff] %vm197_vm0, %v767_v3 }
  0x89   : > { %859 = vrot.lane.b32.xlu1 %v6121_v61, %s5740_s7 }
  0x8a   : > { %1054 = vrot.lane.b32.xlu0 %v6119_v57, %s5740_s7  ;;  %v931_v57 = vld [vmem:[#allocation2 + $0xc8] sm:$0xff] }
  0x8b   : > { %v956_v61 = vpack.c.bf16 %v931_v57, %v930_v0  ;;  %v1114_v0 = vld [vmem:[#allocation2 + $0x62] sm:$0xff]  ;;  %v1116_v57 = vld [vmem:[#allocation2 + $0x7a] sm:$0xff] }
  0x8d   : > { %861 = vrot.lane.b32.xlu1 %v6123_v62, %s5740_s7  ;;  %v737_v62 = vld [vmem:[#allocation2 + $0xa9] sm:$0xff]  ;;  %972 = vst.msk [vmem:[#allocation3 + $0x108] sm:$0xff] %vm197_vm0, %v956_v61 }
  0x8e   : > { %1056 = vrot.lane.b32.xlu0 %v6149_v52, %s5740_s7  ;;  %v763_v60 = vpack.c.bf16 %v738_v50, %v737_v62  ;;  %v933_v52 = vld [vmem:[#allocation2 + $0xe0] sm:$0xff]  ;;  %v5450_v50 = vld [vmem:[%s8047_s1 + $0x108] sm:$0xff]  }
  0x8f   : > { %v1117_v61 = vld [vmem:[#allocation2 + $0x82] sm:$0xff] }
  0x90   : > { %779 = vst.msk [vmem:[#allocation3 + $0x100] sm:$0xff] %vm197_vm0, %v763_v60  ;;  %v1145_v60 = vpack.c.bf16 %v1117_v61, %v1116_v57  ;;  %v752_v57 = vld [vmem:[#allocation2 + $0x159] sm:$0xff] }
  0x91   : > { %863 = vrot.lane.b32.xlu1 %v6127_v38, %s5740_s7  ;;  %v932_v38 = vld [vmem:[#allocation2 + $0xd8] sm:$0xff] }
  0x92   : > { %1058 = vrot.lane.b32.xlu0 %v6166_v55, %s5740_s7  ;;  %v739_v55 = vld [vmem:[#allocation2 + $0xc1] sm:$0xff]  ;;  %1161 = vst.msk [vmem:[#allocation3 + $0x98] sm:$0xff] %vm197_vm0, %v1145_v60  ;;  %v1126_v60 = vld [vmem:[#allocation2 + $0xf2] sm:$0xff] }
  0x93   : > { %v764_v56 = vpack.c.bf16 %v740_v5, %v739_v55  ;;  %v940_v55 = vld [vmem:[#allocation2 + $0x138] sm:$0xff]  ;;  %v941_v5 = vld [vmem:[#allocation2 + $0x140] sm:$0xff] }
  0x95   : > { %865 = vrot.lane.b32.xlu1 %v6131_v14, %s5740_s7  ;;  %v957_v14 = vpack.c.bf16 %v933_v52, %v932_v38  ;;  %780 = vst.msk [vmem:[#allocation3 + $0x128] sm:$0xff] %vm197_vm0, %v764_v56  ;;  %v961_v56 = vpack.c.bf16 %v941_v5, %v940_v55  ;;  %v1128_v55 = vld [vmem:[#allocation2 + $0x10a] sm:$0xff]  ;;  %v1129_v5 = vld [vmem:[#allocation2 + $0x112] sm:$0xff] }
  0x96   : > { %1060 = vrot.lane.b32.xlu0 %v6191_v6, %s5740_s7  ;;  %v935_v6 = vld [vmem:[#allocation2 + $0xf8] sm:$0xff] }
  0x97   : > { %973 = vst.msk [vmem:[#allocation3 + $0x130] sm:$0xff] %vm197_vm0, %v957_v14  ;;  %977 = vst.msk [vmem:[#allocation3 + $0x1d0] sm:$0xff] %vm197_vm0, %v961_v56  ;;  %v1151_v56 = vpack.c.bf16 %v1129_v5, %v1128_v55 }
  0x99   : > { %867 = vrot.lane.b32.xlu1 %v6157_v54, %s5740_s7  ;;  %v934_v54 = vld [vmem:[#allocation2 + $0xf0] sm:$0xff]  ;;  %1167 = vst.msk [vmem:[#allocation3 + $0x188] sm:$0xff] %vm197_vm0, %v1151_v56 }
  0x9a   : > { %1062 = vrot.lane.b32.xlu0 %v6213_v47, %s5740_s7  ;;  %v741_v47 = vld [vmem:[#allocation2 + $0xd9] sm:$0xff] }
  0x9b   : > { %v765_v15 = vpack.c.bf16 %v742_v45, %v741_v47 }
  0x9d   : > { %869 = vrot.lane.b32.xlu1 %v6182_v51, %s5740_s7  ;;  %v958_v51 = vpack.c.bf16 %v935_v6, %v934_v54  ;;  %781 = vst.msk [vmem:[#allocation3 + $0x150] sm:$0xff] %vm197_vm0, %v765_v15  ;;  %v747_v54 = vld [vmem:[#allocation2 + $0x121] sm:$0xff]  ;;  %v748_v6 = vld [vmem:[#allocation2 + $0x129] sm:$0xff] }
  0x9e   : > { %1064 = vrot.lane.b32.xlu0 %v6232_v33, %s5740_s7  ;;  %v768_v47 = vpack.c.bf16 %v748_v6, %v747_v54  ;;  %v1119_v15 = vld [vmem:[#allocation2 + $0x9a] sm:$0xff] }
  0x9f   : > { %974 = vst.msk [vmem:[#allocation3 + $0x158] sm:$0xff] %vm197_vm0, %v958_v51 }
  0xa0   : > { %784 = vst.msk [vmem:[#allocation3 + $0x1c8] sm:$0xff] %vm197_vm0, %v768_v47  ;;  %v947_v47 = vld [vmem:[#allocation2 + $0x188] sm:$0xff] }
  0xa1   : > { %871 = vrot.lane.b32.xlu1 %v6193_v63, %s5740_s7  ;;  %v936_v63 = vld [vmem:[#allocation2 + $0x108] sm:$0xff] }
  0xa2   : > { %1066 = vrot.lane.b32.xlu0 %v6249_v58, %s5740_s7  ;;  %v743_v58 = vld [vmem:[#allocation2 + $0xf1] sm:$0xff] }
  0xa3   : > { %v766_v36 = vpack.c.bf16 %v744_v20, %v743_v58  ;;  %v1121_v58 = vld [vmem:[#allocation2 + $0xb2] sm:$0xff] }
  0xa5   : > { %873 = vrot.lane.b32.xlu1 %v6197_v53, %s5740_s7  ;;  %v937_v53 = vld [vmem:[#allocation2 + $0x110] sm:$0xff]  ;;  %782 = vst.msk [vmem:[#allocation3 + $0x178] sm:$0xff] %vm197_vm0, %v766_v36 }
  0xa6   : > { %1068 = vrot.lane.b32.xlu0 %v6267_v7, %s5740_s7  ;;  %v959_v33 = vpack.c.bf16 %v937_v53, %v936_v63 }
  0xa8   : > { %975 = vst.msk [vmem:[#allocation3 + $0x180] sm:$0xff] %vm197_vm0, %v959_v33  ;;  %v1120_v33 = vld [vmem:[#allocation2 + $0xaa] sm:$0xff] }
  0xa9   : > { %875 = vrot.lane.b32.xlu1 %v6199_v49, %s5740_s7  ;;  %v1110_v49 = vld [vmem:[#allocation2 + $0x32] sm:$0xff]  ;;  %v1147_v36 = vpack.c.bf16 %v1121_v58, %v1120_v33  ;;  %v1130_v58 = vld [vmem:[#allocation2 + $0x122] sm:$0xff] }
  0xaa   : > { %1070 = vrot.lane.b32.xlu0 %v6285_v43, %s5740_s7  ;;  %v1112_v43 = vld [vmem:[#allocation2 + $0x4a] sm:$0xff] }
  0xab   : > { %v662_v4 = vpop.permute.xlu0 %661  ;;  %v1143_v42 = vpack.c.bf16 %v1113_v28, %v1112_v43  ;;  %1163 = vst.msk [vmem:[#allocation3 + $0xe8] sm:$0xff] %vm197_vm0, %v1147_v36  ;;  %v749_v28 = vld [vmem:[#allocation2 + $0x139] sm:$0xff] }
  0xac   : > { %709 = vst.msk [vmem:[#allocation3 + $0x8] sm:$0xff] %vm516_vm3, %v662_v4  ;;  %v664_v7 = vpop.permute.xlu1 %663  ;;  %v5464_v4 = vld [vmem:[%s8047_s1 + $0x118] sm:$0xff]  }
  0xad   : > { %877 = vrot.lane.b32.xlu1 %v6228_v13, %s5740_s7  ;;  %710 = vst.msk [vmem:[#allocation3 + $0x30] sm:$0xff] %vm516_vm3, %v664_v7  ;;  %v1142_v13 = vpack.c.bf16 %v1111_v41, %v1110_v49  ;;  %v942_v41 = vld [vmem:[#allocation2 + $0x150] sm:$0xff] }
  0xae   : > { %1072 = vrot.lane.b32.xlu0 %v6318_v35, %s5740_s7  ;;  %1159 = vst.msk [vmem:[#allocation3 + $0x48] sm:$0xff] %vm197_vm0, %v1143_v42  ;;  %v1029_v35 = vpack.c.bf16 %v1013_v29, %v1012_v37  ;;  %v750_v37 = vld [vmem:[#allocation2 + $0x141] sm:$0xff] }
  0xaf   : > { %v469_v44 = vpop.permute.xlu0 %468  ;;  %1158 = vst.msk [vmem:[#allocation3 + $0x20] sm:$0xff] %vm197_vm0, %v1142_v13  ;;  %v943_v13 = vld [vmem:[#allocation2 + $0x158] sm:$0xff]  ;;  %v769_v42 = vpack.c.bf16 %v750_v37, %v749_v28 }
  0xb0   : > { %517 = vst.msk [vmem:[#allocation3] sm:$0xff] %vm516_vm3, %v469_v44  ;;  %v471_v24 = vpop.permute.xlu1 %470  ;;  %v962_v43 = vpack.c.bf16 %v943_v13, %v942_v41  ;;  %v948_v37 = vld [vmem:[#allocation2 + $0x198] sm:$0xff] }
  0xb1   : > { %879 = vrot.lane.b32.xlu1 %v6251_v8, %s5740_s7  ;;  %518 = vst.msk [vmem:[#allocation3 + $0x28] sm:$0xff] %vm516_vm3, %v471_v24  ;;  %v960_v8 = vpack.c.bf16 %v939_v59, %v938_v32  ;;  %v1122_v24 = vld [vmem:[#allocation2 + $0xc2] sm:$0xff] }
  0xb2   : > { %1074 = vrot.lane.b32.xlu0 %v6272_v40, %s5740_s7  ;;  %v1115_v40 = vld [vmem:[#allocation2 + $0x6a] sm:$0xff]  ;;  %978 = vst.msk [vmem:[#allocation3 + $0x1f8] sm:$0xff] %vm197_vm0, %v962_v43  ;;  %785 = vst.msk [vmem:[#allocation3 + $0x1f0] sm:$0xff] %vm197_vm0, %v769_v42 }
  0xb3   : > { %v666_v31 = vpop.permute.xlu0 %665  ;;  %v1175_v39 = vld [vmem:[#allocation3 + $0x8] sm:$0xff]  ;;  %976 = vst.msk [vmem:[#allocation3 + $0x1a8] sm:$0xff] %vm197_vm0, %v960_v8 }
  0xb4   : > { %711 = vst.msk [vmem:[#allocation3 + $0x58] sm:$0xff] %vm516_vm3, %v666_v31  ;;  %1629 = vmatprep.mubr.bf16.mxu0 %v1175_v39  ;;  %v473_v1 = vpop.permute.xlu1 %472  ;;  %v1180_v62 = vld [vmem:[#allocation3 + $0x30] sm:$0xff] }
  0xb5   : > { %881 = vrot.lane.b32.xlu1 %v6274_v46, %s5740_s7  ;;  %519 = vst.msk [vmem:[#allocation3 + $0x50] sm:$0xff] %vm516_vm3, %v473_v1  ;;  %v1144_v46 = vpack.c.bf16 %v1115_v40, %v1114_v0  ;;  %v1124_v8 = vld [vmem:[#allocation2 + $0xda] sm:$0xff]  ;;  %v944_v1 = vld [vmem:[#allocation2 + $0x168] sm:$0xff]  ;;  %v945_v0 = vld [vmem:[#allocation2 + $0x170] sm:$0xff] }
  0xb6   : > { %1076 = vrot.lane.b32.xlu0 %v1029_v35, %s5740_s7  ;;  %v1123_v35 = vld [vmem:[#allocation2 + $0xca] sm:$0xff]  ;;  %v1149_v31 = vpack.c.bf16 %v1125_v2, %v1124_v8  ;;  %v963_v40 = vpack.c.bf16 %v945_v0, %v944_v1 }
  0xb7   : > { %v668_v38 = vpop.permute.xlu0 %667  ;;  %v1174_v52 = vld [vmem:[#allocation3] sm:$0xff]  ;;  %1160 = vst.msk [vmem:[#allocation3 + $0x70] sm:$0xff] %vm197_vm0, %v1144_v46  ;;  %v1148_v59 = vpack.c.bf16 %v1123_v35, %v1122_v24 }
  0xb8   : > { %712 = vst.msk [vmem:[#allocation3 + $0x80] sm:$0xff] %vm516_vm3, %v668_v38  ;;  %1630 = vmatmul.mubr.bf16.vlgmr.msra.gmra.mrb[0].mxu0 %v1174_v52  ;;  %v475_v14 = vpop.permute.xlu1 %474  ;;  %v1179_v63 = vld [vmem:[#allocation3 + $0x28] sm:$0xff] }
  0xb9   : > { %883 = vrot.lane.b32.xlu1 %v6306_v48, %s5740_s7  ;;  %5229 = vmatpush3.bf16.msra.mxu0 %v6187_v25  ;;  %520 = vst.msk [vmem:[#allocation3 + $0x78] sm:$0xff] %vm516_vm3, %v475_v14  ;;  %v5463_v48 = vld [vmem:[%s8047_s1 + $0x110] sm:$0xff]   ;;  %v1127_v38 = vld [vmem:[#allocation2 + $0xfa] sm:$0xff] }
  0xba   : > { %1637 = vmatprep.mubr.bf16.mxu0 %v1180_v62  ;;  %5230 = vmatprep.subr.bf16.mxu0 %v5450_v50  ;;  %v1118_v25 = vld [vmem:[#allocation2 + $0x92] sm:$0xff]  ;;  %1164 = vst.msk [vmem:[#allocation3 + $0x110] sm:$0xff] %vm197_vm0, %v1148_v59  ;;  %1165 = vst.msk [vmem:[#allocation3 + $0x138] sm:$0xff] %vm197_vm0, %v1149_v31  ;;  %v1150_v14 = vpack.c.bf16 %v1127_v38, %v1126_v60 }
  0xbb   : > { %v670_v51 = vpop.permute.xlu0 %669  ;;  %v1146_v53 = vpack.c.bf16 %v1119_v15, %v1118_v25  ;;  %v1185_v20 = vld [vmem:[#allocation3 + $0x58] sm:$0xff]  ;;  %v751_v46 = vld [vmem:[#allocation2 + $0x151] sm:$0xff]  ;;  %979 = vst.msk [vmem:[#allocation3 + $0x220] sm:$0xff] %vm197_vm0, %v963_v40 }
  0xbc   : > { %713 = vst.msk [vmem:[#allocation3 + $0xa8] sm:$0xff] %vm516_vm3, %v670_v51  ;;  %v477_v45 = vpop.permute.xlu1 %476  ;;  %v1184_v32 = vld [vmem:[#allocation3 + $0x50] sm:$0xff]  ;;  %v770_v62 = vpack.c.bf16 %v752_v57, %v751_v46  ;;  %v753_v25 = vld [vmem:[#allocation2 + $0x169] sm:$0xff]  ;;  %v754_v15 = vld [vmem:[#allocation2 + $0x171] sm:$0xff] }
  0xbd   : > { %521 = vst.msk [vmem:[#allocation3 + $0xa0] sm:$0xff] %vm516_vm3, %v477_v45  ;;  %5231 = vmatpush3.bf16.msra.mxu0 %v5450_v50  ;;  %v946_v51 = vld [vmem:[#allocation2 + $0x180] sm:$0xff] }
  0xbe   : > { %5232 = vmatprep.subr.bf16.mxu0 %v5463_v48  ;;  %1162 = vst.msk [vmem:[#allocation3 + $0xc0] sm:$0xff] %vm197_vm0, %v1146_v53  ;;  %786 = vst.msk [vmem:[#allocation3 + $0x218] sm:$0xff] %vm197_vm0, %v770_v62  ;;  %v964_v45 = vpack.c.bf16 %v947_v47, %v946_v51  ;;  %v771_v53 = vpack.c.bf16 %v754_v15, %v753_v25 }
  0xbf   : > { %v672_v7 = vpop.permute.xlu0 %671  ;;  %v1190_v26 = vld [vmem:[#allocation3 + $0x80] sm:$0xff]  ;;  %1166 = vst.msk [vmem:[#allocation3 + $0x160] sm:$0xff] %vm197_vm0, %v1150_v14 }
  0xc0   : > { %714 = vst.msk [vmem:[#allocation3 + $0xd0] sm:$0xff] %vm516_vm3, %v672_v7  ;;  %v479_v49 = vpop.permute.xlu1 %478  ;;  %1638 = vmatmul.mubr.bf16.gmra.mrb[4].mxu0 %v1179_v63  ;;  %v1189_v52 = vld [vmem:[#allocation3 + $0x78] sm:$0xff]  ;;  %v1132_v7 = vld [vmem:[#allocation2 + $0x13a] sm:$0xff] }
  0xc1   : > { %522 = vst.msk [vmem:[#allocation3 + $0xc8] sm:$0xff] %vm516_vm3, %v479_v49  ;;  %1645 = vmatprep.mubr.bf16.mxu0 %v1185_v20  ;;  %5233 = vmatpush3.bf16.msra.mxu0 %v5463_v48  ;;  %v1131_v20 = vld [vmem:[#allocation2 + $0x12a] sm:$0xff]  ;;  %v1133_v49 = vld [vmem:[#allocation2 + $0x142] sm:$0xff] }
  0xc2   : > { %5234 = vmatprep.subr.bf16.mxu0 %v5464_v4  ;;  %980 = vst.msk [vmem:[#allocation3 + $0x248] sm:$0xff] %vm197_vm0, %v964_v45  ;;  %787 = vst.msk [vmem:[#allocation3 + $0x240] sm:$0xff] %vm197_vm0, %v771_v53  ;;  %v1152_v36 = vpack.c.bf16 %v1131_v20, %v1130_v58  ;;  %v1153_v13 = vpack.c.bf16 %v1133_v49, %v1132_v7 }
  0xc3   : > { %v674_v29 = vpop.permute.xlu0 %673  ;;  %v1195_v48 = vld [vmem:[#allocation3 + $0xa8] sm:$0xff] }
  0xc4   : > { %715 = vst.msk [vmem:[#allocation3 + $0xf8] sm:$0xff] %vm516_vm3, %v674_v29  ;;  %v949_v29 = vld [vmem:[#allocation2 + $0x1a0] sm:$0xff] }
  0xc5   : > { %v481_v44 = vpop.permute.xlu1 %480  ;;  %5235 = vmatpush3.bf16.msra.mxu0 %v5464_v4  ;;  %v1194_v4 = vld [vmem:[#allocation3 + $0xa0] sm:$0xff]  ;;  %1168 = vst.msk [vmem:[#allocation3 + $0x1b0] sm:$0xff] %vm197_vm0, %v1152_v36  ;;  %1169 = vst.msk [vmem:[#allocation3 + $0x1d8] sm:$0xff] %vm197_vm0, %v1153_v13  ;;  %v965_v42 = vpack.c.bf16 %v949_v29, %v948_v37 }
  0xc6   : > { %523 = vst.msk [vmem:[#allocation3 + $0xf0] sm:$0xff] %vm516_vm3, %v481_v44 }
  0xc7   : > { %v676_v39 = vpop.permute.xlu0 %675  ;;  %v1200_v41 = vld [vmem:[#allocation3 + $0xd0] sm:$0xff]  ;;  %981 = vst.msk [vmem:[#allocation3 + $0x270] sm:$0xff] %vm197_vm0, %v965_v42 }
  0xc8   : > { %716 = vst.msk [vmem:[#allocation3 + $0x120] sm:$0xff] %vm516_vm3, %v676_v39  ;;  %1646 = vmatmul.mubr.bf16.gmra.mrb[8].mxu0 %v1184_v32  ;;  %v1199_v35 = vld [vmem:[#allocation3 + $0xc8] sm:$0xff] }
  0xc9   : > { %v483_v3 = vpop.permute.xlu1 %482  ;;  %1653 = vmatprep.mubr.bf16.mxu0 %v1190_v26  ;;  %v1140_v39 = vld [vmem:[#allocation2 + $0x19a] sm:$0xff] }
  0xca   : > { %524 = vst.msk [vmem:[#allocation3 + $0x118] sm:$0xff] %vm516_vm3, %v483_v3  ;;  %v1141_v3 = vld [vmem:[#allocation2 + $0x1a2] sm:$0xff] }
  0xcb   : > { %v678_v61 = vpop.permute.xlu0 %677  ;;  %v1205_v32 = vld [vmem:[#allocation3 + $0xf8] sm:$0xff]  ;;  %v1157_v0 = vpack.c.bf16 %v1141_v3, %v1140_v39 }
  0xcc   : > { %717 = vst.msk [vmem:[#allocation3 + $0x148] sm:$0xff] %vm516_vm3, %v678_v61 }
  0xcd   : > { %v485_v50 = vpop.permute.xlu1 %484  ;;  %v1204_v31 = vld [vmem:[#allocation3 + $0xf0] sm:$0xff]  ;;  %1173 = vst.msk [vmem:[#allocation3 + $0x278] sm:$0xff] %vm197_vm0, %v1157_v0 }
  0xce   : > { %525 = vst.msk [vmem:[#allocation3 + $0x140] sm:$0xff] %vm516_vm3, %v485_v50 }
  0xcf   : > { %v680_v54 = vpop.permute.xlu0 %679  ;;  %v1210_v1 = vld [vmem:[#allocation3 + $0x120] sm:$0xff] }
  0xd0   : > { %718 = vst.msk [vmem:[#allocation3 + $0x170] sm:$0xff] %vm516_vm3, %v680_v54  ;;  %1654 = vmatmul.mubr.bf16.gmra.mrb[12].mxu0 %v1189_v52 }
  0xd1   : > { %1661 = vmatprep.mubr.bf16.mxu0 %v1195_v48  ;;  %v1209_v62 = vld [vmem:[#allocation3 + $0x118] sm:$0xff] }
  0xd3   : > { %v487_v6 = vpop.permute.xlu1 %486  ;;  %v1215_v50 = vld [vmem:[#allocation3 + $0x148] sm:$0xff] }
  0xd4   : > { %526 = vst.msk [vmem:[#allocation3 + $0x168] sm:$0xff] %vm516_vm3, %v487_v6  ;;  %v682_v63 = vpop.permute.xlu0 %681 }
  0xd5   : > { %719 = vst.msk [vmem:[#allocation3 + $0x198] sm:$0xff] %vm516_vm3, %v682_v63  ;;  %v1214_v48 = vld [vmem:[#allocation3 + $0x140] sm:$0xff] }
  0xd7   : > { %v489_v33 = vpop.permute.xlu1 %488  ;;  %v1220_v56 = vld [vmem:[#allocation3 + $0x170] sm:$0xff] }
  0xd8   : > { %527 = vst.msk [vmem:[#allocation3 + $0x190] sm:$0xff] %vm516_vm3, %v489_v33  ;;  %v684_v43 = vpop.permute.xlu0 %683  ;;  %1662 = vmatmul.mubr.bf16.gmra.mrb[16].mxu0 %v1194_v4 }
  0xd9   : > { %720 = vst.msk [vmem:[#allocation3 + $0x1c0] sm:$0xff] %vm516_vm3, %v684_v43  ;;  %1669 = vmatprep.mubr.bf16.mxu0 %v1200_v41 }
  0xdb   : > { %v491_v28 = vpop.permute.xlu1 %490  ;;  %v1219_v63 = vld [vmem:[#allocation3 + $0x168] sm:$0xff] }
  0xdc   : > { %528 = vst.msk [vmem:[#allocation3 + $0x1b8] sm:$0xff] %vm516_vm3, %v491_v28  ;;  %v686_v44 = vpop.permute.xlu0 %685  ;;  %v1225_v33 = vld [vmem:[#allocation3 + $0x198] sm:$0xff] }
  0xdd   : > { %721 = vst.msk [vmem:[#allocation3 + $0x1e8] sm:$0xff] %vm516_vm3, %v686_v44 }
  0xdf   : > { %v493_v24 = vpop.permute.xlu1 %492  ;;  %v1224_v49 = vld [vmem:[#allocation3 + $0x190] sm:$0xff] }
  0xe0   : > { %529 = vst.msk [vmem:[#allocation3 + $0x1e0] sm:$0xff] %vm516_vm3, %v493_v24  ;;  %v688_v59 = vpop.permute.xlu0 %687  ;;  %1670 = vmatmul.mubr.bf16.gmra.mrb[20].mxu0 %v1199_v35  ;;  %v1230_v13 = vld [vmem:[#allocation3 + $0x1c0] sm:$0xff] }
  0xe1   : > { %722 = vst.msk [vmem:[#allocation3 + $0x210] sm:$0xff] %vm516_vm3, %v688_v59  ;;  %1677 = vmatprep.mubr.bf16.mxu0 %v1205_v32 }
  0xe3   : > { %v495_v8 = vpop.permute.xlu1 %494  ;;  %v1229_v44 = vld [vmem:[#allocation3 + $0x1b8] sm:$0xff] }
  0xe4   : > { %530 = vst.msk [vmem:[#allocation3 + $0x208] sm:$0xff] %vm516_vm3, %v495_v8  ;;  %v690_v2 = vpop.permute.xlu0 %689  ;;  %v1235_v35 = vld [vmem:[#allocation3 + $0x1e8] sm:$0xff] }
  0xe5   : > { %723 = vst.msk [vmem:[#allocation3 + $0x238] sm:$0xff] %vm516_vm3, %v690_v2 }
  0xe7   : > { %v497_v26 = vpop.permute.xlu1 %496 }
  0xe8   : > { %531 = vst.msk [vmem:[#allocation3 + $0x230] sm:$0xff] %vm516_vm3, %v497_v26  ;;  %v1047_v40 = vpop.permute.xlu0 %1046  ;;  %1678 = vmatmul.mubr.bf16.gmra.mrb[24].mxu0 %v1204_v31  ;;  %v1234_v31 = vld [vmem:[#allocation3 + $0x1e0] sm:$0xff]  ;;  %v1240_v3 = vld [vmem:[#allocation3 + $0x210] sm:$0xff] }
  0xe9   : > { %1094 = vst.msk [vmem:[#allocation3 + $0x18] sm:$0xff] %vm516_vm3, %v1047_v40  ;;  %1685 = vmatprep.mubr.bf16.mxu0 %v1210_v1 }
  0xeb   : > { %v854_v46 = vpop.permute.xlu1 %853 }
  0xec   : > { %901 = vst.msk [vmem:[#allocation3 + $0x10] sm:$0xff] %vm516_vm3, %v854_v46  ;;  %v692_v57 = vpop.permute.xlu0 %691 }
  0xed   : > { %724 = vst.msk [vmem:[#allocation3 + $0x260] sm:$0xff] %vm516_vm3, %v692_v57 }
  0xef   : > { %v499_v61 = vpop.permute.xlu1 %498 }
  0xf0   : > { %532 = vst.msk [vmem:[#allocation3 + $0x258] sm:$0xff] %vm516_vm3, %v499_v61  ;;  %v1049_v60 = vpop.permute.xlu0 %1048  ;;  %v1177_v38 = vld [vmem:[#allocation3 + $0x18] sm:$0xff]  ;;  %1686 = vmatmul.mubr.bf16.gmra.mrb[28].mxu0 %v1209_v62  ;;  %v1239_v61 = vld [vmem:[#allocation3 + $0x208] sm:$0xff] }
  0xf1   : > { %1095 = vst.msk [vmem:[#allocation3 + $0x40] sm:$0xff] %vm516_vm3, %v1049_v60  ;;  %1790 = vmatprep.mubr.bf16.mxu1 %v1177_v38  ;;  %1693 = vmatprep.mubr.bf16.mxu0 %v1215_v50  ;;  %v1245_v50 = vld [vmem:[#allocation3 + $0x238] sm:$0xff] }
  0xf3   : > { %v856_v52 = vpop.permute.xlu1 %855  ;;  %v1176_v14 = vld [vmem:[#allocation3 + $0x10] sm:$0xff] }
  0xf4   : > { %902 = vst.msk [vmem:[#allocation3 + $0x38] sm:$0xff] %vm516_vm3, %v856_v52  ;;  %1791 = vmatmul.mubr.bf16.vlgmr.msra.gmra.mrb[0].mxu1 %v1176_v14  ;;  %v1051_v55 = vpop.permute.xlu0 %1050 }
  0xf5   : > { %1096 = vst.msk [vmem:[#allocation3 + $0x68] sm:$0xff] %vm516_vm3, %v1051_v55 }
  0xf7   : > { %v858_v5 = vpop.permute.xlu1 %857 }
  0xf8   : > { %903 = vst.msk [vmem:[#allocation3 + $0x60] sm:$0xff] %vm516_vm3, %v858_v5  ;;  %v1182_v54 = vld [vmem:[#allocation3 + $0x40] sm:$0xff]  ;;  %v1053_v6 = vpop.permute.xlu0 %1052  ;;  %1694 = vmatmul.mubr.bf16.gmra.mrb[32].mxu0 %v1214_v48  ;;  %v1244_v5 = vld [vmem:[#allocation3 + $0x230] sm:$0xff] }
  0xf9   : > { %1798 = vmatprep.mubr.bf16.mxu1 %v1182_v54  ;;  %1097 = vst.msk [vmem:[#allocation3 + $0x90] sm:$0xff] %vm516_vm3, %v1053_v6  ;;  %1701 = vmatprep.mubr.bf16.mxu0 %v1220_v56  ;;  %v1250_v56 = vld [vmem:[#allocation3 + $0x260] sm:$0xff] }
  0xfb   : > { %v1181_v51 = vld [vmem:[#allocation3 + $0x38] sm:$0xff]  ;;  %v860_v47 = vpop.permute.xlu1 %859 }
  0xfc   : > { %1799 = vmatmul.mubr.bf16.gmra.mrb[4].mxu1 %v1181_v51  ;;  %904 = vst.msk [vmem:[#allocation3 + $0x88] sm:$0xff] %vm516_vm3, %v860_v47  ;;  %v1187_v45 = vld [vmem:[#allocation3 + $0x68] sm:$0xff]  ;;  %v1055_v25 = vpop.permute.xlu0 %1054  ;;  %v1249_v47 = vld [vmem:[#allocation3 + $0x258] sm:$0xff] }
  0xfd   : > { %1806 = vmatprep.mubr.bf16.mxu1 %v1187_v45  ;;  %1098 = vst.msk [vmem:[#allocation3 + $0xb8] sm:$0xff] %vm516_vm3, %v1055_v25  ;;  %v1178_v25 = vld [vmem:[#allocation3 + $0x20] sm:$0xff] }
  0xff   : > { %v862_v15 = vpop.permute.xlu1 %861  ;;  %v1186_v53 = vld [vmem:[#allocation3 + $0x60] sm:$0xff] }
 0x100   : > { %905 = vst.msk [vmem:[#allocation3 + $0xb0] sm:$0xff] %vm516_vm3, %v862_v15  ;;  %v1192_v58 = vld [vmem:[#allocation3 + $0x90] sm:$0xff]  ;;  %v1057_v20 = vpop.permute.xlu0 %1056  ;;  %1702 = vmatmul.mubr.bf16.gmra.mrb[36].mxu0 %v1219_v63  ;;  %v5354_v63 = vpack.i.bf16 %v5894_v12, %v5892_v11 }
 0x101   : > { %1099 = vst.msk [vmem:[#allocation3 + $0xe0] sm:$0xff] %vm516_vm3, %v1057_v20  ;;  %1709 = vmatprep.mubr.bf16.mxu0 %v1225_v33  ;;  %v1183_v33 = vld [vmem:[#allocation3 + $0x48] sm:$0xff]  ;;  %v1188_v20 = vld [vmem:[#allocation3 + $0x70] sm:$0xff] }
 0x102   : > { %5355 = vrot.lane.b32.xlu1 %v5354_v63, %s5741_s14  ;;  %v8223_v63 = vld [vmem:[#allocation33_spill] sm:$0xff] }
 0x103   : > { %v864_v4 = vpop.permute.xlu1 %863  ;;  %v1191_v41 = vld [vmem:[#allocation3 + $0x88] sm:$0xff] }
 0x104   : > { %1807 = vmatmul.mubr.bf16.gmra.mrb[8].mxu1 %v1186_v53  ;;  %906 = vst.msk [vmem:[#allocation3 + $0xd8] sm:$0xff] %vm516_vm3, %v864_v4  ;;  %v1059_v36 = vpop.permute.xlu0 %1058  ;;  %v1197_v43 = vld [vmem:[#allocation3 + $0xb8] sm:$0xff]  ;;  %v5349_v53 = vpack.i.bf16 %v5890_v10, %v5888_v9 }
 0x105   : > { %1814 = vmatprep.mubr.bf16.mxu1 %v1192_v58  ;;  %1100 = vst.msk [vmem:[#allocation3 + $0x108] sm:$0xff] %vm516_vm3, %v1059_v36  ;;  %v5364_v36 = vpack.i.bf16 %v5905_v19, %v5903_v18 }
 0x106   : > { %5350 = vrot.lane.b32.xlu0 %v5349_v53, %s5741_s14 }
 0x107   : > { %v866_v7 = vpop.permute.xlu1 %865  ;;  %v1196_v24 = vld [vmem:[#allocation3 + $0xb0] sm:$0xff]  ;;  %5365 = vrot.lane.b32.xlu1 %v5364_v36, %s5741_s14  ;;  %v8225_v36 = vld [vmem:[#allocation39_spill] sm:$0xff] }
 0x108   : > { %907 = vst.msk [vmem:[#allocation3 + $0x100] sm:$0xff] %vm516_vm3, %v866_v7  ;;  %v1061_v28 = vpop.permute.xlu0 %1060  ;;  %1710 = vmatmul.mubr.bf16.gmra.mrb[40].mxu0 %v1224_v49  ;;  %v1202_v32 = vld [vmem:[#allocation3 + $0xe0] sm:$0xff]  ;;  %v5359_v7 = vpack.i.bf16 %v5901_v17, %v5899_v16  ;;  %v1193_v49 = vld [vmem:[#allocation3 + $0x98] sm:$0xff] }
 0x109   : > { %1101 = vst.msk [vmem:[#allocation3 + $0x130] sm:$0xff] %vm516_vm3, %v1061_v28  ;;  %1717 = vmatprep.mubr.bf16.mxu0 %v1230_v13  ;;  %v1198_v13 = vld [vmem:[#allocation3 + $0xc0] sm:$0xff]  ;;  %v5374_v28 = vpack.i.bf16 %v5933_v27, %v5920_v23 }
 0x10a   : > { %5360 = vrot.lane.b32.xlu0 %v5359_v7, %s5741_s14 }
 0x10b   : > { %v868_v37 = vpop.permute.xlu1 %867  ;;  %v1201_v39 = vld [vmem:[#allocation3 + $0xd8] sm:$0xff]  ;;  %5375 = vrot.lane.b32.xlu1 %v5374_v28, %s5741_s14 }
 0x10c   : > { %1815 = vmatmul.mubr.bf16.gmra.mrb[12].mxu1 %v1191_v41  ;;  %908 = vst.msk [vmem:[#allocation3 + $0x128] sm:$0xff] %vm516_vm3, %v868_v37  ;;  %v1063_v29 = vpop.permute.xlu0 %1062  ;;  %v1207_v1 = vld [vmem:[#allocation3 + $0x108] sm:$0xff]  ;;  %v5369_v37 = vpack.i.bf16 %v5918_v22, %v5916_v21 }
 0x10d   : > { %1822 = vmatprep.mubr.bf16.mxu1 %v1197_v43  ;;  %1102 = vst.msk [vmem:[#allocation3 + $0x158] sm:$0xff] %vm516_vm3, %v1063_v29  ;;  %v1203_v29 = vld [vmem:[#allocation3 + $0xe8] sm:$0xff] }
 0x10e   : > { %5370 = vrot.lane.b32.xlu0 %v5369_v37, %s5741_s14 }
 0x10f   : > { %v870_v42 = vpop.permute.xlu1 %869  ;;  %v1206_v62 = vld [vmem:[#allocation3 + $0x100] sm:$0xff] }
 0x110   : > { %909 = vst.msk [vmem:[#allocation3 + $0x150] sm:$0xff] %vm516_vm3, %v870_v42  ;;  %v1065_v59 = vpop.permute.xlu0 %1064  ;;  %1718 = vmatmul.mubr.bf16.gmra.mrb[44].mxu0 %v1229_v44  ;;  %v1212_v60 = vld [vmem:[#allocation3 + $0x130] sm:$0xff] }
 0x111   : > { %1103 = vst.msk [vmem:[#allocation3 + $0x180] sm:$0xff] %vm516_vm3, %v1065_v59  ;;  %1725 = vmatprep.mubr.bf16.mxu0 %v1235_v35  ;;  %v1208_v44 = vld [vmem:[#allocation3 + $0x110] sm:$0xff]  ;;  %v5384_v35 = vpack.i.bf16 %v5950_v34, %v5939_v30  ;;  %v8211_v59 = vld [vmem:[#allocation21_spill] sm:$0xff] }
 0x113   : > { %v872_v8 = vpop.permute.xlu1 %871  ;;  %v1211_v48 = vld [vmem:[#allocation3 + $0x128] sm:$0xff]  ;;  %5385 = vrot.lane.b32.xlu1 %v5384_v35, %s5741_s14 }
 0x114   : > { %1823 = vmatmul.mubr.bf16.gmra.mrb[16].mxu1 %v1196_v24  ;;  %910 = vst.msk [vmem:[#allocation3 + $0x178] sm:$0xff] %vm516_vm3, %v872_v8  ;;  %v1067_v2 = vpop.permute.xlu0 %1066  ;;  %v1217_v54 = vld [vmem:[#allocation3 + $0x158] sm:$0xff] }
 0x115   : > { %1830 = vmatprep.mubr.bf16.mxu1 %v1202_v32  ;;  %1104 = vst.msk [vmem:[#allocation3 + $0x1a8] sm:$0xff] %vm516_vm3, %v1067_v2  ;;  %v8210_v32 = vld [vmem:[#allocation20_spill] sm:$0xff]  ;;  %v1213_v2 = vld [vmem:[#allocation3 + $0x138] sm:$0xff] }
 0x116   : > { %v5379_v8 = vpack.i.bf16 %v8211_v59, %v8210_v32 }
 0x117   : > { %v874_v26 = vpop.permute.xlu1 %873  ;;  %v1216_v45 = vld [vmem:[#allocation3 + $0x150] sm:$0xff] }
 0x118   : > { %911 = vst.msk [vmem:[#allocation3 + $0x1a0] sm:$0xff] %vm516_vm3, %v874_v26  ;;  %v1069_v0 = vpop.permute.xlu0 %1068  ;;  %1726 = vmatmul.mubr.bf16.gmra.mrb[48].mxu0 %v1234_v31  ;;  %v1222_v15 = vld [vmem:[#allocation3 + $0x180] sm:$0xff]  ;;  %5380 = vrot.lane.b32.xlu0 %v5379_v8, %s5741_s14 }
 0x119   : > { %1105 = vst.msk [vmem:[#allocation3 + $0x1d0] sm:$0xff] %vm516_vm3, %v1069_v0  ;;  %1733 = vmatprep.mubr.bf16.mxu0 %v1240_v3  ;;  %v1218_v31 = vld [vmem:[#allocation3 + $0x160] sm:$0xff]  ;;  %v8212_v3 = vld [vmem:[#allocation26_spill] sm:$0xff] }
 0x11b   : > { %v876_v40 = vpop.permute.xlu1 %875  ;;  %v1221_v58 = vld [vmem:[#allocation3 + $0x178] sm:$0xff] }
 0x11c   : > { %1831 = vmatmul.mubr.bf16.gmra.mrb[20].mxu1 %v1201_v39  ;;  %912 = vst.msk [vmem:[#allocation3 + $0x1c8] sm:$0xff] %vm516_vm3, %v876_v40  ;;  %v1071_v46 = vpop.permute.xlu0 %1070  ;;  %v1227_v4 = vld [vmem:[#allocation3 + $0x1a8] sm:$0xff]  ;;  %v8214_v40 = vld [vmem:[#allocation24_spill] sm:$0xff] }
 0x11d   : > { %1838 = vmatprep.mubr.bf16.mxu1 %v1207_v1  ;;  %1106 = vst.msk [vmem:[#allocation3 + $0x1f8] sm:$0xff] %vm516_vm3, %v1071_v46  ;;  %v8213_v1 = vld [vmem:[#allocation27_spill] sm:$0xff]  ;;  %v8215_v46 = vld [vmem:[#allocation25_spill] sm:$0xff] }
 0x11e   : > { %v5394_v0 = vpack.i.bf16 %v8213_v1, %v8212_v3 }
 0x11f   : > { %v878_v57 = vpop.permute.xlu1 %877  ;;  %v1226_v41 = vld [vmem:[#allocation3 + $0x1a0] sm:$0xff] }
 0x120   : > { %913 = vst.msk [vmem:[#allocation3 + $0x1f0] sm:$0xff] %vm516_vm3, %v878_v57  ;;  %v1073_v38 = vpop.permute.xlu0 %1072  ;;  %1734 = vmatmul.mubr.bf16.gmra.mrb[52].mxu0 %v1239_v61  ;;  %v1232_v43 = vld [vmem:[#allocation3 + $0x1d0] sm:$0xff]  ;;  %v5389_v57 = vpack.i.bf16 %v8215_v46, %v8214_v40  ;;  %v1223_v61 = vld [vmem:[#allocation3 + $0x188] sm:$0xff]  ;;  %5395 = vrot.lane.b32.xlu1 %v5394_v0, %s5741_s14 }
 0x121   : > { %1107 = vst.msk [vmem:[#allocation3 + $0x220] sm:$0xff] %vm516_vm3, %v1073_v38  ;;  %1741 = vmatprep.mubr.bf16.mxu0 %v1245_v50  ;;  %v1228_v50 = vld [vmem:[#allocation3 + $0x1b0] sm:$0xff] }
 0x122   : > { %5390 = vrot.lane.b32.xlu0 %v5389_v57, %s5741_s14  ;;  %v8216_v38 = vld [vmem:[#allocation30_spill] sm:$0xff] }
 0x123   : > { %v880_v52 = vpop.permute.xlu1 %879  ;;  %v1231_v42 = vld [vmem:[#allocation3 + $0x1c8] sm:$0xff] }
 0x124   : > { %1839 = vmatmul.mubr.bf16.gmra.mrb[24].mxu1 %v1206_v62  ;;  %914 = vst.msk [vmem:[#allocation3 + $0x218] sm:$0xff] %vm516_vm3, %v880_v52  ;;  %v1075_v14 = vpop.permute.xlu0 %1074  ;;  %v1237_v24 = vld [vmem:[#allocation3 + $0x1f8] sm:$0xff] }
 0x125   : > { %1846 = vmatprep.mubr.bf16.mxu1 %v1212_v60  ;;  %1108 = vst.msk [vmem:[#allocation3 + $0x248] sm:$0xff] %vm516_vm3, %v1075_v14  ;;  %v8217_v52 = vld [vmem:[#allocation31_spill] sm:$0xff] }
 0x126   : > { %v5404_v14 = vpack.i.bf16 %v8217_v52, %v8216_v38 }
 0x127   : > { %v882_v55 = vpop.permute.xlu1 %881  ;;  %v1236_v26 = vld [vmem:[#allocation3 + $0x1f0] sm:$0xff] }
 0x128   : > { %915 = vst.msk [vmem:[#allocation3 + $0x240] sm:$0xff] %vm516_vm3, %v882_v55  ;;  %v1077_v6 = vpop.permute.xlu0 %1076  ;;  %1742 = vmatmul.mubr.bf16.gmra.mrb[56].mxu0 %v1244_v5  ;;  %v1242_v39 = vld [vmem:[#allocation3 + $0x220] sm:$0xff]  ;;  %v8219_v5 = vld [vmem:[#allocation29_spill] sm:$0xff]  ;;  %5405 = vrot.lane.b32.xlu1 %v5404_v14, %s5741_s14  ;;  %v2657_v14 = vld [vmem:[#allocation2 + $0x1] sm:$0xff] }
 0x129   : > { %1109 = vst.msk [vmem:[#allocation3 + $0x270] sm:$0xff] %vm516_vm3, %v1077_v6  ;;  %1749 = vmatprep.mubr.bf16.mxu0 %v1250_v56  ;;  %v8218_v55 = vld [vmem:[#allocation28_spill] sm:$0xff]  ;;  %v1233_v56 = vld [vmem:[#allocation3 + $0x1d8] sm:$0xff] }
 0x12a   : > { %v1238_v6 = vld [vmem:[#allocation3 + $0x200] sm:$0xff] }
 0x12b   : > { %v884_v51 = vpop.permute.xlu1 %883  ;;  %v1241_v62 = vld [vmem:[#allocation3 + $0x218] sm:$0xff] }
 0x12c   : > { %1847 = vmatmul.mubr.bf16.gmra.mrb[28].mxu1 %v1211_v48  ;;  %916 = vst.msk [vmem:[#allocation3 + $0x268] sm:$0xff] %vm516_vm3, %v884_v51  ;;  %v1247_v60 = vld [vmem:[#allocation3 + $0x248] sm:$0xff]  ;;  %v5399_v48 = vpack.i.bf16 %v8219_v5, %v8218_v55 }
 0x12d   : > { %1854 = vmatprep.mubr.bf16.mxu1 %v1217_v54 }
 0x12e   : > { %5400 = vrot.lane.b32.xlu0 %v5399_v48, %s5741_s14  ;;  %v2658_v48 = vld [vmem:[#allocation2 + $0x9] sm:$0xff] }
 0x12f   : > { %v1246_v54 = vld [vmem:[#allocation3 + $0x240] sm:$0xff] }
 0x130   : > { %1750 = vmatmul.mubr.bf16.gmra.mrb[60].mxu0 %v1249_v47  ;;  %v1252_v51 = vld [vmem:[#allocation3 + $0x270] sm:$0xff] }
 0x131   : > { %5236 = vmatprep.mubr.msk.bf16.mxu0 %vm197_vm0, %v1178_v25  ;;  %v8220_v47 = vld [vmem:[#allocation34_spill] sm:$0xff] }
 0x134   : > { %1855 = vmatmul.mubr.bf16.gmra.mrb[32].mxu1 %v1216_v45  ;;  %v8221_v45 = vld [vmem:[#allocation35_spill] sm:$0xff] }
 0x135   : > { %1862 = vmatprep.mubr.bf16.mxu1 %v1222_v15  ;;  %v5414_v25 = vpack.i.bf16 %v8221_v45, %v8220_v47  ;;  %v8222_v15 = vld [vmem:[#allocation32_spill] sm:$0xff] }
 0x136   : > { %v5409_v53 = vpack.i.bf16 %v8223_v63, %v8222_v15 }
 0x137   : > { %5415 = vrot.lane.b32.xlu1 %v5414_v25, %s5741_s14 }
 0x138   : > { %5237 = vmatmul.mubr.msk.bf16.vlgmr.msra.gmra.mrb[64].mxu0 %vm197_vm0, %v1183_v33  ;;  %v1243_v33 = vld [vmem:[#allocation3 + $0x228] sm:$0xff]  ;;  %5410 = vrot.lane.b32.xlu0 %v5409_v53, %s5741_s14 }
 0x139   : > { %5240 = vmatprep.mubr.msk.bf16.mxu0 %vm197_vm0, %v1188_v20  ;;  %v1248_v20 = vld [vmem:[#allocation3 + $0x250] sm:$0xff] }
 0x13c   : > { %1863 = vmatmul.mubr.bf16.gmra.mrb[36].mxu1 %v1221_v58  ;;  %v1251_v58 = vld [vmem:[#allocation3 + $0x268] sm:$0xff] }
 0x13d   : > { %1870 = vmatprep.mubr.bf16.mxu1 %v1227_v4  ;;  %v8224_v4 = vld [vmem:[#allocation38_spill] sm:$0xff] }
 0x13e   : > { %v5424_v7 = vpack.i.bf16 %v8225_v36, %v8224_v4 }
 0x140   : > { %5241 = vmatmul.mubr.msk.bf16.gmra.mrb[68].mxu0 %vm197_vm0, %v1193_v49  ;;  %v8226_v49 = vld [vmem:[#allocation36_spill] sm:$0xff]  ;;  %5425 = vrot.lane.b32.xlu1 %v5424_v7, %s5741_s14 }
 0x141   : > { %5244 = vmatprep.mubr.msk.bf16.mxu0 %vm197_vm0, %v1198_v13 }
 0x144   : > { %1871 = vmatmul.mubr.bf16.gmra.mrb[40].mxu1 %v1226_v41  ;;  %v8227_v41 = vld [vmem:[#allocation37_spill] sm:$0xff] }
 0x145   : > { %1878 = vmatprep.mubr.bf16.mxu1 %v1232_v43  ;;  %v5419_v13 = vpack.i.bf16 %v8227_v41, %v8226_v49  ;;  %v1253_v43 = vld [vmem:[#allocation3 + $0x278] sm:$0xff] }
 0x147   : > { %5420 = vrot.lane.b32.xlu0 %v5419_v13, %s5741_s14 }
 0x148   : > { %5245 = vmatmul.mubr.msk.bf16.gmra.mrb[72].mxu0 %vm197_vm0, %v1203_v29 }
 0x149   : > { %5248 = vmatprep.mubr.msk.bf16.mxu0 %vm197_vm0, %v1208_v44 }
 0x14c   : > { %1879 = vmatmul.mubr.bf16.gmra.mrb[44].mxu1 %v1231_v42 }
 0x14d   : > { %1886 = vmatprep.mubr.bf16.mxu1 %v1237_v24 }
 0x150   : > { %5249 = vmatmul.mubr.msk.bf16.gmra.mrb[76].mxu0 %vm197_vm0, %v1213_v2 }
 0x151   : > { %5252 = vmatprep.mubr.msk.bf16.mxu0 %vm197_vm0, %v1218_v31 }
 0x154   : > { %1887 = vmatmul.mubr.bf16.gmra.mrb[48].mxu1 %v1236_v26 }
 0x155   : > { %1894 = vmatprep.mubr.bf16.mxu1 %v1242_v39 }
 0x158   : > { %5253 = vmatmul.mubr.msk.bf16.gmra.mrb[80].mxu0 %vm197_vm0, %v1223_v61 }
 0x159   : > { %5256 = vmatprep.mubr.msk.bf16.mxu0 %vm197_vm0, %v1228_v50 }
 0x15c   : > { %1895 = vmatmul.mubr.bf16.gmra.mrb[52].mxu1 %v1241_v62 }
 0x15d   : > { %1902 = vmatprep.mubr.bf16.mxu1 %v1247_v60 }
 0x160   : > { %5257 = vmatmul.mubr.msk.bf16.gmra.mrb[84].mxu0 %vm197_vm0, %v1233_v56 }
 0x161   : > { %5260 = vmatprep.mubr.msk.bf16.mxu0 %vm197_vm0, %v1238_v6 }
 0x164   : > { %1903 = vmatmul.mubr.bf16.gmra.mrb[56].mxu1 %v1246_v54  ;;  %v2689_v54 = vpack.c.bf16 %v2658_v48, %v2657_v14 }
 0x165   : > { %1910 = vmatprep.mubr.bf16.mxu1 %v1252_v51 }
 0x166   : > { %2721 = vrot.lane.b32.xlu1 %v2689_v54, %s5741_s14 }
 0x168   : > { %5261 = vmatmul.mubr.msk.bf16.gmra.mrb[88].mxu0 %vm197_vm0, %v1243_v33  ;;  %v2786_v33 = vld [vmem:[#allocation2 + $0x2] sm:$0xff] }
 0x169   : > { %5264 = vmatprep.mubr.msk.bf16.mxu0 %vm197_vm0, %v1248_v20 }
 0x16c   : > { %1911 = vmatmul.mubr.bf16.gmra.mrb[60].mxu1 %v1251_v58  ;;  %v2787_v58 = vld [vmem:[#allocation2 + $0xa] sm:$0xff] }
 0x16d   : > { %v2818_v7 = vpack.c.bf16 %v2787_v58, %v2786_v33 }
 0x16f   : > { %2850 = vrot.lane.b32.xlu1 %v2818_v7, %s5740_s7 }
 0x170   : > { %5265 = vmatmul.mubr.msk.bf16.gmra.mrb[92].mxu0 %vm197_vm0, %v1253_v43 }
 0x18b   : > { %v4870_v28 = vpop.f32.mrb[0].mxu0 }
 0x18c   : > { %v4871_v37 = vpop.f32.mrb[1].mxu0 }
 0x18d   : > { %v4872_v29 = vadd.f32 %v4871_v37, %v4870_v28  ;;  %v4873_v42 = vpop.f32.mrb[2].mxu0 }
 0x18e   : > { %v4874_v44 = vpop.f32.mrb[3].mxu0 }
 0x18f   : > { %v4875_v24 = vadd.f32 %v4874_v44, %v4873_v42 }
 0x193   : > { %v4876_v35 = vpop.f32.mrb[4].mxu0 }
 0x194   : > { %v4877_v8 = vpop.f32.mrb[5].mxu0 }
 0x195   : > { %v6564_v2 = vadd.f32 %v4877_v8, %v4876_v35  ;;  %v4879_v26 = vpop.f32.mrb[6].mxu0 }
 0x196   : > { %v4880_v31 = vpop.f32.mrb[7].mxu0 }
 0x197   : > { %v6566_v39 = vadd.f32 %v4880_v31, %v4879_v26 }
 0x19b   : > { %v4882_v0 = vpop.f32.mrb[8].mxu0 }
 0x19c   : > { %v4883_v57 = vpop.f32.mrb[9].mxu0 }
 0x19d   : > { %v6568_v61 = vadd.f32 %v4883_v57, %v4882_v0  ;;  %v4885_v62 = vpop.f32.mrb[10].mxu0 }
 0x19e   : > { %v4886_v50 = vpop.f32.mrb[11].mxu0 }
 0x19f   : > { %v6570_v60 = vadd.f32 %v4886_v50, %v4885_v62 }
 0x1a3   : > { %v4888_v56 = vpop.f32.mrb[12].mxu0 }
 0x1a4   : > { %v4889_v6 = vpop.f32.mrb[13].mxu0 }
 0x1a5   : > { %v6572_v51 = vadd.f32 %v4889_v6, %v4888_v56  ;;  %v4891_v25 = vpop.f32.mrb[14].mxu0  ;;  %v6593_v6 = vld [vmem:[%s8048_s2] ss:$0 sm:$0xff] }
 0x1a6   : > { %v4892_v53 = vpop.f32.mrb[15].mxu0 }
 0x1a7   : > { %v6575_v20 = vadd.f32 %v4892_v53, %v4891_v25 }
 0x1ab   : > { %v4894_v13 = vpop.f32.mrb[16].mxu0 }
 0x1ac   : > { %v4895_v43 = vpop.f32.mrb[17].mxu0 }
 0x1ad   : > { %v6578_v28 = vadd.f32 %v4895_v43, %v4894_v13  ;;  %v4897_v37 = vpop.f32.mrb[18].mxu0  ;;  %v1632_v43 = vadd.f32 %v4872_v29, %v6593_v6 }
 0x1ae   : > { %v4898_v42 = vpop.f32.mrb[19].mxu0 }
 0x1af   : > { %v6580_v44 = vadd.f32 %v4898_v42, %v4897_v37 }
 0x1b3   : > { %v4900_v35 = vpop.f32.mrb[20].mxu0 }
 0x1b4   : > { %v4901_v8 = vpop.f32.mrb[21].mxu0 }
 0x1b5   : > { %v6582_v26 = vadd.f32 %v4901_v8, %v4900_v35  ;;  %v4903_v31 = vpop.f32.mrb[22].mxu0 }
 0x1b6   : > { %v4904_v0 = vpop.f32.mrb[23].mxu0 }
 0x1b7   : > { %v6584_v57 = vadd.f32 %v4904_v0, %v4903_v31  ;;  %v1635_v0 = vadd.f32 %v4875_v24, %v6593_v6 }
 0x1bb   : > { %v4906_v62 = vpop.f32.mrb[24].mxu0 }
 0x1bc   : > { %v4907_v50 = vpop.f32.mrb[25].mxu0 }
 0x1bd   : > { %v6586_v14 = vadd.f32 %v4907_v50, %v4906_v62  ;;  %v4909_v48 = vpop.f32.mrb[26].mxu0 }
 0x1be   : > { %v4910_v56 = vpop.f32.mrb[27].mxu0 }
 0x1bf   : > { %v6588_v54 = vadd.f32 %v4910_v56, %v4909_v48 }
 0x1c3   : > { %v4912_v25 = vpop.f32.mrb[28].mxu0 }
 0x1c4   : > { %v4913_v53 = vpop.f32.mrb[29].mxu0 }
 0x1c5   : > { %v6595_v58 = vadd.f32 %v4913_v53, %v4912_v25  ;;  %v4915_v7 = vpop.f32.mrb[30].mxu0 }
 0x1c6   : > { %v4916_v42 = vpop.f32.mrb[31].mxu0 }
 0x1c7   : > { %v4982_v33 = vpop.f32.mrb[0].mxu1  ;;  %v6598_v8 = vadd.f32 %v4916_v42, %v4915_v7  ;;  %v1688_v1 = vadd.f32 %v6595_v58, %v6593_v6 }
 0x1c8   : > { %v4983_v13 = vpop.f32.mrb[1].mxu1 }
 0x1c9   : > { %v4984_v37 = vadd.f32 %v4983_v13, %v4982_v33  ;;  %v4985_v35 = vpop.f32.mrb[2].mxu1  ;;  %v1640_v33 = vadd.f32 %v6564_v2, %v6593_v6 }
 0x1ca   : > { %v4986_v31 = vpop.f32.mrb[3].mxu1 }
 0x1cb   : > { %v4987_v62 = vadd.f32 %v4986_v31, %v4985_v35  ;;  %v6601_v50 = vadd.f32 %v4984_v37, %v1632_v43  ;;  %v4918_v56 = vpop.f32.mrb[32].mxu0  ;;  %v1643_v43 = vadd.f32 %v6566_v39, %v6593_v6 }
 0x1cc   : > { %v4919_v25 = vpop.f32.mrb[33].mxu0 }
 0x1cd   : > { %v6603_v48 = vadd.f32 %v4987_v62, %v1635_v0  ;;  %v6605_v36 = vadd.f32 %v4919_v25, %v4918_v56  ;;  %v4921_v4 = vpop.f32.mrb[34].mxu0 }
 0x1ce   : > { %v4922_v13 = vpop.f32.mrb[35].mxu0 }
 0x1cf   : > { %v4988_v53 = vpop.f32.mrb[4].mxu1  ;;  %v6609_v41 = vadd.f32 %v4922_v13, %v4921_v4  ;;  %v1648_v4 = vadd.f32 %v6568_v61, %v6593_v6  ;;  %v1696_v30 = vadd.f32 %v6605_v36, %v6593_v6 }
 0x1d0   : > { %v4989_v29 = vpop.f32.mrb[5].mxu1 }
 0x1d1   : > { %v4990_v7 = vadd.f32 %v4989_v29, %v4988_v53  ;;  %v4991_v42 = vpop.f32.mrb[6].mxu1 }
 0x1d2   : > { %v4992_v24 = vpop.f32.mrb[7].mxu1 }
 0x1d3   : > { %v4993_v37 = vadd.f32 %v4992_v24, %v4991_v42  ;;  %v6613_v35 = vadd.f32 %v4990_v7, %v1640_v33  ;;  %v4924_v0 = vpop.f32.mrb[36].mxu0  ;;  %v1651_v33 = vadd.f32 %v6570_v60, %v6593_v6  ;;  %v1659_v60 = vadd.f32 %v6575_v20, %v6593_v6 }
 0x1d4   : > { %v4925_v62 = vpop.f32.mrb[37].mxu0  ;;  %v1667_v20 = vadd.f32 %v6580_v44, %v6593_v6 }
 0x1d5   : > { %v6615_v31 = vadd.f32 %v4993_v37, %v1643_v43  ;;  %v6617_v25 = vadd.f32 %v4925_v62, %v4924_v0  ;;  %v4927_v2 = vpop.f32.mrb[38].mxu0 }
 0x1d6   : > { %v4928_v13 = vpop.f32.mrb[39].mxu0 }
 0x1d7   : > { %v4994_v56 = vpop.f32.mrb[8].mxu1  ;;  %v6621_v45 = vadd.f32 %v4928_v13, %v4927_v2  ;;  %v1656_v2 = vadd.f32 %v6572_v51, %v6593_v6 }
 0x1d8   : > { %v4995_v53 = vpop.f32.mrb[9].mxu1 }
 0x1d9   : > { %v4996_v29 = vadd.f32 %v4995_v53, %v4994_v56  ;;  %v4997_v49 = vpop.f32.mrb[10].mxu1 }
 0x1da   : > { %v4998_v39 = vpop.f32.mrb[11].mxu1 }
 0x1db   : > { %v4999_v7 = vadd.f32 %v4998_v39, %v4997_v49  ;;  %v6625_v42 = vadd.f32 %v4996_v29, %v1648_v4  ;;  %v4930_v43 = vpop.f32.mrb[40].mxu0 }
 0x1dc   : > { %v4931_v37 = vpop.f32.mrb[41].mxu0 }
 0x1dd   : > { %v6627_v24 = vadd.f32 %v4999_v7, %v1651_v33  ;;  %v6629_v62 = vadd.f32 %v4931_v37, %v4930_v43  ;;  %v4933_v61 = vpop.f32.mrb[42].mxu0 }
 0x1de   : > { %v4934_v13 = vpop.f32.mrb[43].mxu0 }
 0x1df   : > { %v5000_v0 = vpop.f32.mrb[12].mxu1  ;;  %v6633_v63 = vadd.f32 %v4934_v13, %v4933_v61  ;;  %v1664_v61 = vadd.f32 %v6578_v28, %v6593_v6 }
 0x1e0   : > { %v5001_v56 = vpop.f32.mrb[13].mxu1 }
 0x1e1   : > { %v5002_v53 = vadd.f32 %v5001_v56, %v5000_v0  ;;  %v5003_v47 = vpop.f32.mrb[14].mxu1 }
 0x1e2   : > { %v5004_v49 = vpop.f32.mrb[15].mxu1 }
 0x1e3   : > { %v5005_v4 = vadd.f32 %v5004_v49, %v5003_v47  ;;  %v6637_v29 = vadd.f32 %v5002_v53, %v1656_v2  ;;  %v4936_v33 = vpop.f32.mrb[44].mxu0 }
 0x1e4   : > { %v4937_v7 = vpop.f32.mrb[45].mxu0 }
 0x1e5   : > { %v6639_v39 = vadd.f32 %v5005_v4, %v1659_v60  ;;  %v6641_v37 = vadd.f32 %v4937_v7, %v4936_v33  ;;  %v4939_v51 = vpop.f32.mrb[46].mxu0 }
 0x1e6   : > { %v4940_v13 = vpop.f32.mrb[47].mxu0 }
 0x1e7   : > { %v5006_v43 = vpop.f32.mrb[16].mxu1  ;;  %v6645_v52 = vadd.f32 %v4940_v13, %v4939_v51  ;;  %v2594_v51 = vld [vmem:[#allocation2 + $0x8] sm:$0xff]  ;;  %v1672_v13 = vadd.f32 %v6582_v26, %v6593_v6  ;;  %v1720_v12 = vadd.f32 %v6641_v37, %v6593_v6 }
 0x1e8   : > { %v5007_v0 = vpop.f32.mrb[17].mxu1 }
 0x1e9   : > { %v5008_v56 = vadd.f32 %v5007_v0, %v5006_v43  ;;  %v5009_v15 = vpop.f32.mrb[18].mxu1  ;;  %v2593_v0 = vld [vmem:[#allocation2] sm:$0xff] }
 0x1ea   : > { %v5010_v47 = vpop.f32.mrb[19].mxu1 }
 0x1eb   : > { %v5011_v2 = vadd.f32 %v5010_v47, %v5009_v15  ;;  %v6649_v53 = vadd.f32 %v5008_v56, %v1664_v61  ;;  %v4942_v60 = vpop.f32.mrb[48].mxu0  ;;  %v2625_v61 = vpack.c.bf16 %v2594_v51, %v2593_v0 }
 0x1ec   : > { %v4943_v4 = vpop.f32.mrb[49].mxu0 }
 0x1ed   : > { %v6651_v49 = vadd.f32 %v5011_v2, %v1667_v20  ;;  %v6653_v7 = vadd.f32 %v4943_v4, %v4942_v60  ;;  %v4945_v28 = vpop.f32.mrb[50].mxu0  ;;  %v1675_v20 = vadd.f32 %v6584_v57, %v6593_v6  ;;  %2641 = vst.msk [vmem:[#allocation4] sm:$0xff] %vm2560_vm4, %v2625_v61  ;;  %v1683_v61 = vadd.f32 %v6588_v54, %v6593_v6 }
 0x1ee   : > { %v4946_v44 = vpop.f32.mrb[51].mxu0 }
 0x1ef   : > { %v5012_v33 = vpop.f32.mrb[20].mxu1  ;;  %v6657_v56 = vadd.f32 %v4946_v44, %v4945_v28  ;;  %v1680_v28 = vadd.f32 %v6586_v14, %v6593_v6 }
 0x1f0   : > { %v5013_v43 = vpop.f32.mrb[21].mxu1 }
 0x1f1   : > { %v5014_v38 = vadd.f32 %v5013_v43, %v5012_v33  ;;  %v5015_v15 = vpop.f32.mrb[22].mxu1 }
 0x1f2   : > { %v5016_v47 = vpop.f32.mrb[23].mxu1 }
 0x1f3   : > { %v5017_v2 = vadd.f32 %v5016_v47, %v5015_v15  ;;  %v6661_v60 = vadd.f32 %v5014_v38, %v1672_v13  ;;  %v4948_v5 = vpop.f32.mrb[52].mxu0  ;;  %v6672_v13 = vpop.permute.xlu1 %5355 }
 0x1f4   : > { %v4949_v55 = vpop.f32.mrb[53].mxu0 }
 0x1f5   : > { %v6664_v4 = vadd.f32 %v5017_v2, %v1675_v20  ;;  %v6666_v33 = vadd.f32 %v4949_v55, %v4948_v5  ;;  %v4951_v43 = vpop.f32.mrb[54].mxu0 }
 0x1f6   : > { %v4952_v44 = vpop.f32.mrb[55].mxu0 }
 0x1f7   : > { %v5018_v26 = vpop.f32.mrb[24].mxu1  ;;  %v6670_v15 = vadd.f32 %v4952_v44, %v4951_v43  ;;  %v6680_v2 = vpop.permute.xlu1 %5365 }
 0x1f8   : > { %v5019_v0 = vpop.f32.mrb[25].mxu1 }
 0x1f9   : > { %v5020_v51 = vadd.f32 %v5019_v0, %v5018_v26  ;;  %v5021_v57 = vpop.f32.mrb[26].mxu1 }
 0x1fa   : > { %v5022_v38 = vpop.f32.mrb[27].mxu1 }
 0x1fb   : > { %v5023_v47 = vadd.f32 %v5022_v38, %v5021_v57  ;;  %v6676_v20 = vadd.f32 %v5020_v51, %v1680_v28  ;;  %v4954_v5 = vpop.f32.mrb[56].mxu0  ;;  %v6688_v51 = vpop.permute.xlu1 %5375  ;;  %v1691_v38 = vadd.f32 %v6598_v8, %v6593_v6 }
 0x1fc   : > { %v4955_v14 = vpop.f32.mrb[57].mxu0 }
 0x1fd   : > { %v6678_v55 = vadd.f32 %v5023_v47, %v1683_v61  ;;  %v6682_v0 = vadd.f32 %v4955_v14, %v4954_v5  ;;  %v4957_v43 = vpop.f32.mrb[58].mxu0  ;;  %v6696_v14 = vpop.permute.xlu0 %5350 }
 0x1fe   : > { %v4958_v46 = vpop.f32.mrb[59].mxu0 }
 0x1ff   : > { %v5024_v26 = vpop.f32.mrb[28].mxu1  ;;  %v6686_v57 = vadd.f32 %v4958_v46, %v4957_v43  ;;  %v6698_v58 = vpop.permute.xlu1 %5385 }
 0x200   : > { %v5025_v44 = vpop.f32.mrb[29].mxu1 }
 0x201   : > { %v5026_v3 = vadd.f32 %v5025_v44, %v5024_v26  ;;  %v5027_v54 = vpop.f32.mrb[30].mxu1 }
 0x202   : > { %v5028_v28 = vpop.f32.mrb[31].mxu1 }
 0x203   : > { %v5029_v61 = vadd.f32 %v5028_v28, %v5027_v54  ;;  %v6692_v47 = vadd.f32 %v5026_v3, %v1688_v1  ;;  %v4960_v40 = vpop.f32.mrb[60].mxu0 }
 0x204   : > { %v4961_v26 = vpop.f32.mrb[61].mxu0 }
 0x205   : > { %v6694_v5 = vadd.f32 %v5029_v61, %v1691_v38  ;;  %v6700_v46 = vadd.f32 %v4961_v26, %v4960_v40  ;;  %v4963_v43 = vpop.f32.mrb[62].mxu0  ;;  %v6706_v38 = vpop.permute.xlu1 %5395  ;;  %v1699_v61 = vadd.f32 %v6609_v41, %v6593_v6 }
 0x206   : > { %v4964_v54 = vpop.f32.mrb[63].mxu0  ;;  %v6714_v26 = vpop.permute.xlu0 %5360 }
 0x207   : > { %v5030_v44 = vpop.f32.mrb[32].mxu1  ;;  %v6704_v1 = vadd.f32 %v4964_v54, %v4963_v43 }
 0x208   : > { %v5031_v34 = vpop.f32.mrb[33].mxu1 }
 0x209   : > { %v5032_v8 = vadd.f32 %v5031_v34, %v5030_v44  ;;  %v5033_v3 = vpop.f32.mrb[34].mxu1  ;;  %v6716_v36 = vpop.permute.xlu1 %5405 }
 0x20a   : > { %v5034_v28 = vpop.f32.mrb[35].mxu1  ;;  %v6748_v17 = vpop.permute.xlu0 %5370 }
 0x20b   : > { %v5035_v59 = vadd.f32 %v5034_v28, %v5033_v3  ;;  %v6710_v32 = vadd.f32 %v5032_v8, %v1696_v30  ;;  %v5238_v27 = vpop.f32.mrb[64].mxu0  ;;  %v1704_v30 = vadd.f32 %v6617_v25, %v6593_v6 }
 0x20c   : > { %v6719_v34 = vadd.f32 %v5238_v27, %v6613_v35  ;;  %v1953_v43 = vpop.f32.mrb[65].mxu0  ;;  %v1707_v27 = vadd.f32 %v6621_v45, %v6593_v6 }
 0x20d   : > { %v6712_v40 = vadd.f32 %v5035_v59, %v1699_v61  ;;  %v6722_v54 = vadd.f32 %v1953_v43, %v6601_v50  ;;  %v5239_v41 = vpop.f32.mrb[66].mxu0  ;;  %v6737_v25 = vpop.permute.xlu1 %5415 }
 0x20e   : > { %v2082_v59 = vsub.f32 0.0, %v6719_v34  ;;  %v6728_v3 = vadd.f32 %v5239_v41, %v6615_v31  ;;  %v1956_v61 = vpop.f32.mrb[67].mxu0 }
 0x20f   : > { %v5036_v44 = vpop.f32.mrb[36].mxu1  ;;  %v2080_v35 = vsub.f32 0.0, %v6722_v54  ;;  %v6734_v50 = vadd.f32 %v1956_v61, %v6603_v48 }
 0x210   : > { %v5037_v23 = vpop.f32.mrb[37].mxu1  ;;  %v2116_v21 = vmul.f32 1.442695, %v2082_v59 }
 0x211   : > { %v5038_v8 = vadd.f32 %v5037_v23, %v5036_v44  ;;  %v5039_v28 = vpop.f32.mrb[38].mxu1  ;;  %v2083_v23 = vsub.f32 0.0, %v6728_v3  ;;  %v2112_v41 = vmul.f32 1.442695, %v2080_v35  ;;  %v2081_v19 = vsub.f32 0.0, %v6734_v50  ;;  %v6752_v35 = vpop.permute.xlu1 %5425 }
 0x212   : > { %v5040_v43 = vpop.f32.mrb[39].mxu1  ;;  %5483 = vpow2.f32 %v2116_v21 }
 0x213   : > { %v5041_v31 = vadd.f32 %v5040_v43, %v5039_v28  ;;  %v6740_v44 = vadd.f32 %v5038_v8, %v1704_v30  ;;  %v2118_v48 = vmul.f32 1.442695, %v2083_v23  ;;  %5485 = vpow2.f32 %v2112_v41  ;;  %v5242_v28 = vpop.f32.mrb[68].mxu0 }
 0x214   : > { %v2114_v59 = vmul.f32 1.442695, %v2081_v19  ;;  %v6755_v43 = vadd.f32 %v5242_v28, %v6637_v29  ;;  %v1969_v23 = vpop.f32.mrb[69].mxu0 }
 0x215   : > { %v6746_v22 = vadd.f32 %v5041_v31, %v1707_v27  ;;  %5487 = vpow2.f32 %v2118_v48  ;;  %v6760_v19 = vadd.f32 %v1969_v23, %v6625_v42  ;;  %v5243_v30 = vpop.f32.mrb[70].mxu0  ;;  %v1712_v48 = vadd.f32 %v6629_v62, %v6593_v6  ;;  %v2722_v62 = vpop.permute.xlu1 %2721 }
 0x216   : > { %5489 = vpow2.f32 %v2114_v59  ;;  %v2086_v29 = vsub.f32 0.0, %v6755_v43  ;;  %v6767_v61 = vadd.f32 %v5243_v30, %v6639_v39  ;;  %v1972_v31 = vpop.f32.mrb[71].mxu0  ;;  %v1715_v42 = vadd.f32 %v6633_v63, %v6593_v6  ;;  %v6779_v30 = vpop.permute.xlu0 %5380  ;;  %2770 = vst.msk [vmem:[#allocation4] sm:$0xff] %vm2769_vm5, %v2722_v62 }
 0x217   : > { %v5042_v21 = vpop.f32.mrb[40].mxu1  ;;  %v2084_v59 = vsub.f32 0.0, %v6760_v19  ;;  %v6773_v23 = vadd.f32 %v1972_v31, %v6627_v24 }
 0x218   : > { %v5043_v41 = vpop.f32.mrb[41].mxu1  ;;  %v2124_v45 = vmul.f32 1.442695, %v2086_v29 }
 0x219   : > { %v5044_v28 = vadd.f32 %v5043_v41, %v5042_v21  ;;  %v5045_v27 = vpop.f32.mrb[42].mxu1  ;;  %v2087_v21 = vsub.f32 0.0, %v6767_v61  ;;  %v2120_v63 = vmul.f32 1.442695, %v2084_v59  ;;  %v2085_v16 = vsub.f32 0.0, %v6773_v23  ;;  %v2851_v62 = vpop.permute.xlu1 %2850 }
 0x21a   : > { %v5046_v8 = vpop.f32.mrb[43].mxu1  ;;  %5491 = vpow2.f32 %v2124_v45  ;;  %2899 = vst.msk [vmem:[#allocation4] sm:$0xff] %vm2898_vm6, %v2851_v62 }
 0x21b   : > { %v5047_v41 = vadd.f32 %v5046_v8, %v5045_v27  ;;  %v6777_v39 = vadd.f32 %v5044_v28, %v1712_v48  ;;  %v2126_v31 = vmul.f32 1.442695, %v2087_v21  ;;  %5493 = vpow2.f32 %v2120_v63  ;;  %v5246_v27 = vpop.f32.mrb[72].mxu0 }
 0x21c   : > { %v2122_v8 = vmul.f32 1.442695, %v2085_v16  ;;  %v5484_v59 = vpop.eup %5483  ;;  %v6792_v45 = vadd.f32 %v5246_v27, %v6661_v60  ;;  %v1985_v21 = vpop.f32.mrb[73].mxu0  ;;  %v1723_v63 = vadd.f32 %v6645_v52, %v6593_v6 }
 0x21d   : > { %v6784_v18 = vadd.f32 %v5047_v41, %v1715_v42  ;;  %5495 = vpow2.f32 %v2126_v31  ;;  %v5486_v16 = vpop.eup %5485  ;;  %v2178_v28 = vadd.f32 1.0, %v5484_v59  ;;  %v6799_v48 = vadd.f32 %v1985_v21, %v6649_v53  ;;  %v5247_v31 = vpop.f32.mrb[74].mxu0 }
 0x21e   : > { %5497 = vpow2.f32 %v2122_v8  ;;  %v2176_v60 = vadd.f32 1.0, %v5486_v16  ;;  %v2090_v27 = vsub.f32 0.0, %v6792_v45  ;;  %v6803_v41 = vadd.f32 %v5247_v31, %v6664_v4  ;;  %v1988_v11 = vpop.f32.mrb[75].mxu0 }
 0x21f   : > { %v5048_v42 = vpop.f32.mrb[44].mxu1  ;;  %v5488_v29 = vpop.eup %5487  ;;  %5499 = vrcp.f32 %v2178_v28  ;;  %v2088_v8 = vsub.f32 0.0, %v6799_v48  ;;  %v6807_v53 = vadd.f32 %v1988_v11, %v6651_v49  ;;  %v1728_v11 = vadd.f32 %v6653_v7, %v6593_v6 }
 0x220   : > { %v5049_v37 = vpop.f32.mrb[45].mxu1  ;;  %v5490_v10 = vpop.eup %5489  ;;  %v2179_v52 = vadd.f32 1.0, %v5488_v29  ;;  %5501 = vrcp.f32 %v2176_v60  ;;  %v2132_v16 = vmul.f32 1.442695, %v2090_v27  ;;  %v2091_v9 = vsub.f32 0.0, %v6803_v41 }
 0x221   : > { %v5050_v24 = vadd.f32 %v5049_v37, %v5048_v42  ;;  %v5051_v62 = vpop.f32.mrb[46].mxu1  ;;  %v2177_v21 = vadd.f32 1.0, %v5490_v10  ;;  %v2128_v42 = vmul.f32 1.442695, %v2088_v8  ;;  %v2089_v4 = vsub.f32 0.0, %v6807_v53 }
 0x222   : > { %v5052_v59 = vpop.f32.mrb[47].mxu1  ;;  %5503 = vrcp.f32 %v2179_v52  ;;  %v2134_v31 = vmul.f32 1.442695, %v2091_v9  ;;  %v1731_v52 = vadd.f32 %v6657_v56, %v6593_v6  ;;  %v6829_v8 = vadd.f32 %v6670_v15, %v6593_v6 }
 0x223   : > { %v5053_v37 = vadd.f32 %v5052_v59, %v5051_v62  ;;  %5505 = vrcp.f32 %v2177_v21  ;;  %v6811_v28 = vadd.f32 %v5050_v24, %v1720_v12  ;;  %v2130_v49 = vmul.f32 1.442695, %v2089_v4  ;;  %v5250_v10 = vpop.f32.mrb[76].mxu0 }
 0x224   : > { %5507 = vpow2.f32 %v2132_v16  ;;  %v5492_v27 = vpop.eup %5491  ;;  %v6822_v62 = vadd.f32 %v6666_v33, %v6593_v6  ;;  %v6825_v9 = vadd.f32 %v5250_v10, %v6692_v47  ;;  %v2001_v24 = vpop.f32.mrb[77].mxu0 }
 0x225   : > { %v6816_v60 = vadd.f32 %v5053_v37, %v1723_v63  ;;  %5509 = vpow2.f32 %v2128_v42  ;;  %v5494_v7 = vpop.eup %5493  ;;  %v2182_v63 = vadd.f32 1.0, %v5492_v27  ;;  %v6832_v59 = vadd.f32 %v2001_v24, %v6676_v20  ;;  %v5251_v21 = vpop.f32.mrb[78].mxu0 }
 0x226   : > { %5511 = vpow2.f32 %v2134_v31  ;;  %v2180_v16 = vadd.f32 1.0, %v5494_v7  ;;  %v2094_v47 = vsub.f32 0.0, %v6825_v9  ;;  %v2004_v37 = vpop.f32.mrb[79].mxu0  ;;  %v6837_v31 = vadd.f32 %v5251_v21, %v6694_v5 }
 0x227   : > { %v5054_v12 = vpop.f32.mrb[48].mxu1  ;;  %v5496_v33 = vpop.eup %5495  ;;  %5513 = vpow2.f32 %v2130_v49  ;;  %v2092_v15 = vsub.f32 0.0, %v6832_v59  ;;  %v6840_v7 = vadd.f32 %v2004_v37, %v6678_v55  ;;  %v8231_v21 = vunpack.i.l.bf16 %v6672_v13 }
 0x228   : > { %v5055_v56 = vpop.f32.mrb[49].mxu1  ;;  %v5498_v10 = vpop.eup %5497  ;;  %5515 = vrcp.f32 %v2182_v63  ;;  %v2183_v29 = vadd.f32 1.0, %v5496_v33  ;;  %8228 = vst [vmem:[#allocation40_spill] sm:$0xff] %v6837_v31  ;;  %v2140_v24 = vmul.f32 1.442695, %v2094_v47 }
 0x229   : > { %v5056_v42 = vadd.f32 %v5055_v56, %v5054_v12  ;;  %v5057_v4 = vpop.f32.mrb[50].mxu1  ;;  %5517 = vrcp.f32 %v2180_v16  ;;  %v2181_v27 = vadd.f32 1.0, %v5498_v10  ;;  %v6842_v49 = vpop.eup %5499  ;;  %v2136_v12 = vmul.f32 1.442695, %v2092_v15 }
 0x22a   : > { %v5058_v20 = vpop.f32.mrb[51].mxu1  ;;  %8229 = vst [vmem:[#allocation41_spill] sm:$0xff] %v6842_v49  ;;  %5519 = vrcp.f32 %v2183_v29  ;;  %v2095_v56 = vsub.f32 0.0, %v6837_v31  ;;  %v6845_v33 = vpop.eup %5501  ;;  %v2093_v5 = vsub.f32 0.0, %v6840_v7  ;;  %v2402_v16 = vmul.f32 %v6842_v49, %v8231_v21 }
 0x22b   : > { %v5059_v63 = vadd.f32 %v5058_v20, %v5057_v4  ;;  %8230 = vst [vmem:[#allocation42_spill] sm:$0xff] %v6845_v33  ;;  %5521 = vrcp.f32 %v2181_v27  ;;  %v6851_v47 = vadd.f32 %v5056_v42, %v1728_v11  ;;  %v6857_v29 = vadd.f32 %v6682_v0, %v6593_v6  ;;  %v5254_v4 = vpop.f32.mrb[80].mxu0 }
 0x22c   : > { %v6853_v55 = vpop.eup %5503  ;;  %5523 = vpow2.f32 %v2140_v24  ;;  %v2142_v37 = vmul.f32 1.442695, %v2095_v56  ;;  %v2138_v20 = vmul.f32 1.442695, %v2093_v5  ;;  %v6864_v27 = vadd.f32 %v5254_v4, %v6740_v44  ;;  %v2017_v42 = vpop.f32.mrb[81].mxu0  ;;  %2468 = vrot.lane.b32.xlu1 %v2402_v16, %s5742_s23 }
 0x22d   : > { %8232 = vst [vmem:[#allocation43_spill] sm:$0xff] %v6853_v55  ;;  %v6859_v10 = vadd.f32 %v5059_v63, %v1731_v52  ;;  %v6861_v15 = vpop.eup %5505  ;;  %5525 = vpow2.f32 %v2136_v12  ;;  %v8234_v0 = vunpack.i.h.bf16 %v6672_v13  ;;  %v6871_v52 = vadd.f32 %v2017_v42, %v6710_v32  ;;  %v5255_v12 = vpop.f32.mrb[82].mxu0 }
 0x22e   : > { %8233 = vst [vmem:[#allocation44_spill] sm:$0xff] %v6861_v15  ;;  %v5508_v56 = vpop.eup %5507  ;;  %5527 = vpow2.f32 %v2142_v37  ;;  %v8235_v5 = vunpack.i.l.bf16 %v6696_v14  ;;  %v8236_v21 = vunpack.i.h.bf16 %v6696_v14  ;;  %v2098_v13 = vsub.f32 0.0, %v6864_v27 }
 0x22f   : > { %v5060_v11 = vpop.f32.mrb[52].mxu1  ;;  %v2403_v24 = vmul.f32 %v6853_v55, %v8234_v0  ;;  %v5510_v16 = vpop.eup %5509  ;;  %v2186_v49 = vadd.f32 1.0, %v5508_v56  ;;  %5529 = vpow2.f32 %v2138_v20  ;;  %v2096_v31 = vsub.f32 0.0, %v6871_v52 }
 0x230   : > { %v5061_v63 = vpop.f32.mrb[53].mxu1  ;;  %v2400_v44 = vmul.f32 %v6845_v33, %v8235_v5  ;;  %v2401_v4 = vmul.f32 %v6861_v15, %v8236_v21  ;;  %v2020_v55 = vpop.f32.mrb[83].mxu0  ;;  %v2184_v42 = vadd.f32 1.0, %v5510_v16  ;;  %v6883_v5 = vadd.f32 %v5255_v12, %v6746_v22 }
 0x231   : > { %v5062_v0 = vadd.f32 %v5061_v63, %v5060_v11  ;;  %v5063_v37 = vpop.f32.mrb[54].mxu1  ;;  %2470 = vrot.lane.b32.xlu0 %v2403_v24, %s5742_s23  ;;  %v5512_v32 = vpop.eup %5511  ;;  %v6886_v14 = vadd.f32 %v2020_v55, %v6712_v40  ;;  %5531 = vrcp.f32 %v2186_v49  ;;  %v2148_v15 = vmul.f32 1.442695, %v2098_v13 }
 0x232   : > { %v5064_v21 = vpop.f32.mrb[55].mxu1  ;;  %v5514_v56 = vpop.eup %5513  ;;  %v2187_v20 = vadd.f32 1.0, %v5512_v32  ;;  %2464 = vrot.lane.b32.xlu1 %v2400_v44, %s5742_s23  ;;  %5533 = vrcp.f32 %v2184_v42  ;;  %v2144_v16 = vmul.f32 1.442695, %v2096_v31  ;;  %v2099_v33 = vsub.f32 0.0, %v6883_v5 }
 0x233   : > { %v5065_v11 = vadd.f32 %v5064_v21, %v5063_v37  ;;  %v6889_v63 = vpop.eup %5515  ;;  %v2185_v24 = vadd.f32 1.0, %v5514_v56  ;;  %v2097_v40 = vsub.f32 0.0, %v6886_v14  ;;  %v8239_v49 = vunpack.i.l.bf16 %v6680_v2  ;;  %v5258_v13 = vpop.f32.mrb[84].mxu0 }
 0x234   : > { %8237 = vst [vmem:[#allocation45_spill] sm:$0xff] %v6889_v63  ;;  %v6892_v22 = vpop.eup %5517  ;;  %5535 = vrcp.f32 %v2187_v20  ;;  %v6900_v12 = vadd.f32 %v5062_v0, %v6822_v62  ;;  %v2150_v31 = vmul.f32 1.442695, %v2099_v33  ;;  %v8241_v37 = vunpack.i.l.bf16 %v6714_v26  ;;  %v2033_v56 = vpop.f32.mrb[85].mxu0 }
 0x235   : > { %8238 = vst [vmem:[#allocation46_spill] sm:$0xff] %v6892_v22  ;;  %2466 = vrot.lane.b32.xlu0 %v2401_v4, %s5742_s23  ;;  %v2406_v55 = vmul.f32 %v6889_v63, %v8239_v49  ;;  %v6902_v44 = vpop.eup %5519  ;;  %5537 = vrcp.f32 %v2185_v24  ;;  %v6908_v42 = vadd.f32 %v5065_v11, %v6829_v8  ;;  %v6914_v21 = vadd.f32 %v6686_v57, %v6593_v6  ;;  %v5259_v24 = vpop.f32.mrb[86].mxu0 }
 0x236   : > { %8240 = vst [vmem:[#allocation47_spill] sm:$0xff] %v6902_v44  ;;  %v2404_v32 = vmul.f32 %v6892_v22, %v8241_v37  ;;  %v6910_v4 = vpop.eup %5521  ;;  %5539 = vpow2.f32 %v2148_v15  ;;  %v2146_v62 = vmul.f32 1.442695, %v2097_v40  ;;  %v6917_v0 = vadd.f32 %v5258_v13, %v6811_v28  ;;  %v2036_v63 = vpop.f32.mrb[87].mxu0 }
 0x237   : > { %8242 = vst [vmem:[#allocation48_spill] sm:$0xff] %v6910_v4  ;;  %v5066_v33 = vpop.f32.mrb[56].mxu1  ;;  %2476 = vrot.lane.b32.xlu1 %v2406_v55, %s5742_s23  ;;  %v5524_v20 = vpop.eup %5523  ;;  %5541 = vpow2.f32 %v2144_v16  ;;  %v6921_v8 = vadd.f32 %v2033_v56, %v6777_v39  ;;  %v8244_v49 = vunpack.i.h.bf16 %v6714_v26  ;;  %v8245_v15 = vunpack.i.h.bf16 %v6680_v2 }
 0x238   : > { %8243 = vst [vmem:[#allocation49_spill] sm:$0xff] %v6917_v0  ;;  %v5067_v11 = vpop.f32.mrb[57].mxu1  ;;  %v5526_v40 = vpop.eup %5525  ;;  %v2190_v13 = vadd.f32 1.0, %v5524_v20  ;;  %5543 = vpow2.f32 %v2150_v31  ;;  %v2102_v55 = vsub.f32 0.0, %v6917_v0  ;;  %v5465_v31 = vld [vmem:[%s8049_s3 + $0x80] sm:$0xff]  }
 0x239   : > { %v2405_v57 = vmul.f32 %v6910_v4, %v8244_v49  ;;  %v2407_v28 = vmul.f32 %v6902_v44, %v8245_v15  ;;  %v5068_v37 = vadd.f32 %v5067_v11, %v5066_v33  ;;  %v5069_v16 = vpop.f32.mrb[58].mxu1  ;;  %2472 = vrot.lane.b32.xlu0 %v2404_v32, %s5742_s23  ;;  %v5528_v39 = vpop.eup %5527  ;;  %v2188_v56 = vadd.f32 1.0, %v5526_v40  ;;  %5268 = vmatprep.subr.bf16.mxu0 %v5465_v31 }
 0x23a   : > { %5545 = vpow2.f32 %v2146_v62  ;;  %v2100_v26 = vsub.f32 0.0, %v6921_v8  ;;  %v6933_v49 = vadd.f32 %v5259_v24, %v6816_v60  ;;  %v5070_v2 = vpop.f32.mrb[59].mxu1  ;;  %v5530_v20 = vpop.eup %5529  ;;  %v2191_v33 = vadd.f32 1.0, %v5528_v39  ;;  %5269 = vmatpush3.bf16.msra.mxu0 %v5465_v31 }
 0x23b   : > { %5547 = vrcp.f32 %v2190_v13  ;;  %v2156_v11 = vmul.f32 1.442695, %v2102_v55  ;;  %v6939_v15 = vadd.f32 %v2036_v63, %v6784_v18  ;;  %2474 = vrot.lane.b32.xlu1 %v2405_v57, %s5742_s23  ;;  %v2189_v32 = vadd.f32 1.0, %v5530_v20  ;;  %v6943_v24 = vpop.eup %5531  ;;  %v5262_v55 = vpop.f32.mrb[88].mxu0 }
 0x23c   : > { %8246 = vst [vmem:[#allocation50_spill] sm:$0xff] %v6933_v49  ;;  %5549 = vrcp.f32 %v2188_v56  ;;  %v2152_v62 = vmul.f32 1.442695, %v2100_v26  ;;  %v2103_v60 = vsub.f32 0.0, %v6933_v49  ;;  %8247 = vst [vmem:[#allocation51_spill] sm:$0xff] %v6943_v24  ;;  %v5071_v44 = vadd.f32 %v5070_v2, %v5069_v16  ;;  %v6950_v18 = vpop.eup %5533 }
 0x23d   : > { %5551 = vrcp.f32 %v2191_v33  ;;  %v2101_v40 = vsub.f32 0.0, %v6939_v15  ;;  %2478 = vrot.lane.b32.xlu0 %v2407_v28, %s5742_s23  ;;  %v6948_v13 = vadd.f32 %v5068_v37, %v6857_v29  ;;  %8248 = vst [vmem:[#allocation52_spill] sm:$0xff] %v6950_v18  ;;  %v1752_v63 = vadd.f32 %v6700_v46, %v6593_v6  ;;  %v5466_v28 = vld [vmem:[%s8049_s3 + $0x88] sm:$0xff]   ;;  %v2049_v46 = vpop.f32.mrb[89].mxu0 }
 0x23e   : > { %5553 = vrcp.f32 %v2189_v32  ;;  %v2158_v57 = vmul.f32 1.442695, %v2103_v60  ;;  %v8249_v39 = vunpack.i.l.bf16 %v6688_v51  ;;  %v6960_v16 = vpop.eup %5535  ;;  %v6963_v37 = vadd.f32 %v5262_v55, %v6900_v12  ;;  %v5263_v12 = vpop.f32.mrb[90].mxu0  ;;  %5270 = vmatprep.subr.bf16.mxu0 %v5466_v28 }
 0x23f   : > { %8250 = vst [vmem:[#allocation53_spill] sm:$0xff] %v6960_v16  ;;  %5555 = vpow2.f32 %v2156_v11  ;;  %v2154_v29 = vmul.f32 1.442695, %v2101_v40  ;;  %v5072_v26 = vpop.f32.mrb[60].mxu1  ;;  %v8252_v2 = vunpack.i.l.bf16 %v6748_v17  ;;  %v6968_v20 = vpop.eup %5537  ;;  %v1755_v33 = vadd.f32 %v6704_v1, %v6593_v6  ;;  %5271 = vmatpush3.bf16.msra.mxu0 %v5466_v28 }
 0x240   : > { %v2410_v56 = vmul.f32 %v6943_v24, %v8249_v39  ;;  %8251 = vst [vmem:[#allocation54_spill] sm:$0xff] %v6963_v37  ;;  %8253 = vst [vmem:[#allocation55_spill] sm:$0xff] %v6968_v20  ;;  %5557 = vpow2.f32 %v2152_v62  ;;  %v6973_v32 = vadd.f32 %v2049_v46, %v6851_v47  ;;  %v5073_v11 = vpop.f32.mrb[61].mxu1  ;;  %v6977_v60 = vadd.f32 %v5071_v44, %v6914_v21  ;;  %v5540_v40 = vpop.eup %5539 }
 0x241   : > { %v2408_v31 = vmul.f32 %v6950_v18, %v8252_v2  ;;  %5559 = vpow2.f32 %v2158_v57  ;;  %v2106_v55 = vsub.f32 0.0, %v6963_v37  ;;  %v5074_v39 = vadd.f32 %v5073_v11, %v5072_v26  ;;  %v5075_v6 = vpop.f32.mrb[62].mxu1  ;;  %v2052_v1 = vpop.f32.mrb[91].mxu0 }
 0x242   : > { %8254 = vst [vmem:[#allocation56_spill] sm:$0xff] %v6973_v32  ;;  %2484 = vrot.lane.b32.xlu1 %v2410_v56, %s5742_s23  ;;  %v6981_v2 = vadd.f32 %v5263_v12, %v6908_v42  ;;  %v5542_v47 = vpop.eup %5541  ;;  %v2194_v62 = vadd.f32 1.0, %v5540_v40  ;;  %5561 = vpow2.f32 %v2154_v29  ;;  %v2104_v44 = vsub.f32 0.0, %v6973_v32  ;;  %v5076_v57 = vpop.f32.mrb[63].mxu1 }
 0x243   : > { %2480 = vrot.lane.b32.xlu0 %v2408_v31, %s5742_s23  ;;  %v6986_v21 = vadd.f32 %v2052_v1, %v6859_v10  ;;  %v5544_v56 = vpop.eup %5543  ;;  %v2192_v46 = vadd.f32 1.0, %v5542_v47  ;;  %v5077_v42 = vadd.f32 %v5076_v57, %v5075_v6  ;;  %v8257_v11 = vunpack.i.h.bf16 %v6688_v51 }
 0x244   : > { %8255 = vst [vmem:[#allocation57_spill] sm:$0xff] %v6981_v2  ;;  %v2107_v26 = vsub.f32 0.0, %v6981_v2  ;;  %v5546_v31 = vpop.eup %5545  ;;  %5563 = vrcp.f32 %v2194_v62  ;;  %v2195_v28 = vadd.f32 1.0, %v5544_v56  ;;  %v2164_v40 = vmul.f32 1.442695, %v2106_v55  ;;  %v5266_v55 = vpop.f32.mrb[92].mxu0 }
 0x245   : > { %8256 = vst [vmem:[#allocation58_spill] sm:$0xff] %v6986_v21  ;;  %v2411_v12 = vmul.f32 %v6960_v16, %v8257_v11  ;;  %v2105_v29 = vsub.f32 0.0, %v6986_v21  ;;  %v6993_v24 = vpop.eup %5547  ;;  %5565 = vrcp.f32 %v2192_v46  ;;  %v2193_v10 = vadd.f32 1.0, %v5546_v31  ;;  %v2065_v46 = vpop.f32.mrb[93].mxu0 }
 0x246   : > { %8258 = vst [vmem:[#allocation59_spill] sm:$0xff] %v6993_v24  ;;  %v2160_v1 = vmul.f32 1.442695, %v2104_v44  ;;  %v8259_v47 = vunpack.i.h.bf16 %v6748_v17  ;;  %v6999_v51 = vpop.eup %5549  ;;  %5567 = vrcp.f32 %v2195_v28  ;;  %v2166_v6 = vmul.f32 1.442695, %v2107_v26  ;;  %v5267_v26 = vpop.f32.mrb[94].mxu0 }
 0x247   : > { %2486 = vrot.lane.b32.xlu0 %v2411_v12, %s5742_s23  ;;  %8260 = vst [vmem:[#allocation60_spill] sm:$0xff] %v6999_v51  ;;  %v2162_v62 = vmul.f32 1.442695, %v2105_v29  ;;  %v1913_v57 = vadd.f32 %v5074_v39, %v1752_v63  ;;  %v7001_v56 = vpop.eup %5551  ;;  %5569 = vrcp.f32 %v2193_v10  ;;  %v8262_v44 = vunpack.i.l.bf16 %v6698_v58 }
 0x248   : > { %v2409_v18 = vmul.f32 %v6968_v20, %v8259_v47  ;;  %8261 = vst [vmem:[#allocation61_spill] sm:$0xff] %v7001_v56  ;;  %v1916_v11 = vadd.f32 %v5077_v42, %v1755_v33  ;;  %v8263_v12 = vunpack.i.l.bf16 %v6779_v30  ;;  %v7010_v28 = vpop.eup %5553  ;;  %5571 = vpow2.f32 %v2164_v40  ;;  %v2068_v47 = vpop.f32.mrb[95].mxu0 }
 0x249   : > { %v2414_v17 = vmul.f32 %v6993_v24, %v8262_v44  ;;  %8264 = vst [vmem:[#allocation62_spill] sm:$0xff] %v7010_v28  ;;  %v7012_v63 = vadd.f32 %v5266_v55, %v1913_v57  ;;  %v7015_v39 = vadd.f32 %v2065_v46, %v6948_v13  ;;  %v5556_v29 = vpop.eup %5555  ;;  %5573 = vpow2.f32 %v2160_v1 }
 0x24a   : > { %2482 = vrot.lane.b32.xlu1 %v2409_v18, %s5742_s23  ;;  %v2412_v31 = vmul.f32 %v6999_v51, %v8263_v12  ;;  %v5397_v18 = vunpack.i.l.bf16 %v6706_v38  ;;  %v8267_v10 = vunpack.i.h.bf16 %v6779_v30  ;;  %v7021_v42 = vadd.f32 %v5267_v26, %v1916_v11  ;;  %v5558_v13 = vpop.eup %5557 }
 0x24b   : > { %8265 = vst [vmem:[#allocation63_spill] sm:$0xff] %v7012_v63  ;;  %8266 = vst [vmem:[#allocation64_spill] sm:$0xff] %v7015_v39  ;;  %v8269_v40 = vunpack.i.h.bf16 %v6698_v58  ;;  %v2198_v55 = vadd.f32 1.0, %v5556_v29  ;;  %5575 = vpow2.f32 %v2166_v6  ;;  %v2110_v46 = vsub.f32 0.0, %v7012_v63  ;;  %v5560_v44 = vpop.eup %5559  ;;  %v5391_v29 = vpop.permute.xlu0 %5390 }
 0x24c   : > { %v2413_v33 = vmul.f32 %v7010_v28, %v8267_v10  ;;  %8268 = vst [vmem:[#allocation65_spill] sm:$0xff] %v7021_v42  ;;  %2488 = vrot.lane.b32.xlu0 %v2412_v31, %s5742_s23  ;;  %v2108_v1 = vsub.f32 0.0, %v7015_v39  ;;  %v2196_v30 = vadd.f32 1.0, %v5558_v13  ;;  %5577 = vpow2.f32 %v2162_v62  ;;  %v5562_v58 = vpop.eup %5561 }
 0x24d   : > { %v2415_v57 = vmul.f32 %v7001_v56, %v8269_v40  ;;  %v2111_v11 = vsub.f32 0.0, %v7021_v42  ;;  %v7032_v12 = vadd.f32 %v2068_v47, %v6977_v60  ;;  %5579 = vrcp.f32 %v2198_v55 }
 0x24e   : > { %2492 = vrot.lane.b32.xlu1 %v2414_v17, %s5742_s23  ;;  %v2199_v31 = vadd.f32 1.0, %v5560_v44  ;;  %v2172_v26 = vmul.f32 1.442695, %v2110_v46  ;;  %v5398_v6 = vunpack.i.h.bf16 %v6706_v38  ;;  %5581 = vrcp.f32 %v2196_v30  ;;  %v7037_v62 = vpop.eup %5563 }
 0x24f   : > { %8270 = vst [vmem:[#allocation66_spill] sm:$0xff] %v7032_v12  ;;  %v2197_v10 = vadd.f32 1.0, %v5562_v58  ;;  %v2168_v40 = vmul.f32 1.442695, %v2108_v1  ;;  %v2109_v13 = vsub.f32 0.0, %v7032_v12  ;;  %8271 = vst [vmem:[#allocation67_spill] sm:$0xff] %v7037_v62  ;;  %v7039_v60 = vpop.eup %5565  ;;  %v5392_v55 = vunpack.i.l.bf16 %v5391_v29 }
 0x250   : > { %2494 = vrot.lane.b32.xlu0 %v2415_v57, %s5742_s23  ;;  %5583 = vrcp.f32 %v2199_v31  ;;  %v2174_v17 = vmul.f32 1.442695, %v2111_v11  ;;  %8272 = vst [vmem:[#allocation68_spill] sm:$0xff] %v7039_v60  ;;  %v2418_v38 = vmul.f32 %v7037_v62, %v5397_v18  ;;  %v7043_v46 = vpop.eup %5567  ;;  %v5393_v44 = vunpack.i.h.bf16 %v5391_v29 }
 0x251   : > { %5585 = vrcp.f32 %v2197_v10  ;;  %v2170_v47 = vmul.f32 1.442695, %v2109_v13  ;;  %8273 = vst [vmem:[#allocation69_spill] sm:$0xff] %v7043_v46  ;;  %v7045_v1 = vpop.eup %5569  ;;  %v2419_v57 = vmul.f32 %v7043_v46, %v5398_v6  ;;  %v5407_v18 = vunpack.i.l.bf16 %v6716_v36  ;;  %v5401_v10 = vpop.permute.xlu0 %5400 }
 0x252   : > { %2490 = vrot.lane.b32.xlu1 %v2413_v33, %s5742_s23  ;;  %5587 = vpow2.f32 %v2172_v26  ;;  %8274 = vst [vmem:[#allocation70_spill] sm:$0xff] %v7045_v1  ;;  %v5572_v30 = vpop.eup %5571  ;;  %v2416_v33 = vmul.f32 %v7039_v60, %v5392_v55  ;;  %v2417_v29 = vmul.f32 %v7045_v1, %v5393_v44  ;;  %v5408_v13 = vunpack.i.h.bf16 %v6716_v36 }
 0x253   : > { %5589 = vpow2.f32 %v2168_v40  ;;  %v5574_v11 = vpop.eup %5573  ;;  %v2202_v58 = vadd.f32 1.0, %v5572_v30  ;;  %v5403_v44 = vunpack.i.h.bf16 %v5401_v10 }
 0x254   : > { %2500 = vrot.lane.b32.xlu0 %v2418_v38, %s5742_s23  ;;  %5591 = vpow2.f32 %v2174_v17  ;;  %v2200_v26 = vadd.f32 1.0, %v5574_v11 }
 0x255   : > { %5593 = vpow2.f32 %v2170_v47  ;;  %v5576_v31 = vpop.eup %5575 }
 0x256   : > { %2502 = vrot.lane.b32.xlu1 %v2419_v57, %s5742_s23  ;;  %v5578_v40 = vpop.eup %5577  ;;  %5595 = vrcp.f32 %v2202_v58  ;;  %v2203_v6 = vadd.f32 1.0, %v5576_v31  ;;  %v5402_v57 = vunpack.i.l.bf16 %v5401_v10 }
 0x257   : > { %v7055_v17 = vpop.eup %5579  ;;  %5597 = vrcp.f32 %v2200_v26  ;;  %v2201_v47 = vadd.f32 1.0, %v5578_v40 }
 0x258   : > { %2496 = vrot.lane.b32.xlu0 %v2416_v33, %s5742_s23  ;;  %8275 = vst [vmem:[#allocation71_spill] sm:$0xff] %v7055_v17  ;;  %v7057_v55 = vpop.eup %5581  ;;  %5599 = vrcp.f32 %v2203_v6  ;;  %v2422_v38 = vmul.f32 %v7055_v17, %v5407_v18  ;;  %v5417_v6 = vunpack.i.l.bf16 %v6737_v25 }
 0x259   : > { %8276 = vst [vmem:[#allocation72_spill] sm:$0xff] %v7057_v55  ;;  %5601 = vrcp.f32 %v2201_v47  ;;  %v2420_v26 = vmul.f32 %v7057_v55, %v5402_v57 }
 0x25a   : > { %2498 = vrot.lane.b32.xlu1 %v2417_v29, %s5742_s23  ;;  %v7061_v30 = vpop.eup %5583 }
 0x25b   : > { %8277 = vst [vmem:[#allocation73_spill] sm:$0xff] %v7061_v30  ;;  %v7063_v11 = vpop.eup %5585  ;;  %v2423_v36 = vmul.f32 %v7061_v30, %v5408_v13  ;;  %v5411_v13 = vpop.permute.xlu0 %5410 }
 0x25c   : > { %8278 = vst [vmem:[#allocation74_spill] sm:$0xff] %v7063_v11  ;;  %2508 = vrot.lane.b32.xlu0 %v2422_v38, %s5742_s23  ;;  %v5588_v58 = vpop.eup %5587  ;;  %v2421_v47 = vmul.f32 %v7063_v11, %v5403_v44  ;;  %v5418_v38 = vunpack.i.h.bf16 %v6737_v25 }
 0x25d   : > { %v5590_v33 = vpop.eup %5589  ;;  %v2206_v31 = vadd.f32 1.0, %v5588_v58 }
 0x25e   : > { %2510 = vrot.lane.b32.xlu1 %v2423_v36, %s5742_s23  ;;  %v5592_v18 = vpop.eup %5591  ;;  %v2204_v40 = vadd.f32 1.0, %v5590_v33  ;;  %v5412_v33 = vunpack.i.l.bf16 %v5411_v13 }
 0x25f   : > { %v5594_v29 = vpop.eup %5593  ;;  %5603 = vrcp.f32 %v2206_v31  ;;  %v2207_v17 = vadd.f32 1.0, %v5592_v18 }
 0x260   : > { %2504 = vrot.lane.b32.xlu0 %v2420_v26, %s5742_s23  ;;  %5605 = vrcp.f32 %v2204_v40  ;;  %v2205_v10 = vadd.f32 1.0, %v5594_v29  ;;  %v7073_v58 = vpop.eup %5595  ;;  %v5413_v26 = vunpack.i.h.bf16 %v5411_v13  ;;  %v5421_v40 = vpop.permute.xlu0 %5420  ;;  %v5428_v29 = vunpack.i.h.bf16 %v6752_v35 }
 0x261   : > { %8279 = vst [vmem:[#allocation75_spill] sm:$0xff] %v7073_v58  ;;  %5607 = vrcp.f32 %v2207_v17  ;;  %v7076_v57 = vpop.eup %5597  ;;  %v2426_v36 = vmul.f32 %v7073_v58, %v5417_v6  ;;  %v5427_v17 = vunpack.i.l.bf16 %v6752_v35 }
 0x262   : > { %2506 = vrot.lane.b32.xlu1 %v2421_v47, %s5742_s23  ;;  %8280 = vst [vmem:[#allocation76_spill] sm:$0xff] %v7076_v57  ;;  %v7079_v31 = vpop.eup %5599  ;;  %5609 = vrcp.f32 %v2205_v10  ;;  %v2424_v25 = vmul.f32 %v7076_v57, %v5412_v33 }
 0x263   : > { %8281 = vst [vmem:[#allocation77_spill] sm:$0xff] %v7079_v31  ;;  %v2427_v44 = vmul.f32 %v7079_v31, %v5418_v38  ;;  %v7083_v18 = vpop.eup %5601  ;;  %v5422_v38 = vunpack.i.l.bf16 %v5421_v40 }
 0x264   : > { %2516 = vrot.lane.b32.xlu0 %v2426_v36, %s5742_s23  ;;  %8282 = vst [vmem:[#allocation78_spill] sm:$0xff] %v7083_v18  ;;  %v2425_v6 = vmul.f32 %v7083_v18, %v5413_v26 }
 0x266   : > { %2518 = vrot.lane.b32.xlu1 %v2427_v44, %s5742_s23  ;;  %v5423_v44 = vunpack.i.h.bf16 %v5421_v40  ;;  %v5468_v40 = vld [vmem:[%s8049_s3] sm:$0xff]  }
 0x268   : > { %2512 = vrot.lane.b32.xlu0 %v2424_v25, %s5742_s23 }
 0x269   : > { %v7091_v47 = vpop.eup %5603 }
 0x26a   : > { %8283 = vst [vmem:[#allocation79_spill] sm:$0xff] %v7091_v47  ;;  %v7093_v13 = vpop.eup %5605  ;;  %v2430_v10 = vmul.f32 %v7091_v47, %v5427_v17  ;;  %2514 = vrot.lane.b32.xlu1 %v2425_v6, %s5742_s23  ;;  %v5467_v17 = vld [vmem:[%s8049_s3 + $0x40] sm:$0xff]   ;;  %v5469_v6 = vld [vmem:[%s8049_s3 + $0x48] sm:$0xff]  }
 0x26b   : > { %8284 = vst [vmem:[#allocation80_spill] sm:$0xff] %v7093_v13  ;;  %v7097_v36 = vpop.eup %5607  ;;  %v2428_v35 = vmul.f32 %v7093_v13, %v5422_v38  ;;  %5098 = vmatprep.subr.bf16.mxu1 %v5467_v17  ;;  %v5472_v38 = vld [vmem:[%s8049_s3 + $0x10] sm:$0xff]  }
 0x26c   : > { %8285 = vst [vmem:[#allocation81_spill] sm:$0xff] %v7097_v36  ;;  %v2431_v33 = vmul.f32 %v7097_v36, %v5428_v29  ;;  %2524 = vrot.lane.b32.xlu0 %v2430_v10, %s5742_s23  ;;  %v7101_v26 = vpop.eup %5609  ;;  %5099 = vmatpush3.bf16.msra.mxu1 %v5468_v40  ;;  %v5470_v29 = vld [vmem:[%s8049_s3 + $0x8] sm:$0xff]   ;;  %v5471_v10 = vld [vmem:[%s8049_s3 + $0x50] sm:$0xff]  }
 0x26d   : > { %8286 = vst [vmem:[#allocation82_spill] sm:$0xff] %v7101_v26  ;;  %v2429_v25 = vmul.f32 %v7101_v26, %v5423_v44  ;;  %5100 = vmatprep.subr.bf16.mxu1 %v5469_v6  ;;  %v5474_v44 = vld [vmem:[%s8049_s3 + $0x18] sm:$0xff]   ;;  %v5475_v6 = vld [vmem:[%s8049_s3 + $0x60] sm:$0xff]  }
 0x26e   : > { %2526 = vrot.lane.b32.xlu1 %v2431_v33, %s5742_s23  ;;  %v5473_v33 = vld [vmem:[%s8049_s3 + $0x58] sm:$0xff]  }
 0x270   : > { %2520 = vrot.lane.b32.xlu0 %v2428_v35, %s5742_s23  ;;  %5101 = vmatpush3.bf16.msra.mxu1 %v5470_v29 }
 0x271   : > { %5102 = vmatprep.subr.bf16.mxu1 %v5471_v10  ;;  %v5476_v10 = vld [vmem:[%s8049_s3 + $0x20] sm:$0xff]  }
 0x272   : > { %2522 = vrot.lane.b32.xlu1 %v2429_v25, %s5742_s23 }
 0x274   : > { %5103 = vmatpush3.bf16.msra.mxu1 %v5472_v38 }
 0x275   : > { %5104 = vmatprep.subr.bf16.mxu1 %v5473_v33 }
 0x278   : > { %5105 = vmatpush3.bf16.msra.mxu1 %v5474_v44 }
 0x279   : > { %5106 = vmatprep.subr.bf16.mxu1 %v5475_v6  ;;  %v5477_v6 = vld [vmem:[%s8049_s3 + $0x68] sm:$0xff]  }
 0x27c   : > { %5107 = vmatpush3.bf16.msra.mxu1 %v5476_v10 }
 0x27d   : > { %5108 = vmatprep.subr.bf16.mxu1 %v5477_v6 }
 0x29e   : > { %v2469_v35 = vpop.permute.xlu1 %2468 }
 0x29f   : > { %2563 = vst.msk [vmem:[#allocation2 + $0x31] sm:$0xff] %vm2560_vm4, %v2469_v35 }
 0x2a3   : > { %v2471_v25 = vpop.permute.xlu0 %2470 }
 0x2a4   : > { %2564 = vst.msk [vmem:[#allocation2 + $0x39] sm:$0xff] %vm2560_vm4, %v2471_v25  ;;  %v2465_v17 = vpop.permute.xlu1 %2464 }
 0x2a5   : > { %2561 = vst.msk [vmem:[#allocation2 + $0x19] sm:$0xff] %vm2560_vm4, %v2465_v17 }
 0x2a6   : > { %v3236_v38 = vld [vmem:[#allocation2 + $0x30] sm:$0xff] }
 0x2a7   : > { %v2467_v40 = vpop.permute.xlu0 %2466  ;;  %v3364_v33 = vld [vmem:[#allocation2 + $0x31] sm:$0xff] }
 0x2a8   : > { %2562 = vst.msk [vmem:[#allocation2 + $0x21] sm:$0xff] %vm2560_vm4, %v2467_v40 }
 0x2a9   : > { %v2477_v29 = vpop.permute.xlu1 %2476 }
 0x2aa   : > { %2567 = vst.msk [vmem:[#allocation2 + $0x61] sm:$0xff] %vm2560_vm4, %v2477_v29 }
 0x2ab   : > { %v2473_v44 = vpop.permute.xlu0 %2472  ;;  %v3237_v35 = vld [vmem:[#allocation2 + $0x38] sm:$0xff] }
 0x2ac   : > { %v3365_v25 = vld [vmem:[#allocation2 + $0x39] sm:$0xff]  ;;  %2565 = vst.msk [vmem:[#allocation2 + $0x49] sm:$0xff] %vm2560_vm4, %v2473_v44  ;;  %v3268_v36 = vpack.c.bf16 %v3237_v35, %v3236_v38 }
 0x2ad   : > { %v3492_v17 = vld [vmem:[#allocation2 + $0x32] sm:$0xff]  ;;  %v3396_v47 = vpack.c.bf16 %v3365_v25, %v3364_v33  ;;  %v3493_v40 = vld [vmem:[#allocation2 + $0x3a] sm:$0xff]  ;;  %v2475_v26 = vpop.permute.xlu1 %2474 }
 0x2ae   : > { %v3524_v13 = vpack.c.bf16 %v3493_v40, %v3492_v17  ;;  %2566 = vst.msk [vmem:[#allocation2 + $0x51] sm:$0xff] %vm2560_vm4, %v2475_v26  ;;  %3300 = vrot.lane.b32.xlu0 %v3268_v36, %s5740_s7  ;;  %2981 = vrot.lane.b32.xlu1 %v3268_v36, %s5742_s23  ;;  %2643 = vst.msk [vmem:[#allocation4 + $0x30] sm:$0xff] %vm2560_vm4, %v3268_v36  ;;  %v2915_v10 = vld [vmem:[#allocation2 + $0x18] sm:$0xff]  ;;  %v5478_v26 = vld [vmem:[%s8049_s3 + $0x28] sm:$0xff]  }
 0x2af   : > { %3093 = vst.msk [vmem:[#allocation4 + $0x20] sm:$0xff] %vm2560_vm4, %v3396_v47  ;;  %v2479_v29 = vpop.permute.xlu0 %2478  ;;  %v2916_v38 = vld [vmem:[#allocation2 + $0x20] sm:$0xff]  ;;  %v5479_v36 = vld [vmem:[%s8049_s3 + $0x70] sm:$0xff]   ;;  %5109 = vmatpush3.bf16.msra.mxu1 %v5478_v26 }
 0x2b0   : > { %3540 = vst.msk [vmem:[#allocation4 + $0x10] sm:$0xff] %vm2560_vm4, %v3524_v13  ;;  %v2659_v33 = vld [vmem:[#allocation2 + $0x19] sm:$0xff]  ;;  %2568 = vst.msk [vmem:[#allocation2 + $0x69] sm:$0xff] %vm2560_vm4, %v2479_v29  ;;  %v2947_v44 = vpack.c.bf16 %v2916_v38, %v2915_v10  ;;  %v2660_v35 = vld [vmem:[#allocation2 + $0x21] sm:$0xff]  ;;  %5110 = vmatprep.subr.bf16.mxu1 %v5479_v36 }
 0x2b1   : > { %v2690_v25 = vpack.c.bf16 %v2660_v35, %v2659_v33  ;;  %v3108_v6 = vld [vmem:[#allocation2 + $0x1a] sm:$0xff]  ;;  %v3109_v29 = vld [vmem:[#allocation2 + $0x22] sm:$0xff]  ;;  %v5480_v10 = vld [vmem:[%s8049_s3 + $0x30] sm:$0xff]  }
 0x2b2   : > { %3428 = vrot.lane.b32.xlu0 %v3396_v47, %s5742_s23  ;;  %2725 = vrot.lane.b32.xlu1 %v3396_v47, %s5741_s14  ;;  %2642 = vst.msk [vmem:[#allocation4 + $0x18] sm:$0xff] %vm2560_vm4, %v2947_v44  ;;  %v5481_v47 = vld [vmem:[%s8049_s3 + $0x78] sm:$0xff]   ;;  %v3240_v35 = vld [vmem:[#allocation2 + $0x60] sm:$0xff] }
 0x2b3   : > { %3092 = vst.msk [vmem:[#allocation4 + $0x8] sm:$0xff] %vm2560_vm4, %v2690_v25  ;;  %v3238_v38 = vld [vmem:[#allocation2 + $0x48] sm:$0xff]  ;;  %v5482_v36 = vld [vmem:[%s8049_s3 + $0x38] sm:$0xff]   ;;  %5111 = vmatpush3.bf16.msra.mxu1 %v5480_v10 }
 0x2b4   : > { %v2485_v17 = vpop.permute.xlu1 %2484  ;;  %v3366_v33 = vld [vmem:[#allocation2 + $0x49] sm:$0xff]  ;;  %v3368_v58 = vld [vmem:[#allocation2 + $0x61] sm:$0xff]  ;;  %5112 = vmatprep.subr.bf16.mxu1 %v5481_v47 }
 0x2b5   : > { %2571 = vst.msk [vmem:[#allocation2 + $0x91] sm:$0xff] %vm2560_vm4, %v2485_v17  ;;  %v2481_v40 = vpop.permute.xlu0 %2480  ;;  %v3494_v17 = vld [vmem:[#allocation2 + $0x4a] sm:$0xff]  ;;  %v3495_v31 = vld [vmem:[#allocation2 + $0x52] sm:$0xff] }
 0x2b6   : > { %2569 = vst.msk [vmem:[#allocation2 + $0x79] sm:$0xff] %vm2560_vm4, %v2481_v40  ;;  %v3239_v18 = vld [vmem:[#allocation2 + $0x50] sm:$0xff]  ;;  %3174 = vrot.lane.b32.xlu0 %v3524_v13, %s5741_s14  ;;  %2854 = vrot.lane.b32.xlu1 %v3524_v13, %s5740_s7  ;;  %v7174_v26 = vpack.c.bf16 %v3495_v31, %v3494_v17  ;;  %v3140_v31 = vpack.c.bf16 %v3109_v29, %v3108_v6 }
 0x2b7   : > { %v3558_v57 = vld [vmem:[#allocation4 + $0x10] sm:$0xff]  ;;  %v7176_v40 = vpack.c.bf16 %v3239_v18, %v3238_v38  ;;  %v3367_v30 = vld [vmem:[#allocation2 + $0x51] sm:$0xff]  ;;  %v3241_v55 = vld [vmem:[#allocation2 + $0x68] sm:$0xff]  ;;  %5113 = vmatpush3.bf16.msra.mxu1 %v5482_v36 }
 0x2b8   : > { %5272 = vmatprep.mubr.msk.bf16.mxu0 %vm2560_vm4, %v3558_v57  ;;  %v3369_v46 = vld [vmem:[#allocation2 + $0x69] sm:$0xff]  ;;  %v7182_v1 = vpack.c.bf16 %v3367_v30, %v3366_v33  ;;  %v3270_v13 = vpack.c.bf16 %v3241_v55, %v3240_v35  ;;  %3541 = vst.msk [vmem:[#allocation4 + $0x28] sm:$0xff] %vm2560_vm4, %v7174_v26 }
 0x2b9   : > { %v2487_v11 = vpop.permute.xlu0 %2486  ;;  %v3496_v62 = vld [vmem:[#allocation2 + $0x62] sm:$0xff]  ;;  %v7187_v18 = vpack.c.bf16 %v3369_v46, %v3368_v58  ;;  %v3497_v38 = vld [vmem:[#allocation2 + $0x6a] sm:$0xff]  ;;  %2644 = vst.msk [vmem:[#allocation4 + $0x48] sm:$0xff] %vm2560_vm4, %v7176_v40 }
 0x2ba   : > { %2572 = vst.msk [vmem:[#allocation2 + $0x99] sm:$0xff] %vm2560_vm4, %v2487_v11  ;;  %v7191_v17 = vpack.c.bf16 %v3497_v38, %v3496_v62  ;;  %3094 = vst.msk [vmem:[#allocation4 + $0x38] sm:$0xff] %vm2560_vm4, %v7182_v1  ;;  %3172 = vrot.lane.b32.xlu0 %v3140_v31, %s5741_s14  ;;  %2979 = vrot.lane.b32.xlu1 %v2947_v44, %s5742_s23 }
 0x2bb   : > { %3095 = vst.msk [vmem:[#allocation4 + $0x50] sm:$0xff] %vm2560_vm4, %v7187_v18  ;;  %2645 = vst.msk [vmem:[#allocation4 + $0x60] sm:$0xff] %vm2560_vm4, %v3270_v13 }
 0x2bc   : > { %v2483_v57 = vpop.permute.xlu1 %2482  ;;  %3542 = vst.msk [vmem:[#allocation4 + $0x40] sm:$0xff] %vm2560_vm4, %v7191_v17  ;;  %v3244_v55 = vld [vmem:[#allocation2 + $0x90] sm:$0xff] }
 0x2bd   : > { %2570 = vst.msk [vmem:[#allocation2 + $0x81] sm:$0xff] %vm2560_vm4, %v2483_v57  ;;  %v3372_v30 = vld [vmem:[#allocation2 + $0x91] sm:$0xff] }
 0x2be   : > { %v2489_v46 = vpop.permute.xlu0 %2488  ;;  %2723 = vrot.lane.b32.xlu1 %v2690_v25, %s5741_s14  ;;  %3304 = vrot.lane.b32.xlu0 %v3270_v13, %s5740_s7  ;;  %v3242_v47 = vld [vmem:[#allocation2 + $0x78] sm:$0xff] }
 0x2bf   : > { %2573 = vst.msk [vmem:[#allocation2 + $0xa9] sm:$0xff] %vm2560_vm4, %v2489_v46  ;;  %v3561_v58 = vld [vmem:[#allocation4 + $0x28] sm:$0xff] }
 0x2c0   : > { %v2493_v62 = vpop.permute.xlu1 %2492  ;;  %5273 = vmatmul.mubr.msk.bf16.vlgmr.msra.gmra.mrb[96].mxu0 %vm2560_vm4, %v3561_v58 }
 0x2c1   : > { %2575 = vst.msk [vmem:[#allocation2 + $0xc1] sm:$0xff] %vm2560_vm4, %v2493_v62  ;;  %v3500_v44 = vld [vmem:[#allocation2 + $0x92] sm:$0xff]  ;;  %v3501_v6 = vld [vmem:[#allocation2 + $0x9a] sm:$0xff] }
 0x2c2   : > { %v2495_v11 = vpop.permute.xlu0 %2494  ;;  %v7209_v29 = vpack.c.bf16 %v3501_v6, %v3500_v44  ;;  %v3245_v10 = vld [vmem:[#allocation2 + $0x98] sm:$0xff]  ;;  %2852 = vrot.lane.b32.xlu1 %v3140_v31, %s5740_s7  ;;  %3432 = vrot.lane.b32.xlu0 %v7187_v18, %s5742_s23 }
 0x2c3   : > { %2576 = vst.msk [vmem:[#allocation2 + $0xc9] sm:$0xff] %vm2560_vm4, %v2495_v11  ;;  %v3373_v33 = vld [vmem:[#allocation2 + $0x99] sm:$0xff]  ;;  %v7211_v38 = vpack.c.bf16 %v3245_v10, %v3244_v55  ;;  %v3564_v62 = vld [vmem:[#allocation4 + $0x40] sm:$0xff] }
 0x2c4   : > { %v2491_v35 = vpop.permute.xlu1 %2490  ;;  %v3498_v36 = vld [vmem:[#allocation2 + $0x7a] sm:$0xff]  ;;  %v3499_v25 = vld [vmem:[#allocation2 + $0x82] sm:$0xff]  ;;  %v7213_v57 = vpack.c.bf16 %v3373_v33, %v3372_v30  ;;  %3544 = vst.msk [vmem:[#allocation4 + $0x70] sm:$0xff] %vm2560_vm4, %v7209_v29  ;;  %5276 = vmatprep.mubr.msk.bf16.mxu0 %vm2560_vm4, %v3564_v62 }
 0x2c5   : > { %v3243_v46 = vld [vmem:[#allocation2 + $0x80] sm:$0xff]  ;;  %2574 = vst.msk [vmem:[#allocation2 + $0xb1] sm:$0xff] %vm2560_vm4, %v2491_v35  ;;  %v7219_v11 = vpack.c.bf16 %v3499_v25, %v3498_v36  ;;  %2647 = vst.msk [vmem:[#allocation4 + $0x90] sm:$0xff] %vm2560_vm4, %v7211_v38 }
 0x2c6   : > { %v7223_v58 = vpack.c.bf16 %v3243_v46, %v3242_v47  ;;  %v3370_v55 = vld [vmem:[#allocation2 + $0x79] sm:$0xff]  ;;  %v3371_v44 = vld [vmem:[#allocation2 + $0x81] sm:$0xff]  ;;  %v2501_v30 = vpop.permute.xlu0 %2500  ;;  %3097 = vst.msk [vmem:[#allocation4 + $0x80] sm:$0xff] %vm2560_vm4, %v7213_v57  ;;  %3178 = vrot.lane.b32.xlu0 %v7191_v17, %s5741_s14  ;;  %2985 = vrot.lane.b32.xlu1 %v3270_v13, %s5742_s23  ;;  %v3374_v13 = vld [vmem:[#allocation2 + $0xa9] sm:$0xff] }
 0x2c7   : > { %v7226_v6 = vpack.c.bf16 %v3371_v44, %v3370_v55  ;;  %2579 = vst.msk [vmem:[#allocation2 + $0xf1] sm:$0xff] %vm2560_vm4, %v2501_v30  ;;  %3543 = vst.msk [vmem:[#allocation4 + $0x58] sm:$0xff] %vm2560_vm4, %v7219_v11  ;;  %v3246_v44 = vld [vmem:[#allocation2 + $0xa8] sm:$0xff] }
 0x2c8   : > { %2646 = vst.msk [vmem:[#allocation4 + $0x78] sm:$0xff] %vm2560_vm4, %v7223_v58  ;;  %v2503_v31 = vpop.permute.xlu1 %2502  ;;  %v3248_v10 = vld [vmem:[#allocation2 + $0xc0] sm:$0xff] }
 0x2c9   : > { %3096 = vst.msk [vmem:[#allocation4 + $0x68] sm:$0xff] %vm2560_vm4, %v7226_v6  ;;  %2580 = vst.msk [vmem:[#allocation2 + $0xf9] sm:$0xff] %vm2560_vm4, %v2503_v31  ;;  %v3376_v62 = vld [vmem:[#allocation2 + $0xc1] sm:$0xff] }
 0x2ca   : > { %v2497_v33 = vpop.permute.xlu0 %2496  ;;  %v3504_v47 = vld [vmem:[#allocation2 + $0xc2] sm:$0xff]  ;;  %v3505_v35 = vld [vmem:[#allocation2 + $0xca] sm:$0xff]  ;;  %2729 = vrot.lane.b32.xlu1 %v7187_v18, %s5741_s14  ;;  %3302 = vrot.lane.b32.xlu0 %v7176_v40, %s5740_s7 }
 0x2cb   : > { %v3249_v36 = vld [vmem:[#allocation2 + $0xc8] sm:$0xff]  ;;  %2577 = vst.msk [vmem:[#allocation2 + $0xd9] sm:$0xff] %vm2560_vm4, %v2497_v33  ;;  %v7244_v25 = vpack.c.bf16 %v3505_v35, %v3504_v47  ;;  %v3570_v33 = vld [vmem:[#allocation4 + $0x70] sm:$0xff] }
 0x2cc   : > { %v7246_v46 = vpack.c.bf16 %v3249_v36, %v3248_v10  ;;  %v3377_v55 = vld [vmem:[#allocation2 + $0xc9] sm:$0xff]  ;;  %v2499_v30 = vpop.permute.xlu1 %2498  ;;  %v3503_v60 = vld [vmem:[#allocation2 + $0xb2] sm:$0xff] }
 0x2cd   : > { %v3502_v31 = vld [vmem:[#allocation2 + $0xaa] sm:$0xff]  ;;  %v7248_v56 = vpack.c.bf16 %v3377_v55, %v3376_v62  ;;  %2578 = vst.msk [vmem:[#allocation2 + $0xe1] sm:$0xff] %vm2560_vm4, %v2499_v30  ;;  %3546 = vst.msk [vmem:[#allocation4 + $0xa0] sm:$0xff] %vm2560_vm4, %v7244_v25 }
 0x2ce   : > { %v7255_v10 = vpack.c.bf16 %v3503_v60, %v3502_v31  ;;  %v3247_v47 = vld [vmem:[#allocation2 + $0xb0] sm:$0xff]  ;;  %2649 = vst.msk [vmem:[#allocation4 + $0xc0] sm:$0xff] %vm2560_vm4, %v7246_v46  ;;  %v3567_v36 = vld [vmem:[#allocation4 + $0x58] sm:$0xff]  ;;  %v2509_v62 = vpop.permute.xlu0 %2508  ;;  %2858 = vrot.lane.b32.xlu1 %v7191_v17, %s5740_s7  ;;  %3430 = vrot.lane.b32.xlu0 %v7182_v1, %s5742_s23 }
 0x2cf   : > { %v3375_v35 = vld [vmem:[#allocation2 + $0xb1] sm:$0xff]  ;;  %v7261_v55 = vpack.c.bf16 %v3247_v47, %v3246_v44  ;;  %3099 = vst.msk [vmem:[#allocation4 + $0xb0] sm:$0xff] %vm2560_vm4, %v7248_v56  ;;  %5277 = vmatmul.mubr.msk.bf16.gmra.mrb[100].mxu0 %vm2560_vm4, %v3567_v36  ;;  %2583 = vst.msk [vmem:[#allocation2 + $0x121] sm:$0xff] %vm2560_vm4, %v2509_v62 }
 0x2d0   : > { %v7263_v30 = vpack.c.bf16 %v3375_v35, %v3374_v13  ;;  %v3252_v18 = vld [vmem:[#allocation2 + $0xf0] sm:$0xff]  ;;  %3545 = vst.msk [vmem:[#allocation4 + $0x88] sm:$0xff] %vm2560_vm4, %v7255_v10  ;;  %5280 = vmatprep.mubr.msk.bf16.mxu0 %vm2560_vm4, %v3570_v33  ;;  %v2511_v31 = vpop.permute.xlu1 %2510  ;;  %v3509_v44 = vld [vmem:[#allocation2 + $0xfa] sm:$0xff] }
 0x2d1   : > { %v3380_v60 = vld [vmem:[#allocation2 + $0xf1] sm:$0xff]  ;;  %2648 = vst.msk [vmem:[#allocation4 + $0xa8] sm:$0xff] %vm2560_vm4, %v7261_v55  ;;  %2584 = vst.msk [vmem:[#allocation2 + $0x129] sm:$0xff] %vm2560_vm4, %v2511_v31  ;;  %v3381_v35 = vld [vmem:[#allocation2 + $0xf9] sm:$0xff] }
 0x2d2   : > { %v3508_v24 = vld [vmem:[#allocation2 + $0xf2] sm:$0xff]  ;;  %3098 = vst.msk [vmem:[#allocation4 + $0x98] sm:$0xff] %vm2560_vm4, %v7263_v30  ;;  %v2505_v36 = vpop.permute.xlu0 %2504  ;;  %v7285_v62 = vpack.c.bf16 %v3381_v35, %v3380_v60  ;;  %3176 = vrot.lane.b32.xlu0 %v7174_v26, %s5741_s14  ;;  %2983 = vrot.lane.b32.xlu1 %v7176_v40, %s5742_s23 }
 0x2d3   : > { %v3253_v47 = vld [vmem:[#allocation2 + $0xf8] sm:$0xff]  ;;  %v7281_v13 = vpack.c.bf16 %v3509_v44, %v3508_v24  ;;  %2581 = vst.msk [vmem:[#allocation2 + $0x109] sm:$0xff] %vm2560_vm4, %v2505_v36 }
 0x2d4   : > { %v7283_v33 = vpack.c.bf16 %v3253_v47, %v3252_v18  ;;  %v3250_v31 = vld [vmem:[#allocation2 + $0xd8] sm:$0xff]  ;;  %v2507_v17 = vpop.permute.xlu1 %2506  ;;  %v3507_v24 = vld [vmem:[#allocation2 + $0xe2] sm:$0xff]  ;;  %3101 = vst.msk [vmem:[#allocation4 + $0xe0] sm:$0xff] %vm2560_vm4, %v7285_v62  ;;  %v3576_v18 = vld [vmem:[#allocation4 + $0xa0] sm:$0xff] }
 0x2d5   : > { %3548 = vst.msk [vmem:[#allocation4 + $0xd0] sm:$0xff] %vm2560_vm4, %v7281_v13  ;;  %v3378_v28 = vld [vmem:[#allocation2 + $0xd9] sm:$0xff]  ;;  %2582 = vst.msk [vmem:[#allocation2 + $0x111] sm:$0xff] %vm2560_vm4, %v2507_v17  ;;  %v3379_v47 = vld [vmem:[#allocation2 + $0xe1] sm:$0xff] }
 0x2d6   : > { %2651 = vst.msk [vmem:[#allocation4 + $0xf0] sm:$0xff] %vm2560_vm4, %v7283_v33  ;;  %v3506_v51 = vld [vmem:[#allocation2 + $0xda] sm:$0xff]  ;;  %v7303_v16 = vpack.c.bf16 %v3379_v47, %v3378_v28  ;;  %v2517_v17 = vpop.permute.xlu0 %2516  ;;  %2727 = vrot.lane.b32.xlu1 %v7182_v1, %s5741_s14  ;;  %3308 = vrot.lane.b32.xlu0 %v7211_v38, %s5740_s7 }
 0x2d7   : > { %v7299_v60 = vpack.c.bf16 %v3507_v24, %v3506_v51  ;;  %v3251_v44 = vld [vmem:[#allocation2 + $0xe0] sm:$0xff]  ;;  %v3573_v35 = vld [vmem:[#allocation4 + $0x88] sm:$0xff]  ;;  %2587 = vst.msk [vmem:[#allocation2 + $0x151] sm:$0xff] %vm2560_vm4, %v2517_v17 }
 0x2d8   : > { %v7301_v36 = vpack.c.bf16 %v3251_v44, %v3250_v31  ;;  %v3256_v20 = vld [vmem:[#allocation2 + $0x120] sm:$0xff]  ;;  %5281 = vmatmul.mubr.msk.bf16.gmra.mrb[104].mxu0 %vm2560_vm4, %v3573_v35  ;;  %v3513_v40 = vld [vmem:[#allocation2 + $0x12a] sm:$0xff]  ;;  %3100 = vst.msk [vmem:[#allocation4 + $0xc8] sm:$0xff] %vm2560_vm4, %v7303_v16  ;;  %v2519_v28 = vpop.permute.xlu1 %2518 }
 0x2d9   : > { %3547 = vst.msk [vmem:[#allocation4 + $0xb8] sm:$0xff] %vm2560_vm4, %v7299_v60  ;;  %v3384_v4 = vld [vmem:[#allocation2 + $0x121] sm:$0xff]  ;;  %5284 = vmatprep.mubr.msk.bf16.mxu0 %vm2560_vm4, %v3576_v18  ;;  %v3385_v44 = vld [vmem:[#allocation2 + $0x129] sm:$0xff]  ;;  %2588 = vst.msk [vmem:[#allocation2 + $0x159] sm:$0xff] %vm2560_vm4, %v2519_v28 }
 0x2da   : > { %v3512_v51 = vld [vmem:[#allocation2 + $0x122] sm:$0xff]  ;;  %2650 = vst.msk [vmem:[#allocation4 + $0xd8] sm:$0xff] %vm2560_vm4, %v7301_v36  ;;  %v7323_v47 = vpack.c.bf16 %v3385_v44, %v3384_v4  ;;  %v2513_v17 = vpop.permute.xlu0 %2512  ;;  %2856 = vrot.lane.b32.xlu1 %v7174_v26, %s5740_s7  ;;  %3436 = vrot.lane.b32.xlu0 %v7213_v57, %s5742_s23 }
 0x2db   : > { %v3257_v24 = vld [vmem:[#allocation2 + $0x128] sm:$0xff]  ;;  %v7318_v31 = vpack.c.bf16 %v3513_v40, %v3512_v51  ;;  %2585 = vst.msk [vmem:[#allocation2 + $0x139] sm:$0xff] %vm2560_vm4, %v2513_v17 }
 0x2dc   : > { %v7320_v18 = vpack.c.bf16 %v3257_v24, %v3256_v20  ;;  %v3254_v35 = vld [vmem:[#allocation2 + $0x108] sm:$0xff]  ;;  %v3511_v51 = vld [vmem:[#allocation2 + $0x112] sm:$0xff]  ;;  %3103 = vst.msk [vmem:[#allocation4 + $0x110] sm:$0xff] %vm2560_vm4, %v7323_v47  ;;  %v2515_v40 = vpop.permute.xlu1 %2514  ;;  %v3582_v63 = vld [vmem:[#allocation4 + $0xd0] sm:$0xff] }
 0x2dd   : > { %3550 = vst.msk [vmem:[#allocation4 + $0x100] sm:$0xff] %vm2560_vm4, %v7318_v31  ;;  %v3382_v22 = vld [vmem:[#allocation2 + $0x109] sm:$0xff]  ;;  %v3383_v28 = vld [vmem:[#allocation2 + $0x111] sm:$0xff]  ;;  %2586 = vst.msk [vmem:[#allocation2 + $0x141] sm:$0xff] %vm2560_vm4, %v2515_v40 }
 0x2de   : > { %2653 = vst.msk [vmem:[#allocation4 + $0x120] sm:$0xff] %vm2560_vm4, %v7320_v18  ;;  %v3510_v1 = vld [vmem:[#allocation2 + $0x10a] sm:$0xff]  ;;  %v7341_v17 = vpack.c.bf16 %v3383_v28, %v3382_v22  ;;  %v2525_v42 = vpop.permute.xlu0 %2524  ;;  %3182 = vrot.lane.b32.xlu0 %v7209_v29, %s5741_s14  ;;  %2989 = vrot.lane.b32.xlu1 %v7211_v38, %s5742_s23 }
 0x2df   : > { %v3255_v20 = vld [vmem:[#allocation2 + $0x110] sm:$0xff]  ;;  %v7336_v4 = vpack.c.bf16 %v3511_v51, %v3510_v1  ;;  %2591 = vst.msk [vmem:[#allocation2 + $0x181] sm:$0xff] %vm2560_vm4, %v2525_v42 }
 0x2e0   : > { %v7338_v24 = vpack.c.bf16 %v3255_v20, %v3254_v35  ;;  %v3579_v44 = vld [vmem:[#allocation4 + $0xb8] sm:$0xff]  ;;  %v3260_v26 = vld [vmem:[#allocation2 + $0x150] sm:$0xff]  ;;  %3102 = vst.msk [vmem:[#allocation4 + $0xf8] sm:$0xff] %vm2560_vm4, %v7341_v17  ;;  %v2527_v22 = vpop.permute.xlu1 %2526  ;;  %v3517_v51 = vld [vmem:[#allocation2 + $0x15a] sm:$0xff] }
 0x2e1   : > { %5285 = vmatmul.mubr.msk.bf16.gmra.mrb[108].mxu0 %vm2560_vm4, %v3579_v44  ;;  %3549 = vst.msk [vmem:[#allocation4 + $0xe8] sm:$0xff] %vm2560_vm4, %v7336_v4  ;;  %v3388_v35 = vld [vmem:[#allocation2 + $0x151] sm:$0xff]  ;;  %2592 = vst.msk [vmem:[#allocation2 + $0x189] sm:$0xff] %vm2560_vm4, %v2527_v22 }
 0x2e2   : > { %2652 = vst.msk [vmem:[#allocation4 + $0x108] sm:$0xff] %vm2560_vm4, %v7338_v24  ;;  %5288 = vmatprep.mubr.msk.bf16.mxu0 %vm2560_vm4, %v3582_v63  ;;  %v3516_v1 = vld [vmem:[#allocation2 + $0x152] sm:$0xff]  ;;  %v2521_v28 = vpop.permute.xlu0 %2520  ;;  %2733 = vrot.lane.b32.xlu1 %v7213_v57, %s5741_s14 }
 0x2e3   : > { %v3261_v20 = vld [vmem:[#allocation2 + $0x158] sm:$0xff]  ;;  %v7357_v40 = vpack.c.bf16 %v3517_v51, %v3516_v1  ;;  %2589 = vst.msk [vmem:[#allocation2 + $0x169] sm:$0xff] %vm2560_vm4, %v2521_v28  ;;  %3306 = vrot.lane.b32.xlu0 %v7223_v58, %s5740_s7 }
 0x2e4   : > { %v7359_v42 = vpack.c.bf16 %v3261_v20, %v3260_v26  ;;  %v3389_v63 = vld [vmem:[#allocation2 + $0x159] sm:$0xff]  ;;  %v2523_v39 = vpop.permute.xlu1 %2522  ;;  %v3588_v57 = vld [vmem:[#allocation4 + $0x100] sm:$0xff] }
 0x2e5   : > { %v7361_v44 = vpack.c.bf16 %v3389_v63, %v3388_v35  ;;  %v3258_v12 = vld [vmem:[#allocation2 + $0x138] sm:$0xff]  ;;  %3552 = vst.msk [vmem:[#allocation4 + $0x130] sm:$0xff] %vm2560_vm4, %v7357_v40  ;;  %v3515_v35 = vld [vmem:[#allocation2 + $0x142] sm:$0xff]  ;;  %2590 = vst.msk [vmem:[#allocation2 + $0x171] sm:$0xff] %vm2560_vm4, %v2523_v39 }
 0x2e6   : > { %v3386_v38 = vld [vmem:[#allocation2 + $0x139] sm:$0xff]  ;;  %2655 = vst.msk [vmem:[#allocation4 + $0x150] sm:$0xff] %vm2560_vm4, %v7359_v42  ;;  %v3387_v63 = vld [vmem:[#allocation2 + $0x141] sm:$0xff]  ;;  %2862 = vrot.lane.b32.xlu1 %v7209_v29, %s5740_s7 }
 0x2e7   : > { %v3514_v26 = vld [vmem:[#allocation2 + $0x13a] sm:$0xff]  ;;  %3105 = vst.msk [vmem:[#allocation4 + $0x140] sm:$0xff] %vm2560_vm4, %v7361_v44  ;;  %v7380_v28 = vpack.c.bf16 %v3387_v63, %v3386_v38  ;;  %3434 = vrot.lane.b32.xlu0 %v7226_v6, %s5742_s23 }
 0x2e8   : > { %v3259_v22 = vld [vmem:[#allocation2 + $0x140] sm:$0xff]  ;;  %v3585_v1 = vld [vmem:[#allocation4 + $0xe8] sm:$0xff]  ;;  %v7375_v51 = vpack.c.bf16 %v3515_v35, %v3514_v26  ;;  %v3393_v26 = vld [vmem:[#allocation2 + $0x189] sm:$0xff] }
 0x2e9   : > { %v7377_v20 = vpack.c.bf16 %v3259_v22, %v3258_v12  ;;  %5289 = vmatmul.mubr.msk.bf16.gmra.mrb[112].mxu0 %vm2560_vm4, %v3585_v1  ;;  %v3392_v2 = vld [vmem:[#allocation2 + $0x181] sm:$0xff]  ;;  %v3521_v12 = vld [vmem:[#allocation2 + $0x18a] sm:$0xff]  ;;  %3104 = vst.msk [vmem:[#allocation4 + $0x128] sm:$0xff] %vm2560_vm4, %v7380_v28 }
 0x2ea   : > { %5292 = vmatprep.mubr.msk.bf16.mxu0 %vm2560_vm4, %v3588_v57  ;;  %3551 = vst.msk [vmem:[#allocation4 + $0x118] sm:$0xff] %vm2560_vm4, %v7375_v51  ;;  %v3520_v39 = vld [vmem:[#allocation2 + $0x182] sm:$0xff]  ;;  %v7395_v35 = vpack.c.bf16 %v3393_v26, %v3392_v2  ;;  %2987 = vrot.lane.b32.xlu1 %v7223_v58, %s5742_s23 }
 0x2eb   : > { %2654 = vst.msk [vmem:[#allocation4 + $0x138] sm:$0xff] %vm2560_vm4, %v7377_v20  ;;  %v7393_v38 = vpack.c.bf16 %v3521_v12, %v3520_v39  ;;  %v3262_v22 = vld [vmem:[#allocation2 + $0x168] sm:$0xff]  ;;  %3180 = vrot.lane.b32.xlu0 %v7219_v11, %s5741_s14 }
 0x2ec   : > { %v3390_v1 = vld [vmem:[#allocation2 + $0x169] sm:$0xff]  ;;  %v3519_v63 = vld [vmem:[#allocation2 + $0x172] sm:$0xff]  ;;  %3107 = vst.msk [vmem:[#allocation4 + $0x170] sm:$0xff] %vm2560_vm4, %v7395_v35  ;;  %v3594_v21 = vld [vmem:[#allocation4 + $0x130] sm:$0xff] }
 0x2ed   : > { %3554 = vst.msk [vmem:[#allocation4 + $0x160] sm:$0xff] %vm2560_vm4, %v7393_v38  ;;  %v3518_v29 = vld [vmem:[#allocation2 + $0x16a] sm:$0xff] }
 0x2ee   : > { %v3263_v57 = vld [vmem:[#allocation2 + $0x170] sm:$0xff]  ;;  %v7405_v39 = vpack.c.bf16 %v3519_v63, %v3518_v29  ;;  %2731 = vrot.lane.b32.xlu1 %v7226_v6, %s5741_s14 }
 0x2ef   : > { %v7407_v2 = vpack.c.bf16 %v3263_v57, %v3262_v22  ;;  %v3391_v12 = vld [vmem:[#allocation2 + $0x171] sm:$0xff]  ;;  %3312 = vrot.lane.b32.xlu0 %v7246_v46, %s5740_s7  ;;  %v3264_v57 = vld [vmem:[#allocation2 + $0x180] sm:$0xff] }
 0x2f0   : > { %v7409_v37 = vpack.c.bf16 %v3391_v12, %v3390_v1  ;;  %3553 = vst.msk [vmem:[#allocation4 + $0x148] sm:$0xff] %vm2560_vm4, %v7405_v39  ;;  %v3265_v12 = vld [vmem:[#allocation2 + $0x188] sm:$0xff] }
 0x2f1   : > { %v3591_v26 = vld [vmem:[#allocation4 + $0x118] sm:$0xff]  ;;  %2656 = vst.msk [vmem:[#allocation4 + $0x168] sm:$0xff] %vm2560_vm4, %v7407_v2 }
 0x2f2   : > { %5293 = vmatmul.mubr.msk.bf16.gmra.mrb[116].mxu0 %vm2560_vm4, %v3591_v26  ;;  %3106 = vst.msk [vmem:[#allocation4 + $0x158] sm:$0xff] %vm2560_vm4, %v7409_v37  ;;  %2860 = vrot.lane.b32.xlu1 %v7219_v11, %s5740_s7 }
 0x2f3   : > { %5296 = vmatprep.mubr.msk.bf16.mxu0 %vm2560_vm4, %v3594_v21  ;;  %3440 = vrot.lane.b32.xlu0 %v7248_v56, %s5742_s23 }
 0x2f4   : > { %v3600_v22 = vld [vmem:[#allocation4 + $0x160] sm:$0xff] }
 0x2f6   : > { %2993 = vrot.lane.b32.xlu1 %v7246_v46, %s5742_s23 }
 0x2f7   : > { %v3597_v58 = vld [vmem:[#allocation4 + $0x148] sm:$0xff]  ;;  %3186 = vrot.lane.b32.xlu0 %v7244_v25, %s5741_s14 }
 0x2fa   : > { %5297 = vmatmul.mubr.msk.bf16.gmra.mrb[120].mxu0 %vm2560_vm4, %v3597_v58  ;;  %2737 = vrot.lane.b32.xlu1 %v7248_v56, %s5741_s14  ;;  %v3282_v58 = vpack.c.bf16 %v3265_v12, %v3264_v57 }
 0x2fb   : > { %5300 = vmatprep.mubr.msk.bf16.mxu0 %vm2560_vm4, %v3600_v22  ;;  %3310 = vrot.lane.b32.xlu0 %v7261_v55, %s5740_s7 }
 0x2fe   : > { %2866 = vrot.lane.b32.xlu1 %v7244_v25, %s5740_s7 }
 0x2ff   : > { %3438 = vrot.lane.b32.xlu0 %v7263_v30, %s5742_s23 }
 0x302   : > { %2991 = vrot.lane.b32.xlu1 %v7261_v55, %s5742_s23 }
 0x303   : > { %3184 = vrot.lane.b32.xlu0 %v7255_v10, %s5741_s14 }
 0x306   : > { %2735 = vrot.lane.b32.xlu1 %v7263_v30, %s5741_s14 }
 0x307   : > { %3316 = vrot.lane.b32.xlu0 %v7283_v33, %s5740_s7 }
 0x30a   : > { %2864 = vrot.lane.b32.xlu1 %v7255_v10, %s5740_s7 }
 0x30b   : > { %3444 = vrot.lane.b32.xlu0 %v7285_v62, %s5742_s23 }
 0x30e   : > { %2997 = vrot.lane.b32.xlu1 %v7283_v33, %s5742_s23 }
 0x30f   : > { %3190 = vrot.lane.b32.xlu0 %v7281_v13, %s5741_s14 }
 0x312   : > { %2741 = vrot.lane.b32.xlu1 %v7285_v62, %s5741_s14 }
 0x313   : > { %3314 = vrot.lane.b32.xlu0 %v7301_v36, %s5740_s7 }
 0x316   : > { %2870 = vrot.lane.b32.xlu1 %v7281_v13, %s5740_s7 }
 0x317   : > { %3442 = vrot.lane.b32.xlu0 %v7303_v16, %s5742_s23 }
 0x31a   : > { %2995 = vrot.lane.b32.xlu1 %v7301_v36, %s5742_s23 }
 0x31b   : > { %3188 = vrot.lane.b32.xlu0 %v7299_v60, %s5741_s14 }
 0x31e   : > { %2739 = vrot.lane.b32.xlu1 %v7303_v16, %s5741_s14 }
 0x31f   : > { %3320 = vrot.lane.b32.xlu0 %v7320_v18, %s5740_s7 }
 0x320   : > { %v3301_v21 = vpop.permute.xlu0 %3300  ;;  %v2982_v56 = vpop.permute.xlu1 %2981 }
 0x322   : > { %2868 = vrot.lane.b32.xlu1 %v7299_v60, %s5740_s7 }
 0x323   : > { %3448 = vrot.lane.b32.xlu0 %v7323_v47, %s5742_s23 }
 0x324   : > { %v3429_v11 = vpop.permute.xlu0 %3428  ;;  %v2726_v6 = vpop.permute.xlu1 %2725 }
 0x325   : > { %2772 = vst.msk [vmem:[#allocation4 + $0x30] sm:$0xff] %vm2769_vm5, %v2726_v6 }
 0x326   : > { %3001 = vrot.lane.b32.xlu1 %v7320_v18, %s5742_s23 }
 0x327   : > { %3194 = vrot.lane.b32.xlu0 %v7318_v31, %s5741_s14 }
 0x328   : > { %v3175_v16 = vpop.permute.xlu0 %3174  ;;  %v2855_v25 = vpop.permute.xlu1 %2854 }
 0x329   : > { %3221 = vst.msk [vmem:[#allocation4 + $0x20] sm:$0xff] %vm2769_vm5, %v3175_v16 }
 0x32a   : > { %2901 = vst.msk [vmem:[#allocation4 + $0x30] sm:$0xff] %vm2898_vm6, %v2855_v25  ;;  %2745 = vrot.lane.b32.xlu1 %v7323_v47, %s5741_s14 }
 0x32b   : > { %3318 = vrot.lane.b32.xlu0 %v7338_v24, %s5740_s7 }
 0x32c   : > { %v3173_v46 = vpop.permute.xlu0 %3172  ;;  %v2980_v10 = vpop.permute.xlu1 %2979 }
 0x32d   : > { %3220 = vst.msk [vmem:[#allocation4 + $0x8] sm:$0xff] %vm2769_vm5, %v3173_v46 }
 0x32e   : > { %3028 = vst.msk [vmem:[#allocation4] sm:$0xff] %vm3027_vm7, %v2980_v10  ;;  %2874 = vrot.lane.b32.xlu1 %v7318_v31, %s5740_s7 }
 0x32f   : > { %3348 = vst.msk [vmem:[#allocation4 + $0x8] sm:$0xff] %vm2898_vm6, %v3301_v21  ;;  %3446 = vrot.lane.b32.xlu0 %v7341_v17, %s5742_s23 }
 0x330   : > { %3476 = vst.msk [vmem:[#allocation4 + $0x8] sm:$0xff] %vm3027_vm7, %v3429_v11  ;;  %v3305_v55 = vpop.permute.xlu0 %3304  ;;  %v2724_v30 = vpop.permute.xlu1 %2723 }
 0x331   : > { %2771 = vst.msk [vmem:[#allocation4 + $0x18] sm:$0xff] %vm2769_vm5, %v2724_v30  ;;  %v3267_v30 = vld [vmem:[#allocation2 + $0x1a0] sm:$0xff] }
 0x332   : > { %2999 = vrot.lane.b32.xlu1 %v7338_v24, %s5742_s23 }
 0x333   : > { %3192 = vrot.lane.b32.xlu0 %v7336_v4, %s5741_s14 }
 0x334   : > { %v3433_v13 = vpop.permute.xlu0 %3432  ;;  %v2853_v33 = vpop.permute.xlu1 %2852 }
 0x335   : > { %2900 = vst.msk [vmem:[#allocation4 + $0x18] sm:$0xff] %vm2898_vm6, %v2853_v33  ;;  %v3556_v60 = vld [vmem:[#allocation4] sm:$0xff] }
 0x336   : > { %3029 = vst.msk [vmem:[#allocation4 + $0x18] sm:$0xff] %vm3027_vm7, %v2982_v56  ;;  %2743 = vrot.lane.b32.xlu1 %v7341_v17, %s5741_s14 }
 0x337   : > { %v3557_v62 = vld [vmem:[#allocation4 + $0x8] sm:$0xff]  ;;  %3324 = vrot.lane.b32.xlu0 %v7359_v42, %s5740_s7 }
 0x338   : > { %3828 = vmatprep.mubr.bf16.mxu1 %v3557_v62  ;;  %v3179_v36 = vpop.permute.xlu0 %3178  ;;  %v2986_v31 = vpop.permute.xlu1 %2985 }
 0x339   : > { %3829 = vmatmul.mubr.bf16.vlgmr.msra.gmra.mrb[64].mxu1 %v3556_v60  ;;  %3223 = vst.msk [vmem:[#allocation4 + $0x50] sm:$0xff] %vm2769_vm5, %v3179_v36  ;;  %v3394_v36 = vld [vmem:[#allocation2 + $0x199] sm:$0xff] }
 0x33a   : > { %2872 = vrot.lane.b32.xlu1 %v7336_v4, %s5740_s7 }
 0x33b   : > { %3452 = vrot.lane.b32.xlu0 %v7361_v44, %s5742_s23 }
 0x33c   : > { %v3303_v18 = vpop.permute.xlu0 %3302  ;;  %v2730_v47 = vpop.permute.xlu1 %2729 }
 0x33d   : > { %3349 = vst.msk [vmem:[#allocation4 + $0x20] sm:$0xff] %vm2898_vm6, %v3303_v18  ;;  %v3559_v63 = vld [vmem:[#allocation4 + $0x18] sm:$0xff] }
 0x33e   : > { %2774 = vst.msk [vmem:[#allocation4 + $0x60] sm:$0xff] %vm2769_vm5, %v2730_v47  ;;  %3005 = vrot.lane.b32.xlu1 %v7359_v42, %s5742_s23 }
 0x33f   : > { %3198 = vrot.lane.b32.xlu0 %v7357_v40, %s5741_s14 }
 0x340   : > { %v3431_v24 = vpop.permute.xlu0 %3430  ;;  %v2859_v17 = vpop.permute.xlu1 %2858 }
 0x341   : > { %3477 = vst.msk [vmem:[#allocation4 + $0x20] sm:$0xff] %vm3027_vm7, %v3431_v24 }
 0x342   : > { %2903 = vst.msk [vmem:[#allocation4 + $0x60] sm:$0xff] %vm2898_vm6, %v2859_v17  ;;  %2749 = vrot.lane.b32.xlu1 %v7361_v44, %s5741_s14 }
 0x343   : > { %3322 = vrot.lane.b32.xlu0 %v7377_v20, %s5740_s7 }
 0x344   : > { %v3177_v4 = vpop.permute.xlu0 %3176  ;;  %v2984_v1 = vpop.permute.xlu1 %2983 }
 0x345   : > { %3222 = vst.msk [vmem:[#allocation4 + $0x38] sm:$0xff] %vm2769_vm5, %v3177_v4 }
 0x346   : > { %3030 = vst.msk [vmem:[#allocation4 + $0x30] sm:$0xff] %vm3027_vm7, %v2984_v1  ;;  %3003 = vrot.lane.b32.xlu1 %v7377_v20, %s5742_s23 }
 0x347   : > { %3350 = vst.msk [vmem:[#allocation4 + $0x38] sm:$0xff] %vm2898_vm6, %v3305_v55  ;;  %3450 = vrot.lane.b32.xlu0 %v7380_v28, %s5742_s23  ;;  %v3266_v55 = vld [vmem:[#allocation2 + $0x198] sm:$0xff] }
 0x348   : > { %3478 = vst.msk [vmem:[#allocation4 + $0x38] sm:$0xff] %vm3027_vm7, %v3433_v13  ;;  %v3309_v42 = vpop.permute.xlu0 %3308  ;;  %v2728_v44 = vpop.permute.xlu1 %2727  ;;  %v3560_v29 = vld [vmem:[#allocation4 + $0x20] sm:$0xff]  ;;  %v3283_v62 = vpack.c.bf16 %v3267_v30, %v3266_v55 }
 0x349   : > { %2773 = vst.msk [vmem:[#allocation4 + $0x48] sm:$0xff] %vm2769_vm5, %v2728_v44  ;;  %3836 = vmatprep.mubr.bf16.mxu1 %v3560_v29 }
 0x34a   : > { %2747 = vrot.lane.b32.xlu1 %v7380_v28, %s5741_s14  ;;  %3837 = vmatmul.mubr.bf16.gmra.mrb[68].mxu1 %v3559_v63 }
 0x34b   : > { %3196 = vrot.lane.b32.xlu0 %v7375_v51, %s5741_s14 }
 0x34c   : > { %v3437_v20 = vpop.permute.xlu0 %3436  ;;  %v2857_v26 = vpop.permute.xlu1 %2856 }
 0x34d   : > { %2902 = vst.msk [vmem:[#allocation4 + $0x48] sm:$0xff] %vm2898_vm6, %v2857_v26  ;;  %v3562_v56 = vld [vmem:[#allocation4 + $0x30] sm:$0xff] }
 0x34e   : > { %3031 = vst.msk [vmem:[#allocation4 + $0x48] sm:$0xff] %vm3027_vm7, %v2986_v31  ;;  %2876 = vrot.lane.b32.xlu1 %v7375_v51, %s5740_s7  ;;  %v3395_v31 = vld [vmem:[#allocation2 + $0x1a1] sm:$0xff] }
 0x34f   : > { %v3563_v22 = vld [vmem:[#allocation4 + $0x38] sm:$0xff]  ;;  %3328 = vrot.lane.b32.xlu0 %v3282_v58, %s5740_s7  ;;  %v3411_v24 = vpack.c.bf16 %v3395_v31, %v3394_v36 }
 0x350   : > { %3844 = vmatprep.mubr.bf16.mxu1 %v3563_v22  ;;  %v3183_v28 = vpop.permute.xlu0 %3182  ;;  %v2990_v21 = vpop.permute.xlu1 %2989 }
 0x351   : > { %3225 = vst.msk [vmem:[#allocation4 + $0x80] sm:$0xff] %vm2769_vm5, %v3183_v28 }
 0x352   : > { %2878 = vrot.lane.b32.xlu1 %v7357_v40, %s5740_s7  ;;  %3845 = vmatmul.mubr.bf16.gmra.mrb[72].mxu1 %v3562_v56  ;;  %v3522_v40 = vld [vmem:[#allocation2 + $0x19a] sm:$0xff] }
 0x353   : > { %3456 = vrot.lane.b32.xlu0 %v7395_v35, %s5742_s23  ;;  %v3523_v35 = vld [vmem:[#allocation2 + $0x1a2] sm:$0xff] }
 0x354   : > { %v2734_v6 = vpop.permute.xlu1 %2733  ;;  %v3539_v25 = vpack.c.bf16 %v3523_v35, %v3522_v40 }
 0x355   : > { %v3307_v11 = vpop.permute.xlu0 %3306  ;;  %2776 = vst.msk [vmem:[#allocation4 + $0x90] sm:$0xff] %vm2769_vm5, %v2734_v6  ;;  %v3565_v33 = vld [vmem:[#allocation4 + $0x48] sm:$0xff] }
 0x356   : > { %3351 = vst.msk [vmem:[#allocation4 + $0x50] sm:$0xff] %vm2898_vm6, %v3307_v11  ;;  %3007 = vrot.lane.b32.xlu1 %v7407_v2, %s5742_s23 }
 0x357   : > { %3326 = vrot.lane.b32.xlu0 %v7407_v2, %s5740_s7  ;;  %3555 = vst.msk [vmem:[#allocation4 + $0x178] sm:$0xff] %vm2560_vm4, %v3539_v25 }
 0x358   : > { %v2863_v16 = vpop.permute.xlu1 %2862 }
 0x359   : > { %v3435_v51 = vpop.permute.xlu0 %3434  ;;  %2905 = vst.msk [vmem:[#allocation4 + $0x90] sm:$0xff] %vm2898_vm6, %v2863_v16 }
 0x35a   : > { %3479 = vst.msk [vmem:[#allocation4 + $0x50] sm:$0xff] %vm3027_vm7, %v3435_v51  ;;  %2751 = vrot.lane.b32.xlu1 %v7409_v37, %s5741_s14 }
 0x35b   : > { %3454 = vrot.lane.b32.xlu0 %v7409_v37, %s5742_s23 }
 0x35c   : > { %v2988_v10 = vpop.permute.xlu1 %2987 }
 0x35d   : > { %v3181_v46 = vpop.permute.xlu0 %3180  ;;  %3032 = vst.msk [vmem:[#allocation4 + $0x60] sm:$0xff] %vm3027_vm7, %v2988_v10 }
 0x35e   : > { %3224 = vst.msk [vmem:[#allocation4 + $0x68] sm:$0xff] %vm2769_vm5, %v3181_v46  ;;  %2880 = vrot.lane.b32.xlu1 %v7405_v39, %s5740_s7 }
 0x35f   : > { %3352 = vst.msk [vmem:[#allocation4 + $0x68] sm:$0xff] %vm2898_vm6, %v3309_v42  ;;  %3200 = vrot.lane.b32.xlu0 %v7405_v39, %s5741_s14  ;;  %v3603_v39 = vld [vmem:[#allocation4 + $0x178] sm:$0xff] }
 0x360   : > { %3480 = vst.msk [vmem:[#allocation4 + $0x68] sm:$0xff] %vm3027_vm7, %v3437_v20  ;;  %v2732_v37 = vpop.permute.xlu1 %2731  ;;  %5301 = vmatmul.mubr.msk.bf16.gmra.mrb[124].mxu0 %vm2560_vm4, %v3603_v39 }
 0x361   : > { %v3566_v2 = vld [vmem:[#allocation4 + $0x50] sm:$0xff]  ;;  %v3313_v13 = vpop.permute.xlu0 %3312  ;;  %2775 = vst.msk [vmem:[#allocation4 + $0x78] sm:$0xff] %vm2769_vm5, %v2732_v37 }
 0x362   : > { %3852 = vmatprep.mubr.bf16.mxu1 %v3566_v2  ;;  %3009 = vrot.lane.b32.xlu1 %v3282_v58, %s5742_s23 }
 0x363   : > { %3853 = vmatmul.mubr.bf16.gmra.mrb[76].mxu1 %v3565_v33  ;;  %3202 = vrot.lane.b32.xlu0 %v7393_v38, %s5741_s14  ;;  %s188_s14 = sand.u32 1, %s5729_s16  }
 0x364   : > { %v2861_v60 = vpop.permute.xlu1 %2860  ;;  %v3568_v38 = vld [vmem:[#allocation4 + $0x60] sm:$0xff] }
 0x365   : > { %v3441_v18 = vpop.permute.xlu0 %3440  ;;  %2904 = vst.msk [vmem:[#allocation4 + $0x78] sm:$0xff] %vm2898_vm6, %v2861_v60 }
 0x366   : > { %3033 = vst.msk [vmem:[#allocation4 + $0x78] sm:$0xff] %vm3027_vm7, %v2990_v21 }
 0x367   : > { %v3569_v47 = vld [vmem:[#allocation4 + $0x68] sm:$0xff]  ;;  %3330 = vrot.lane.b32.xlu0 %v3283_v62, %s5740_s7 }
 0x368   : > { %3860 = vmatprep.mubr.bf16.mxu1 %v3569_v47  ;;  %v2994_v17 = vpop.permute.xlu1 %2993 }
 0x369   : > { %v3187_v4 = vpop.permute.xlu0 %3186 }
 0x36a   : > { %3227 = vst.msk [vmem:[#allocation4 + $0xb0] sm:$0xff] %vm2769_vm5, %v3187_v4 }
 0x36b   : > { %3861 = vmatmul.mubr.bf16.gmra.mrb[80].mxu1 %v3568_v38  ;;  %3458 = vrot.lane.b32.xlu0 %v3411_v24, %s5742_s23  ;;  %s4678_s23 = sshll.u32 %s188_s14, 8 }
 0x36c   : > { %v2738_v1 = vpop.permute.xlu1 %2737  ;;  %s7838_s10 = scalar_lea.vmem [#allocation5], %s4678_s23 }
 0x36d   : > { %v3311_v42 = vpop.permute.xlu0 %3310  ;;  %2778 = vst.msk [vmem:[#allocation4 + $0xc0] sm:$0xff] %vm2769_vm5, %v2738_v1  ;;  %v3571_v58 = vld [vmem:[#allocation4 + $0x78] sm:$0xff]  ;;  %s4612_s11 = sshll.u32 %s7838_s10, 4  ;;  %s7997_s11 = int_to_ptr.vmem [resolvable:$true] %s4612_s11 }
 0x36e   : > { %3353 = vst.msk [vmem:[#allocation4 + $0x80] sm:$0xff] %vm2898_vm6, %v3311_v42  ;;  %s5675_s22 = scalar_lea.vmem %s7997_s11, 4096  ;;  %p5682_p0 = scmp.lt.s32.totalorder %s7997_s11, %s5680_s28 }
 0x36f   : > { %p5676_p11 = scmp.ne.s32.totalorder %s7997_s11, %s5675_s22  ;;  %p5683_p1 = scmp.lt.s32.totalorder %s5681_s29, %s5675_s22 }
 0x370   : > { %v2867_v44 = vpop.permute.xlu1 %2866 }
 0x371   : > { %v3439_v29 = vpop.permute.xlu0 %3438  ;;  %2907 = vst.msk [vmem:[#allocation4 + $0xc0] sm:$0xff] %vm2898_vm6, %v2867_v44  ;;  %p5677_p12 = pnand %p5676_p11, %p5809_p5  ;;  %p5684_p2 = por %p5683_p1, %p5682_p0 }
 0x372   : > { %3481 = vst.msk [vmem:[#allocation4 + $0x80] sm:$0xff] %vm3027_vm7, %v3439_v29 }
 0x373   : > { %p5678_p13 = pneg %p5677_p12 }
 0x374   : > { %v2992_v63 = vpop.permute.xlu1 %2991 }
 0x375   : > { %v3185_v57 = vpop.permute.xlu0 %3184  ;;  %3034 = vst.msk [vmem:[#allocation4 + $0x90] sm:$0xff] %vm3027_vm7, %v2992_v63  ;;  %p5685_p3 = pnand %p5684_p2, %p5678_p13 }
 0x376   : > { %3226 = vst.msk [vmem:[#allocation4 + $0x98] sm:$0xff] %vm2769_vm5, %v3185_v57 }
 0x377   : > { %3354 = vst.msk [vmem:[#allocation4 + $0x98] sm:$0xff] %vm2898_vm6, %v3313_v13 }
 0x378   : > { %3482 = vst.msk [vmem:[#allocation4 + $0x98] sm:$0xff] %vm3027_vm7, %v3441_v18  ;;  %v2736_v12 = vpop.permute.xlu1 %2735 }
 0x379   : > { %v3317_v20 = vpop.permute.xlu0 %3316  ;;  %2777 = vst.msk [vmem:[#allocation4 + $0xa8] sm:$0xff] %vm2769_vm5, %v2736_v12  ;;  %v3572_v26 = vld [vmem:[#allocation4 + $0x80] sm:$0xff] }
 0x37a   : > { %3868 = vmatprep.mubr.bf16.mxu1 %v3572_v26 }
 0x37b   : > { %3869 = vmatmul.mubr.bf16.gmra.mrb[84].mxu1 %v3571_v58 }
 0x37c   : > { %v2865_v22 = vpop.permute.xlu1 %2864  ;;  %v3574_v6 = vld [vmem:[#allocation4 + $0x90] sm:$0xff] }
 0x37d   : > { %v3445_v28 = vpop.permute.xlu0 %3444  ;;  %2906 = vst.msk [vmem:[#allocation4 + $0xa8] sm:$0xff] %vm2898_vm6, %v2865_v22 }
 0x37e   : > { %3035 = vst.msk [vmem:[#allocation4 + $0xa8] sm:$0xff] %vm3027_vm7, %v2994_v17 }
 0x37f   : > { %v3575_v21 = vld [vmem:[#allocation4 + $0x98] sm:$0xff] }
 0x380   : > { %3876 = vmatprep.mubr.bf16.mxu1 %v3575_v21  ;;  %v2998_v56 = vpop.permute.xlu1 %2997 }
 0x381   : > { %v3191_v11 = vpop.permute.xlu0 %3190 }
 0x382   : > { %3229 = vst.msk [vmem:[#allocation4 + $0xe0] sm:$0xff] %vm2769_vm5, %v3191_v11 }
 0x383   : > { %3877 = vmatmul.mubr.bf16.gmra.mrb[88].mxu1 %v3574_v6 }
 0x384   : > { %v2742_v51 = vpop.permute.xlu1 %2741 }
 0x385   : > { %v3315_v16 = vpop.permute.xlu0 %3314  ;;  %2780 = vst.msk [vmem:[#allocation4 + $0xf0] sm:$0xff] %vm2769_vm5, %v2742_v51  ;;  %v3577_v55 = vld [vmem:[#allocation4 + $0xa8] sm:$0xff] }
 0x386   : > { %3355 = vst.msk [vmem:[#allocation4 + $0xb0] sm:$0xff] %vm2898_vm6, %v3315_v16 }
 0x388   : > { %v2871_v40 = vpop.permute.xlu1 %2870 }
 0x389   : > { %v3443_v35 = vpop.permute.xlu0 %3442  ;;  %2909 = vst.msk [vmem:[#allocation4 + $0xf0] sm:$0xff] %vm2898_vm6, %v2871_v40 }
 0x38a   : > { %3483 = vst.msk [vmem:[#allocation4 + $0xb0] sm:$0xff] %vm3027_vm7, %v3443_v35 }
 0x38c   : > { %v2996_v25 = vpop.permute.xlu1 %2995 }
 0x38d   : > { %v3189_v46 = vpop.permute.xlu0 %3188  ;;  %3036 = vst.msk [vmem:[#allocation4 + $0xc0] sm:$0xff] %vm3027_vm7, %v2996_v25 }
 0x38e   : > { %3228 = vst.msk [vmem:[#allocation4 + $0xc8] sm:$0xff] %vm2769_vm5, %v3189_v46 }
 0x38f   : > { %3356 = vst.msk [vmem:[#allocation4 + $0xc8] sm:$0xff] %vm2898_vm6, %v3317_v20 }
 0x390   : > { %3484 = vst.msk [vmem:[#allocation4 + $0xc8] sm:$0xff] %vm3027_vm7, %v3445_v28  ;;  %v2740_v10 = vpop.permute.xlu1 %2739 }
 0x391   : > { %v3321_v37 = vpop.permute.xlu0 %3320  ;;  %2779 = vst.msk [vmem:[#allocation4 + $0xd8] sm:$0xff] %vm2769_vm5, %v2740_v10  ;;  %v3578_v2 = vld [vmem:[#allocation4 + $0xb0] sm:$0xff] }
 0x392   : > { %3884 = vmatprep.mubr.bf16.mxu1 %v3578_v2 }
 0x393   : > { %3885 = vmatmul.mubr.bf16.gmra.mrb[92].mxu1 %v3577_v55  ;;  %v7599_v30 = vpop.f32.mrb[96].mxu0 }
 0x394   : > { %v7601_v13 = vpop.f32.mrb[97].mxu0  ;;  %v2869_v33 = vpop.permute.xlu1 %2868  ;;  %v3580_v47 = vld [vmem:[#allocation4 + $0xc0] sm:$0xff] }
 0x395   : > { %v3449_v62 = vpop.permute.xlu0 %3448  ;;  %2908 = vst.msk [vmem:[#allocation4 + $0xd8] sm:$0xff] %vm2898_vm6, %v2869_v33  ;;  %v7604_v60 = vpop.f32.mrb[98].mxu0 }
 0x396   : > { %3037 = vst.msk [vmem:[#allocation4 + $0xd8] sm:$0xff] %vm3027_vm7, %v2998_v56  ;;  %v7607_v36 = vpop.f32.mrb[99].mxu0 }
 0x397   : > { %v3581_v31 = vld [vmem:[#allocation4 + $0xc8] sm:$0xff] }
 0x398   : > { %3892 = vmatprep.mubr.bf16.mxu1 %v3581_v31  ;;  %v3002_v39 = vpop.permute.xlu1 %3001 }
 0x399   : > { %v3195_v18 = vpop.permute.xlu0 %3194 }
 0x39a   : > { %3231 = vst.msk [vmem:[#allocation4 + $0x110] sm:$0xff] %vm2769_vm5, %v3195_v18 }
 0x39b   : > { %3893 = vmatmul.mubr.bf16.gmra.mrb[96].mxu1 %v3580_v47 }
 0x39c   : > { %v2746_v24 = vpop.permute.xlu1 %2745 }
 0x39d   : > { %v3319_v17 = vpop.permute.xlu0 %3318  ;;  %2782 = vst.msk [vmem:[#allocation4 + $0x120] sm:$0xff] %vm2769_vm5, %v2746_v24  ;;  %v3583_v56 = vld [vmem:[#allocation4 + $0xd8] sm:$0xff] }
 0x39e   : > { %3357 = vst.msk [vmem:[#allocation4 + $0xe0] sm:$0xff] %vm2898_vm6, %v3319_v17 }
 0x3a0   : > { %v2875_v1 = vpop.permute.xlu1 %2874 }
 0x3a1   : > { %v3447_v44 = vpop.permute.xlu0 %3446  ;;  %2911 = vst.msk [vmem:[#allocation4 + $0x120] sm:$0xff] %vm2898_vm6, %v2875_v1 }
 0x3a2   : > { %v7612_v4 = vpop.f32.mrb[100].mxu0  ;;  %3485 = vst.msk [vmem:[#allocation4 + $0xe0] sm:$0xff] %vm3027_vm7, %v3447_v44 }
 0x3a3   : > { %v7614_v38 = vpop.f32.mrb[101].mxu0 }
 0x3a4   : > { %v7616_v42 = vpop.f32.mrb[102].mxu0  ;;  %v3000_v63 = vpop.permute.xlu1 %2999 }
 0x3a5   : > { %v7619_v29 = vpop.f32.mrb[103].mxu0  ;;  %v3193_v57 = vpop.permute.xlu0 %3192  ;;  %3038 = vst.msk [vmem:[#allocation4 + $0xf0] sm:$0xff] %vm3027_vm7, %v3000_v63 }
 0x3a6   : > { %3230 = vst.msk [vmem:[#allocation4 + $0xf8] sm:$0xff] %vm2769_vm5, %v3193_v57 }
 0x3a7   : > { %3358 = vst.msk [vmem:[#allocation4 + $0xf8] sm:$0xff] %vm2898_vm6, %v3321_v37 }
 0x3a8   : > { %3486 = vst.msk [vmem:[#allocation4 + $0xf8] sm:$0xff] %vm3027_vm7, %v3449_v62  ;;  %v2744_v26 = vpop.permute.xlu1 %2743 }
 0x3a9   : > { %v3325_v22 = vpop.permute.xlu0 %3324  ;;  %2781 = vst.msk [vmem:[#allocation4 + $0x108] sm:$0xff] %vm2769_vm5, %v2744_v26  ;;  %v3584_v28 = vld [vmem:[#allocation4 + $0xe0] sm:$0xff] }
 0x3aa   : > { %3900 = vmatprep.mubr.bf16.mxu1 %v3584_v28 }
 0x3ab   : > { %v7624_v12 = vpop.f32.mrb[104].mxu0  ;;  %3901 = vmatmul.mubr.bf16.gmra.mrb[100].mxu1 %v3583_v56 }
 0x3ac   : > { %v7627_v20 = vpop.f32.mrb[105].mxu0  ;;  %v2873_v11 = vpop.permute.xlu1 %2872  ;;  %v3586_v37 = vld [vmem:[#allocation4 + $0xf0] sm:$0xff] }
 0x3ad   : > { %v7630_v58 = vpop.f32.mrb[106].mxu0  ;;  %v3453_v6 = vpop.permute.xlu0 %3452  ;;  %2910 = vst.msk [vmem:[#allocation4 + $0x108] sm:$0xff] %vm2898_vm6, %v2873_v11 }
 0x3ae   : > { %v7633_v21 = vpop.f32.mrb[107].mxu0  ;;  %3039 = vst.msk [vmem:[#allocation4 + $0x108] sm:$0xff] %vm3027_vm7, %v3002_v39 }
 0x3af   : > { %v3587_v16 = vld [vmem:[#allocation4 + $0xf8] sm:$0xff] }
 0x3b0   : > { %3908 = vmatprep.mubr.bf16.mxu1 %v3587_v16  ;;  %v3006_v35 = vpop.permute.xlu1 %3005 }
 0x3b1   : > { %v3199_v46 = vpop.permute.xlu0 %3198 }
 0x3b2   : > { %3233 = vst.msk [vmem:[#allocation4 + $0x140] sm:$0xff] %vm2769_vm5, %v3199_v46 }
 0x3b3   : > { %3909 = vmatmul.mubr.bf16.gmra.mrb[104].mxu1 %v3586_v37 }
 0x3b4   : > { %v7637_v51 = vpop.f32.mrb[108].mxu0  ;;  %v2750_v2 = vpop.permute.xlu1 %2749 }
 0x3b5   : > { %v7639_v40 = vpop.f32.mrb[109].mxu0  ;;  %v3323_v55 = vpop.permute.xlu0 %3322  ;;  %2784 = vst.msk [vmem:[#allocation4 + $0x150] sm:$0xff] %vm2769_vm5, %v2750_v2  ;;  %v3589_v56 = vld [vmem:[#allocation4 + $0x108] sm:$0xff] }
 0x3b6   : > { %v7641_v25 = vpop.f32.mrb[110].mxu0  ;;  %3359 = vst.msk [vmem:[#allocation4 + $0x110] sm:$0xff] %vm2898_vm6, %v3323_v55 }
 0x3b7   : > { %v7643_v10 = vpop.f32.mrb[111].mxu0 }
 0x3b8   : > { %v3004_v31 = vpop.permute.xlu1 %3003 }
 0x3b9   : > { %v3451_v18 = vpop.permute.xlu0 %3450  ;;  %3040 = vst.msk [vmem:[#allocation4 + $0x120] sm:$0xff] %vm3027_vm7, %v3004_v31 }
 0x3ba   : > { %3487 = vst.msk [vmem:[#allocation4 + $0x110] sm:$0xff] %vm3027_vm7, %v3451_v18 }
 0x3bc   : > { %v7648_v33 = vpop.f32.mrb[112].mxu0  ;;  %v2748_v24 = vpop.permute.xlu1 %2747 }
 0x3bd   : > { %v7650_v62 = vpop.f32.mrb[113].mxu0  ;;  %v3197_v17 = vpop.permute.xlu0 %3196  ;;  %2783 = vst.msk [vmem:[#allocation4 + $0x138] sm:$0xff] %vm2769_vm5, %v2748_v24 }
 0x3be   : > { %v7652_v39 = vpop.f32.mrb[114].mxu0  ;;  %3232 = vst.msk [vmem:[#allocation4 + $0x128] sm:$0xff] %vm2769_vm5, %v3197_v17 }
 0x3bf   : > { %v7655_v47 = vpop.f32.mrb[115].mxu0  ;;  %3360 = vst.msk [vmem:[#allocation4 + $0x128] sm:$0xff] %vm2898_vm6, %v3325_v22 }
 0x3c0   : > { %3488 = vst.msk [vmem:[#allocation4 + $0x128] sm:$0xff] %vm3027_vm7, %v3453_v6  ;;  %v2877_v44 = vpop.permute.xlu1 %2876  ;;  %v3592_v31 = vld [vmem:[#allocation4 + $0x120] sm:$0xff] }
 0x3c1   : > { %v3329_v57 = vpop.permute.xlu0 %3328  ;;  %2912 = vst.msk [vmem:[#allocation4 + $0x138] sm:$0xff] %vm2898_vm6, %v2877_v44  ;;  %v3590_v26 = vld [vmem:[#allocation4 + $0x110] sm:$0xff] }
 0x3c2   : > { %3041 = vst.msk [vmem:[#allocation4 + $0x138] sm:$0xff] %vm3027_vm7, %v3006_v35  ;;  %3916 = vmatprep.mubr.bf16.mxu1 %v3590_v26 }
 0x3c3   : > { %3917 = vmatmul.mubr.bf16.gmra.mrb[108].mxu1 %v3589_v56 }
 0x3c4   : > { %v2879_v22 = vpop.permute.xlu1 %2878 }
 0x3c5   : > { %v7662_v1 = vpop.f32.mrb[116].mxu0  ;;  %v3457_v6 = vpop.permute.xlu0 %3456  ;;  %2913 = vst.msk [vmem:[#allocation4 + $0x150] sm:$0xff] %vm2898_vm6, %v2879_v22 }
 0x3c6   : > { %v7664_v63 = vpop.f32.mrb[117].mxu0 }
 0x3c7   : > { %v7667_v28 = vpop.f32.mrb[118].mxu0  ;;  %v3593_v16 = vld [vmem:[#allocation4 + $0x128] sm:$0xff] }
 0x3c8   : > { %v7670_v11 = vpop.f32.mrb[119].mxu0  ;;  %3924 = vmatprep.mubr.bf16.mxu1 %v3593_v16  ;;  %v3008_v37 = vpop.permute.xlu1 %3007 }
 0x3c9   : > { %v3327_v55 = vpop.permute.xlu0 %3326  ;;  %3042 = vst.msk [vmem:[#allocation4 + $0x150] sm:$0xff] %vm3027_vm7, %v3008_v37  ;;  %v3595_v37 = vld [vmem:[#allocation4 + $0x138] sm:$0xff] }
 0x3ca   : > { %3361 = vst.msk [vmem:[#allocation4 + $0x140] sm:$0xff] %vm2898_vm6, %v3327_v55 }
 0x3cb   : > { %3925 = vmatmul.mubr.bf16.gmra.mrb[112].mxu1 %v3592_v31 }
 0x3cc   : > { %v2752_v24 = vpop.permute.xlu1 %2751 }
 0x3cd   : > { %v7673_v46 = vpop.f32.mrb[120].mxu0  ;;  %v3455_v17 = vpop.permute.xlu0 %3454  ;;  %2785 = vst.msk [vmem:[#allocation4 + $0x168] sm:$0xff] %vm2769_vm5, %v2752_v24 }
 0x3ce   : > { %v7675_v2 = vpop.f32.mrb[121].mxu0  ;;  %3489 = vst.msk [vmem:[#allocation4 + $0x140] sm:$0xff] %vm3027_vm7, %v3455_v17 }
 0x3cf   : > { %v7678_v35 = vpop.f32.mrb[122].mxu0 }
 0x3d0   : > { %v7681_v18 = vpop.f32.mrb[123].mxu0  ;;  %v2881_v44 = vpop.permute.xlu1 %2880 }
 0x3d1   : > { %v3201_v26 = vpop.permute.xlu0 %3200  ;;  %2914 = vst.msk [vmem:[#allocation4 + $0x168] sm:$0xff] %vm2898_vm6, %v2881_v44 }
 0x3d2   : > { %3234 = vst.msk [vmem:[#allocation4 + $0x158] sm:$0xff] %vm2769_vm5, %v3201_v26 }
 0x3d3   : > { %3362 = vst.msk [vmem:[#allocation4 + $0x158] sm:$0xff] %vm2898_vm6, %v3329_v57  ;;  %v3598_v57 = vld [vmem:[#allocation4 + $0x150] sm:$0xff] }
 0x3d4   : > { %3490 = vst.msk [vmem:[#allocation4 + $0x158] sm:$0xff] %vm3027_vm7, %v3457_v6  ;;  %v3010_v56 = vpop.permute.xlu1 %3009 }
 0x3d5   : > { %v3203_v22 = vpop.permute.xlu0 %3202  ;;  %3043 = vst.msk [vmem:[#allocation4 + $0x168] sm:$0xff] %vm3027_vm7, %v3010_v56  ;;  %v3596_v16 = vld [vmem:[#allocation4 + $0x140] sm:$0xff] }
 0x3d6   : > { %3235 = vst.msk [vmem:[#allocation4 + $0x170] sm:$0xff] %vm2769_vm5, %v3203_v22  ;;  %3932 = vmatprep.mubr.bf16.mxu1 %v3596_v16 }
 0x3d7   : > { %3933 = vmatmul.mubr.bf16.gmra.mrb[116].mxu1 %v3595_v37 }
 0x3d9   : > { %v3331_v55 = vpop.permute.xlu0 %3330 }
 0x3da   : > { %3363 = vst.msk [vmem:[#allocation4 + $0x170] sm:$0xff] %vm2898_vm6, %v3331_v55 }
 0x3db   : > { %v3599_v31 = vld [vmem:[#allocation4 + $0x158] sm:$0xff] }
 0x3dc   : > { %3940 = vmatprep.mubr.bf16.mxu1 %v3599_v31  ;;  %v3601_v17 = vld [vmem:[#allocation4 + $0x168] sm:$0xff] }
 0x3dd   : > { %v3459_v24 = vpop.permute.xlu0 %3458 }
 0x3de   : > { %3491 = vst.msk [vmem:[#allocation4 + $0x170] sm:$0xff] %vm3027_vm7, %v3459_v24 }
 0x3df   : > { %3941 = vmatmul.mubr.bf16.gmra.mrb[120].mxu1 %v3598_v57 }
 0x3e5   : > { %v3602_v6 = vld [vmem:[#allocation4 + $0x170] sm:$0xff] }
 0x3e6   : > { %3948 = vmatprep.mubr.bf16.mxu1 %v3602_v6 }
 0x3e7   : > { %3949 = vmatmul.mubr.bf16.gmra.mrb[124].mxu1 %v3601_v17 }
 0x40c   : > { %v5114_v44 = vpop.f32.mrb[64].mxu1 }
 0x40d   : > { %v5115_v26 = vpop.f32.mrb[65].mxu1 }
 0x40e   : > { %v5116_v56 = vadd.f32 %v5115_v26, %v5114_v44  ;;  %v5117_v22 = vpop.f32.mrb[66].mxu1 }
 0x40f   : > { %v5118_v16 = vpop.f32.mrb[67].mxu1 }
 0x410   : > { %v3992_v37 = vadd.f32 %v5116_v56, %v7601_v13  ;;  %v5119_v32 = vadd.f32 %v5118_v16, %v5117_v22 }
 0x412   : > { %v3995_v55 = vadd.f32 %v5119_v32, %v7607_v36  ;;  %4150 = vrot.lane.b32.xlu0 %v3992_v37, %s5740_s7 }
 0x414   : > { %4152 = vrot.lane.b32.xlu1 %v3995_v55, %s5740_s7 }
 0x41d   : > { %v5120_v31 = vpop.f32.mrb[68].mxu1 }
 0x41e   : > { %v5121_v24 = vpop.f32.mrb[69].mxu1 }
 0x41f   : > { %v5122_v57 = vadd.f32 %v5121_v24, %v5120_v31  ;;  %v5123_v6 = vpop.f32.mrb[70].mxu1 }
 0x420   : > { %v5124_v49 = vpop.f32.mrb[71].mxu1 }
 0x421   : > { %v4000_v17 = vadd.f32 %v7599_v30, %v5122_v57  ;;  %v5125_v0 = vadd.f32 %v5124_v49, %v5123_v6 }
 0x423   : > { %v4003_v44 = vadd.f32 %v7604_v60, %v5125_v0  ;;  %4154 = vrot.lane.b32.xlu0 %v4000_v17, %s5740_s7 }
 0x425   : > { %4156 = vrot.lane.b32.xlu1 %v4003_v44, %s5740_s7  ;;  %v5126_v13 = vpop.f32.mrb[72].mxu1 }
 0x426   : > { %v5127_v32 = vpop.f32.mrb[73].mxu1 }
 0x427   : > { %v5128_v36 = vadd.f32 %v5127_v32, %v5126_v13  ;;  %v5129_v26 = vpop.f32.mrb[74].mxu1 }
 0x428   : > { %v5130_v56 = vpop.f32.mrb[75].mxu1 }
 0x429   : > { %v4008_v22 = vadd.f32 %v5128_v36, %v7614_v38  ;;  %v5131_v16 = vadd.f32 %v5130_v56, %v5129_v26 }
 0x42b   : > { %v4011_v37 = vadd.f32 %v5131_v16, %v7619_v29  ;;  %4158 = vrot.lane.b32.xlu0 %v4008_v22, %s5740_s7 }
 0x42d   : > { %4160 = vrot.lane.b32.xlu1 %v4011_v37, %s5740_s7 }
 0x433   : > { %v7705_v31 = vpop.f32.mrb[124].mxu0 }
 0x434   : > { %v7708_v6 = vpop.f32.mrb[125].mxu0 }
 0x435   : > { %v7710_v38 = vpop.f32.mrb[126].mxu0 }
 0x436   : > { %v5132_v49 = vpop.f32.mrb[76].mxu1  ;;  %v7714_v17 = vpop.f32.mrb[127].mxu0 }
 0x437   : > { %v5133_v0 = vpop.f32.mrb[77].mxu1 }
 0x438   : > { %v5134_v30 = vadd.f32 %v5133_v0, %v5132_v49  ;;  %v5135_v60 = vpop.f32.mrb[78].mxu1 }
 0x439   : > { %v5136_v55 = vpop.f32.mrb[79].mxu1 }
 0x43a   : > { %v4016_v24 = vadd.f32 %v7612_v4, %v5134_v30  ;;  %v5137_v57 = vadd.f32 %v5136_v55, %v5135_v60 }
 0x43c   : > { %v4019_v29 = vadd.f32 %v7616_v42, %v5137_v57  ;;  %4162 = vrot.lane.b32.xlu0 %v4016_v24, %s5740_s7 }
 0x43e   : > { %4164 = vrot.lane.b32.xlu1 %v4019_v29, %s5740_s7  ;;  %v5138_v44 = vpop.f32.mrb[80].mxu1 }
 0x43f   : > { %v5139_v13 = vpop.f32.mrb[81].mxu1 }
 0x440   : > { %v5140_v32 = vadd.f32 %v5139_v13, %v5138_v44  ;;  %v5141_v36 = vpop.f32.mrb[82].mxu1 }
 0x441   : > { %v5142_v26 = vpop.f32.mrb[83].mxu1 }
 0x442   : > { %v4024_v4 = vadd.f32 %v5140_v32, %v7627_v20  ;;  %v5143_v56 = vadd.f32 %v5142_v26, %v5141_v36 }
 0x444   : > { %v4027_v22 = vadd.f32 %v5143_v56, %v7633_v21  ;;  %4166 = vrot.lane.b32.xlu0 %v4024_v4, %s5740_s7 }
 0x446   : > { %4168 = vrot.lane.b32.xlu1 %v4027_v22, %s5740_s7 }
 0x44e   : > { %v5144_v42 = vpop.f32.mrb[84].mxu1 }
 0x44f   : > { %v5145_v16 = vpop.f32.mrb[85].mxu1 }
 0x450   : > { %v5146_v37 = vadd.f32 %v5145_v16, %v5144_v42  ;;  %v5147_v49 = vpop.f32.mrb[86].mxu1 }
 0x451   : > { %v5148_v0 = vpop.f32.mrb[87].mxu1 }
 0x452   : > { %v4032_v30 = vadd.f32 %v7624_v12, %v5146_v37  ;;  %v5149_v60 = vadd.f32 %v5148_v0, %v5147_v49 }
 0x454   : > { %v4035_v55 = vadd.f32 %v7630_v58, %v5149_v60  ;;  %4170 = vrot.lane.b32.xlu0 %v4032_v30, %s5740_s7 }
 0x456   : > { %4172 = vrot.lane.b32.xlu1 %v4035_v55, %s5740_s7  ;;  %v5150_v20 = vpop.f32.mrb[88].mxu1 }
 0x457   : > { %v5151_v21 = vpop.f32.mrb[89].mxu1 }
 0x458   : > { %v5152_v24 = vadd.f32 %v5151_v21, %v5150_v20  ;;  %v5153_v57 = vpop.f32.mrb[90].mxu1 }
 0x459   : > { %v5154_v29 = vpop.f32.mrb[91].mxu1 }
 0x45a   : > { %v4040_v44 = vadd.f32 %v5152_v24, %v7639_v40  ;;  %v5155_v13 = vadd.f32 %v5154_v29, %v5153_v57 }
 0x45c   : > { %v4043_v32 = vadd.f32 %v5155_v13, %v7643_v10  ;;  %4174 = vrot.lane.b32.xlu0 %v4040_v44, %s5740_s7 }
 0x45e   : > { %4176 = vrot.lane.b32.xlu1 %v4043_v32, %s5740_s7 }
 0x466   : > { %v5156_v12 = vpop.f32.mrb[92].mxu1 }
 0x467   : > { %v5157_v58 = vpop.f32.mrb[93].mxu1 }
 0x468   : > { %v5158_v36 = vadd.f32 %v5157_v58, %v5156_v12  ;;  %v5159_v26 = vpop.f32.mrb[94].mxu1 }
 0x469   : > { %v5160_v4 = vpop.f32.mrb[95].mxu1 }
 0x46a   : > { %v4048_v56 = vadd.f32 %v7637_v51, %v5158_v36  ;;  %v5161_v22 = vadd.f32 %v5160_v4, %v5159_v26 }
 0x46c   : > { %v4051_v42 = vadd.f32 %v7641_v25, %v5161_v22  ;;  %4178 = vrot.lane.b32.xlu0 %v4048_v56, %s5740_s7 }
 0x46e   : > { %4180 = vrot.lane.b32.xlu1 %v4051_v42, %s5740_s7  ;;  %v5162_v40 = vpop.f32.mrb[96].mxu1 }
 0x46f   : > { %v5163_v10 = vpop.f32.mrb[97].mxu1 }
 0x470   : > { %v5164_v16 = vadd.f32 %v5163_v10, %v5162_v40  ;;  %v5165_v37 = vpop.f32.mrb[98].mxu1 }
 0x471   : > { %v5166_v49 = vpop.f32.mrb[99].mxu1 }
 0x472   : > { %v4056_v0 = vadd.f32 %v5164_v16, %v7650_v62  ;;  %v5167_v30 = vadd.f32 %v5166_v49, %v5165_v37 }
 0x474   : > { %v4059_v60 = vadd.f32 %v5167_v30, %v7655_v47  ;;  %4182 = vrot.lane.b32.xlu0 %v4056_v0, %s5740_s7 }
 0x476   : > { %4184 = vrot.lane.b32.xlu1 %v4059_v60, %s5740_s7 }
 0x47e   : > { %v5168_v51 = vpop.f32.mrb[100].mxu1 }
 0x47f   : > { %v5169_v25 = vpop.f32.mrb[101].mxu1 }
 0x480   : > { %v5170_v55 = vadd.f32 %v5169_v25, %v5168_v51  ;;  %v5171_v20 = vpop.f32.mrb[102].mxu1 }
 0x481   : > { %v5172_v21 = vpop.f32.mrb[103].mxu1 }
 0x482   : > { %v4064_v24 = vadd.f32 %v7648_v33, %v5170_v55  ;;  %v5173_v57 = vadd.f32 %v5172_v21, %v5171_v20 }
 0x484   : > { %v4067_v29 = vadd.f32 %v7652_v39, %v5173_v57  ;;  %4186 = vrot.lane.b32.xlu0 %v4064_v24, %s5740_s7 }
 0x486   : > { %4188 = vrot.lane.b32.xlu1 %v4067_v29, %s5740_s7  ;;  %v5174_v62 = vpop.f32.mrb[104].mxu1  ;;  %v4153_v57 = vpop.permute.xlu1 %4152 }
 0x487   : > { %v5175_v47 = vpop.f32.mrb[105].mxu1 }
 0x488   : > { %v5176_v44 = vadd.f32 %v5175_v47, %v5174_v62  ;;  %v5177_v13 = vpop.f32.mrb[106].mxu1 }
 0x489   : > { %v5178_v32 = vpop.f32.mrb[107].mxu1 }
 0x48a   : > { %v4072_v12 = vadd.f32 %v5176_v44, %v7664_v63  ;;  %v5179_v58 = vadd.f32 %v5178_v32, %v5177_v13 }
 0x48c   : > { %v4075_v36 = vadd.f32 %v5179_v58, %v7670_v11  ;;  %4190 = vrot.lane.b32.xlu0 %v4072_v12, %s5740_s7  ;;  %v4247_v12 = vadd.f32 %v4153_v57, %v6734_v50 }
 0x48e   : > { %4192 = vrot.lane.b32.xlu1 %v4075_v36, %s5740_s7 }
 0x496   : > { %v5180_v33 = vpop.f32.mrb[108].mxu1 }
 0x497   : > { %v5181_v39 = vpop.f32.mrb[109].mxu1 }
 0x498   : > { %v5182_v26 = vadd.f32 %v5181_v39, %v5180_v33  ;;  %v5183_v4 = vpop.f32.mrb[110].mxu1 }
 0x499   : > { %v5184_v56 = vpop.f32.mrb[111].mxu1 }
 0x49a   : > { %v4080_v22 = vadd.f32 %v7662_v1, %v5182_v26  ;;  %v5185_v42 = vadd.f32 %v5184_v56, %v5183_v4 }
 0x49c   : > { %v4083_v40 = vadd.f32 %v7667_v28, %v5185_v42  ;;  %4194 = vrot.lane.b32.xlu0 %v4080_v22, %s5740_s7 }
 0x49e   : > { %4196 = vrot.lane.b32.xlu1 %v4083_v40, %s5740_s7  ;;  %v5186_v63 = vpop.f32.mrb[112].mxu1 }
 0x49f   : > { %v5187_v11 = vpop.f32.mrb[113].mxu1 }
 0x4a0   : > { %v5188_v10 = vadd.f32 %v5187_v11, %v5186_v63  ;;  %v5189_v16 = vpop.f32.mrb[114].mxu1 }
 0x4a1   : > { %v5190_v37 = vpop.f32.mrb[115].mxu1 }
 0x4a2   : > { %v4088_v49 = vadd.f32 %v5188_v10, %v7675_v2  ;;  %v5191_v0 = vadd.f32 %v5190_v37, %v5189_v16  ;;  %v4151_v2 = vpop.permute.xlu0 %4150 }
 0x4a3   : > { %v4246_v47 = vadd.f32 %v4151_v2, %v6722_v54 }
 0x4a4   : > { %v4091_v30 = vadd.f32 %v5191_v0, %v7681_v18  ;;  %4198 = vrot.lane.b32.xlu0 %v4088_v49, %s5740_s7 }
 0x4a5   : > { %5611 = vtanh.f32 %v4246_v47 }
 0x4a6   : > { %4200 = vrot.lane.b32.xlu1 %v4091_v30, %s5740_s7  ;;  %v4155_v13 = vpop.permute.xlu0 %4154  ;;  %5613 = vtanh.f32 %v4247_v12 }
 0x4a7   : > { %v4248_v36 = vadd.f32 %v4155_v13, %v6719_v34 }
 0x4a9   : > { %5615 = vtanh.f32 %v4248_v36 }
 0x4aa   : > { %v5192_v1 = vpop.f32.mrb[116].mxu1  ;;  %v4159_v33 = vpop.permute.xlu0 %4158 }
 0x4ab   : > { %v5193_v28 = vpop.f32.mrb[117].mxu1  ;;  %v4250_v50 = vadd.f32 %v4159_v33, %v6760_v19 }
 0x4ac   : > { %v5194_v60 = vadd.f32 %v5193_v28, %v5192_v1  ;;  %v5195_v51 = vpop.f32.mrb[118].mxu1 }
 0x4ad   : > { %v5196_v25 = vpop.f32.mrb[119].mxu1 }
 0x4ae   : > { %v4096_v55 = vadd.f32 %v7673_v46, %v5194_v60  ;;  %v5197_v20 = vadd.f32 %v5196_v25, %v5195_v51  ;;  %v4163_v22 = vpop.permute.xlu0 %4162 }
 0x4af   : > { %v5612_v19 = vpop.eup %5611 }
 0x4b0   : > { %v4099_v21 = vadd.f32 %v7678_v35, %v5197_v20  ;;  %4202 = vrot.lane.b32.xlu0 %v4096_v55, %s5740_s7  ;;  %v4157_v35 = vpop.permute.xlu1 %4156  ;;  %v5614_v37 = vpop.eup %5613 }
 0x4b1   : > { %v4249_v54 = vadd.f32 %v4157_v35, %v6728_v3  ;;  %v4252_v3 = vadd.f32 %v4163_v22, %v6755_v43  ;;  %v8289_v22 = vld [vmem:[#allocation50_spill] sm:$0xff] }
 0x4b2   : > { %4204 = vrot.lane.b32.xlu1 %v4099_v21, %s5740_s7  ;;  %v5198_v18 = vpop.f32.mrb[120].mxu1 }
 0x4b3   : > { %v5199_v24 = vpop.f32.mrb[121].mxu1  ;;  %5617 = vtanh.f32 %v4249_v54  ;;  %v5616_v49 = vpop.eup %5615 }
 0x4b4   : > { %v5200_v29 = vadd.f32 %v5199_v24, %v5198_v18  ;;  %v5201_v62 = vpop.f32.mrb[122].mxu1  ;;  %v4161_v4 = vpop.permute.xlu1 %4160  ;;  %5619 = vtanh.f32 %v4250_v50  ;;  %v8288_v50 = vld [vmem:[#allocation49_spill] sm:$0xff] }
 0x4b5   : > { %v5202_v44 = vpop.f32.mrb[123].mxu1  ;;  %v4251_v34 = vadd.f32 %v4161_v4, %v6773_v23 }
 0x4b6   : > { %v5203_v32 = vadd.f32 %v5202_v44, %v5201_v62  ;;  %v4104_v46 = vadd.f32 %v5200_v29, %v7708_v6  ;;  %v4167_v10 = vpop.permute.xlu0 %4166  ;;  %v8287_v29 = vld [vmem:[#allocation40_spill] sm:$0xff] }
 0x4b7   : > { %5621 = vtanh.f32 %v4251_v34  ;;  %v4254_v23 = vadd.f32 %v4167_v10, %v6799_v48 }
 0x4b8   : > { %v4107_v58 = vadd.f32 %v5203_v32, %v7714_v17  ;;  %4206 = vrot.lane.b32.xlu0 %v4104_v46, %s5740_s7  ;;  %v4165_v63 = vpop.permute.xlu1 %4164  ;;  %5623 = vtanh.f32 %v4252_v3 }
 0x4b9   : > { %v4253_v16 = vadd.f32 %v4165_v63, %v6767_v61 }
 0x4ba   : > { %4208 = vrot.lane.b32.xlu1 %v4107_v58, %s5740_s7  ;;  %v5204_v39 = vpop.f32.mrb[124].mxu1 }
 0x4bb   : > { %v5205_v26 = vpop.f32.mrb[125].mxu1  ;;  %5625 = vtanh.f32 %v4253_v16 }
 0x4bc   : > { %v5206_v6 = vadd.f32 %v5205_v26, %v5204_v39  ;;  %v5207_v56 = vpop.f32.mrb[126].mxu1  ;;  %5627 = vtanh.f32 %v4254_v23 }
 0x4bd   : > { %v5208_v17 = vpop.f32.mrb[127].mxu1  ;;  %v5618_v30 = vpop.eup %5617 }
 0x4be   : > { %v4112_v42 = vadd.f32 %v7705_v31, %v5206_v6  ;;  %v5209_v40 = vadd.f32 %v5208_v17, %v5207_v56  ;;  %v4169_v31 = vpop.permute.xlu1 %4168  ;;  %v5620_v1 = vpop.eup %5619 }
 0x4bf   : > { %v4255_v43 = vadd.f32 %v4169_v31, %v6807_v53 }
 0x4c0   : > { %v4115_v11 = vadd.f32 %v7710_v38, %v5209_v40  ;;  %4210 = vrot.lane.b32.xlu0 %v4112_v42, %s5740_s7  ;;  %v8290_v40 = vld [vmem:[#allocation56_spill] sm:$0xff] }
 0x4c1   : > { %5629 = vtanh.f32 %v4255_v43  ;;  %v5622_v28 = vpop.eup %5621  ;;  %v8293_v43 = vld [vmem:[#allocation57_spill] sm:$0xff] }
 0x4c2   : > { %4212 = vrot.lane.b32.xlu1 %v4115_v11, %s5740_s7  ;;  %v5624_v53 = vpop.eup %5623  ;;  %v8291_v11 = vld [vmem:[#allocation58_spill] sm:$0xff] }
 0x4c4   : > { %4406 = vrot.lane.b32.xlu0 %v5612_v19, %s5740_s7 }
 0x4c5   : > { %v5626_v25 = vpop.eup %5625 }
 0x4c6   : > { %v4171_v38 = vpop.permute.xlu0 %4170  ;;  %4408 = vrot.lane.b32.xlu1 %v5614_v37, %s5740_s7  ;;  %v8292_v37 = vld [vmem:[#allocation54_spill] sm:$0xff] }
 0x4c7   : > { %v4256_v61 = vadd.f32 %v4171_v38, %v6792_v45 }
 0x4c8   : > { %4410 = vrot.lane.b32.xlu0 %v5616_v49, %s5740_s7  ;;  %v4173_v0 = vpop.permute.xlu1 %4172 }
 0x4c9   : > { %v4257_v48 = vadd.f32 %v4173_v0, %v6803_v41  ;;  %5631 = vtanh.f32 %v4256_v61  ;;  %v5628_v41 = vpop.eup %5627  ;;  %v8294_v61 = vld [vmem:[#allocation64_spill] sm:$0xff] }
 0x4ca   : > { %4412 = vrot.lane.b32.xlu1 %v5618_v30, %s5740_s7 }
 0x4cb   : > { %5633 = vtanh.f32 %v4257_v48  ;;  %v5630_v20 = vpop.eup %5629 }
 0x4cc   : > { %4414 = vrot.lane.b32.xlu0 %v5620_v1, %s5740_s7 }
 0x4ce   : > { %v4175_v60 = vpop.permute.xlu0 %4174  ;;  %4416 = vrot.lane.b32.xlu1 %v5622_v28, %s5740_s7  ;;  %v8295_v28 = vld [vmem:[#allocation66_spill] sm:$0xff] }
 0x4cf   : > { %v4258_v51 = vadd.f32 %v4175_v60, %v6832_v59 }
 0x4d0   : > { %4418 = vrot.lane.b32.xlu0 %v5624_v53, %s5740_s7  ;;  %v4177_v45 = vpop.permute.xlu1 %4176 }
 0x4d1   : > { %5635 = vtanh.f32 %v4258_v51  ;;  %v4259_v55 = vadd.f32 %v4177_v45, %v6840_v7 }
 0x4d2   : > { %4420 = vrot.lane.b32.xlu1 %v5626_v25, %s5740_s7  ;;  %v8296_v25 = vld [vmem:[#allocation63_spill] sm:$0xff] }
 0x4d3   : > { %5637 = vtanh.f32 %v4259_v55  ;;  %v5632_v21 = vpop.eup %5631 }
 0x4d4   : > { %4422 = vrot.lane.b32.xlu0 %v5628_v41, %s5740_s7  ;;  %v8297_v41 = vld [vmem:[#allocation42_spill] sm:$0xff] }
 0x4d5   : > { %v5634_v59 = vpop.eup %5633 }
 0x4d6   : > { %4424 = vrot.lane.b32.xlu1 %v5630_v20, %s5740_s7  ;;  %v4310_v20 = vsub.f32 1.0, %v8297_v41 }
 0x4d8   : > { %4426 = vrot.lane.b32.xlu0 %v5632_v21, %s5740_s7 }
 0x4da   : > { %4428 = vrot.lane.b32.xlu1 %v5634_v59, %s5740_s7  ;;  %v8298_v59 = vld [vmem:[#allocation65_spill] sm:$0xff] }
 0x4db   : > { %v5636_v2 = vpop.eup %5635 }
 0x4dc   : > { %4430 = vrot.lane.b32.xlu0 %v5636_v2, %s5740_s7 }
 0x4dd   : > { %v5638_v18 = vpop.eup %5637 }
 0x4de   : > { %v4179_v7 = vpop.permute.xlu0 %4178  ;;  %4432 = vrot.lane.b32.xlu1 %v5638_v18, %s5740_s7  ;;  %v8299_v18 = vld [vmem:[#allocation44_spill] sm:$0xff] }
 0x4df   : > { %v4260_v24 = vadd.f32 %v4179_v7, %v6825_v9  ;;  %v4311_v7 = vsub.f32 1.0, %v8299_v18 }
 0x4e0   : > { %v4181_v57 = vpop.permute.xlu1 %4180 }
 0x4e1   : > { %5639 = vtanh.f32 %v4260_v24  ;;  %v4261_v62 = vadd.f32 %v4181_v57, %v8287_v29  ;;  %v8300_v29 = vld [vmem:[#allocation8_spill] sm:$0xff] }
 0x4e3   : > { %5641 = vtanh.f32 %v4261_v62  ;;  %v4342_v62 = vmul.f32 %v8300_v29, %v4310_v20 }
 0x4e6   : > { %v4183_v47 = vpop.permute.xlu0 %4182 }
 0x4e7   : > { %v4262_v44 = vadd.f32 %v4183_v47, %v6871_v52 }
 0x4e8   : > { %v4185_v13 = vpop.permute.xlu1 %4184 }
 0x4e9   : > { %5643 = vtanh.f32 %v4262_v44  ;;  %v4263_v32 = vadd.f32 %v4185_v13, %v6886_v14  ;;  %v8301_v44 = vld [vmem:[#allocation41_spill] sm:$0xff] }
 0x4ea   : > { %v4312_v13 = vsub.f32 1.0, %v8301_v44 }
 0x4eb   : > { %v5640_v46 = vpop.eup %5639  ;;  %5645 = vtanh.f32 %v4263_v32 }
 0x4ec   : > { %4434 = vrot.lane.b32.xlu0 %v5640_v46, %s5740_s7 }
 0x4ed   : > { %v5642_v12 = vpop.eup %5641 }
 0x4ee   : > { %4436 = vrot.lane.b32.xlu1 %v5642_v12, %s5740_s7 }
 0x4f3   : > { %v5644_v9 = vpop.eup %5643 }
 0x4f4   : > { %4438 = vrot.lane.b32.xlu0 %v5644_v9, %s5740_s7  ;;  %v8302_v9 = vld [vmem:[#allocation9_spill] sm:$0xff] }
 0x4f5   : > { %v5646_v35 = vpop.eup %5645 }
 0x4f6   : > { %v4187_v58 = vpop.permute.xlu0 %4186  ;;  %4440 = vrot.lane.b32.xlu1 %v5646_v35, %s5740_s7  ;;  %v4343_v35 = vmul.f32 %v8302_v9, %v4311_v7 }
 0x4f7   : > { %v4264_v52 = vadd.f32 %v4187_v58, %v6864_v27 }
 0x4f8   : > { %v4189_v36 = vpop.permute.xlu1 %4188 }
 0x4f9   : > { %5647 = vtanh.f32 %v4264_v52  ;;  %v4265_v14 = vadd.f32 %v4189_v36, %v6883_v5  ;;  %v8303_v52 = vld [vmem:[#allocation43_spill] sm:$0xff] }
 0x4fa   : > { %v4313_v36 = vsub.f32 1.0, %v8303_v52 }
 0x4fb   : > { %5649 = vtanh.f32 %v4265_v14 }
 0x4fe   : > { %v4191_v33 = vpop.permute.xlu0 %4190 }
 0x4ff   : > { %v4266_v39 = vadd.f32 %v4191_v33, %v6921_v8 }
 0x500   : > { %v4193_v54 = vpop.permute.xlu1 %4192 }
 0x501   : > { %5651 = vtanh.f32 %v4266_v39  ;;  %v4267_v26 = vadd.f32 %v4193_v54, %v6939_v15  ;;  %v8304_v39 = vld [vmem:[#allocation10_spill] sm:$0xff] }
 0x502   : > { %v4344_v54 = vmul.f32 %v8304_v39, %v4312_v13 }
 0x503   : > { %v5648_v4 = vpop.eup %5647  ;;  %5653 = vtanh.f32 %v4267_v26 }
 0x504   : > { %4442 = vrot.lane.b32.xlu0 %v5648_v4, %s5740_s7  ;;  %v8305_v4 = vld [vmem:[#allocation46_spill] sm:$0xff] }
 0x505   : > { %v5650_v6 = vpop.eup %5649 }
 0x506   : > { %4444 = vrot.lane.b32.xlu1 %v5650_v6, %s5740_s7  ;;  %v4314_v6 = vsub.f32 1.0, %v8305_v4 }
 0x50b   : > { %v5652_v27 = vpop.eup %5651 }
 0x50c   : > { %4446 = vrot.lane.b32.xlu0 %v5652_v27, %s5740_s7 }
 0x50d   : > { %v5654_v56 = vpop.eup %5653 }
 0x50e   : > { %v4195_v5 = vpop.permute.xlu0 %4194  ;;  %4448 = vrot.lane.b32.xlu1 %v5654_v56, %s5740_s7 }
 0x50f   : > { %v4268_v8 = vadd.f32 %v4195_v5, %v8288_v50  ;;  %v8306_v5 = vld [vmem:[#allocation11_spill] sm:$0xff] }
 0x510   : > { %v4197_v17 = vpop.permute.xlu1 %4196  ;;  %v4345_v50 = vmul.f32 %v8306_v5, %v4313_v36  ;;  %v8321_v36 = vld [vmem:[#allocation60_spill] sm:$0xff] }
 0x511   : > { %5655 = vtanh.f32 %v4268_v8  ;;  %v4269_v15 = vadd.f32 %v4197_v17, %v8289_v22  ;;  %v8307_v17 = vld [vmem:[#allocation48_spill] sm:$0xff] }
 0x512   : > { %v4315_v22 = vsub.f32 1.0, %v8307_v17 }
 0x513   : > { %5657 = vtanh.f32 %v4269_v15 }
 0x516   : > { %v4199_v42 = vpop.permute.xlu0 %4198 }
 0x517   : > { %v4270_v34 = vadd.f32 %v4199_v42, %v8290_v40 }
 0x518   : > { %v4201_v63 = vpop.permute.xlu1 %4200 }
 0x519   : > { %5659 = vtanh.f32 %v4270_v34  ;;  %v4271_v3 = vadd.f32 %v4201_v63, %v8291_v11  ;;  %v8308_v34 = vld [vmem:[#allocation12_spill] sm:$0xff] }
 0x51a   : > { %v4346_v63 = vmul.f32 %v8308_v34, %v4314_v6  ;;  %v8323_v6 = vld [vmem:[#allocation62_spill] sm:$0xff] }
 0x51b   : > { %v5656_v10 = vpop.eup %5655  ;;  %5661 = vtanh.f32 %v4271_v3  ;;  %v8309_v3 = vld [vmem:[#allocation45_spill] sm:$0xff] }
 0x51c   : > { %4450 = vrot.lane.b32.xlu0 %v5656_v10, %s5740_s7  ;;  %v4316_v10 = vsub.f32 1.0, %v8309_v3 }
 0x51d   : > { %v5658_v19 = vpop.eup %5657 }
 0x51e   : > { %4452 = vrot.lane.b32.xlu1 %v5658_v19, %s5740_s7 }
 0x522   : > { %v4203_v16 = vpop.permute.xlu0 %4202 }
 0x523   : > { %v5660_v31 = vpop.eup %5659  ;;  %v4272_v23 = vadd.f32 %v4203_v16, %v8292_v37  ;;  %v8310_v37 = vld [vmem:[#allocation13_spill] sm:$0xff] }
 0x524   : > { %4454 = vrot.lane.b32.xlu0 %v5660_v31, %s5740_s7  ;;  %v4205_v38 = vpop.permute.xlu1 %4204 }
 0x525   : > { %v5662_v49 = vpop.eup %5661  ;;  %5663 = vtanh.f32 %v4272_v23  ;;  %v4273_v0 = vadd.f32 %v4205_v38, %v8293_v43  ;;  %v4347_v23 = vmul.f32 %v8310_v37, %v4315_v22 }
 0x526   : > { %4456 = vrot.lane.b32.xlu1 %v5662_v49, %s5740_s7  ;;  %v8311_v49 = vld [vmem:[#allocation47_spill] sm:$0xff] }
 0x527   : > { %5665 = vtanh.f32 %v4273_v0  ;;  %v4317_v43 = vsub.f32 1.0, %v8311_v49 }
 0x52a   : > { %v4207_v30 = vpop.permute.xlu0 %4206 }
 0x52b   : > { %v4274_v1 = vadd.f32 %v4207_v30, %v8294_v61  ;;  %v8312_v61 = vld [vmem:[#allocation14_spill] sm:$0xff] }
 0x52c   : > { %v4209_v48 = vpop.permute.xlu1 %4208 }
 0x52d   : > { %5667 = vtanh.f32 %v4274_v1  ;;  %v4275_v60 = vadd.f32 %v4209_v48, %v8295_v28  ;;  %v4348_v1 = vmul.f32 %v8312_v61, %v4316_v10  ;;  %v8313_v28 = vld [vmem:[#allocation52_spill] sm:$0xff]  ;;  %v8327_v10 = vld [vmem:[#allocation61_spill] sm:$0xff] }
 0x52f   : > { %v5664_v53 = vpop.eup %5663  ;;  %5669 = vtanh.f32 %v4275_v60  ;;  %v4318_v60 = vsub.f32 1.0, %v8313_v28 }
 0x530   : > { %4458 = vrot.lane.b32.xlu0 %v5664_v53, %s5740_s7 }
 0x531   : > { %v5666_v51 = vpop.eup %5665 }
 0x532   : > { %v4211_v45 = vpop.permute.xlu0 %4210  ;;  %4460 = vrot.lane.b32.xlu1 %v5666_v51, %s5740_s7 }
 0x533   : > { %v4276_v55 = vadd.f32 %v4211_v45, %v8296_v25  ;;  %v8314_v45 = vld [vmem:[#allocation15_spill] sm:$0xff] }
 0x534   : > { %v4213_v21 = vpop.permute.xlu1 %4212  ;;  %v4349_v25 = vmul.f32 %v8314_v45, %v4317_v43  ;;  %v8329_v43 = vld [vmem:[#allocation23_spill] sm:$0xff] }
 0x535   : > { %5671 = vtanh.f32 %v4276_v55  ;;  %v4277_v2 = vadd.f32 %v4213_v21, %v8298_v59 }
 0x536   : > { %v4407_v24 = vpop.permute.xlu0 %4406 }
 0x537   : > { %v5668_v57 = vpop.eup %5667  ;;  %5673 = vtanh.f32 %v4277_v2  ;;  %v4502_v47 = vmul.f32 %v8297_v41, %v4407_v24  ;;  %v8315_v41 = vld [vmem:[#allocation55_spill] sm:$0xff]  ;;  %v8316_v2 = vld [vmem:[#allocation16_spill] sm:$0xff] }
 0x538   : > { %4462 = vrot.lane.b32.xlu0 %v5668_v57, %s5740_s7  ;;  %v4409_v32 = vpop.permute.xlu1 %4408  ;;  %v4319_v20 = vsub.f32 1.0, %v8315_v41  ;;  %v8317_v24 = vld [vmem:[#allocation51_spill] sm:$0xff] }
 0x539   : > { %v5670_v46 = vpop.eup %5669  ;;  %v4534_v12 = vadd.f32 %v4502_v47, %v4342_v62  ;;  %v4503_v58 = vmul.f32 %v8299_v18, %v4409_v32  ;;  %v4350_v18 = vmul.f32 %v8316_v2, %v4318_v60  ;;  %v4320_v57 = vsub.f32 1.0, %v8317_v24  ;;  %v8318_v47 = vld [vmem:[#allocation17_spill] sm:$0xff] }
 0x53a   : > { %v4411_v14 = vpop.permute.xlu0 %4410  ;;  %4464 = vrot.lane.b32.xlu1 %v5670_v46, %s5740_s7  ;;  %v8319_v32 = vld [vmem:[#allocation53_spill] sm:$0xff] }
 0x53b   : > { %4566 = vst.msk [vmem:[%s7838_s10] sm:$0xff] %vm2560_vm4, %v4534_v12  ;;  %v4535_v33 = vadd.f32 %v4503_v58, %v4343_v35  ;;  %v4504_v26 = vmul.f32 %v8301_v44, %v4411_v14  ;;  %v4351_v44 = vmul.f32 %v8318_v47, %v4319_v20  ;;  %v4321_v46 = vsub.f32 1.0, %v8319_v32  ;;  %v8320_v35 = vld [vmem:[#allocation18_spill] sm:$0xff]  ;;  %v8333_v20 = vld [vmem:[#allocation25_spill] sm:$0xff] }
 0x53c   : > { %v4413_v27 = vpop.permute.xlu1 %4412  ;;  %v4352_v58 = vmul.f32 %v8320_v35, %v4320_v57  ;;  %v4322_v14 = vsub.f32 1.0, %v8321_v36 }
 0x53d   : > { %4567 = vst.msk [vmem:[%s7838_s10 + $0x8] sm:$0xff] %vm2560_vm4, %v4535_v33  ;;  %v4536_v56 = vadd.f32 %v4504_v26, %v4344_v54  ;;  %v4505_v8 = vmul.f32 %v8303_v52, %v4413_v27  ;;  %v8322_v54 = vld [vmem:[#allocation19_spill] sm:$0xff]  ;;  %v4323_v27 = vsub.f32 1.0, %v8323_v6 }
 0x53e   : > { %v4415_v15 = vpop.permute.xlu0 %4414  ;;  %v4353_v26 = vmul.f32 %v8322_v54, %v4321_v46  ;;  %v8337_v46 = vld [vmem:[#allocation27_spill] sm:$0xff] }
 0x53f   : > { %v5672_v42 = vpop.eup %5671  ;;  %4568 = vst.msk [vmem:[%s7838_s10 + $0x10] sm:$0xff] %vm2560_vm4, %v4536_v56  ;;  %v4537_v40 = vadd.f32 %v4505_v8, %v4345_v50  ;;  %v4506_v11 = vmul.f32 %v8305_v4, %v4415_v15  ;;  %v8324_v50 = vld [vmem:[#allocation20_spill] sm:$0xff] }
 0x540   : > { %4466 = vrot.lane.b32.xlu0 %v5672_v42, %s5740_s7  ;;  %v4417_v19 = vpop.permute.xlu1 %4416  ;;  %v4354_v8 = vmul.f32 %v8324_v50, %v4322_v14  ;;  %v8325_v42 = vld [vmem:[#allocation21_spill] sm:$0xff] }
 0x541   : > { %v5674_v16 = vpop.eup %5673  ;;  %4569 = vst.msk [vmem:[%s7838_s10 + $0x18] sm:$0xff] %vm2560_vm4, %v4537_v40  ;;  %v4538_v31 = vadd.f32 %v4506_v11, %v4346_v63  ;;  %v4507_v38 = vmul.f32 %v8307_v17, %v4417_v19  ;;  %v4355_v40 = vmul.f32 %v8325_v42, %v4323_v27  ;;  %v8326_v11 = vld [vmem:[#allocation59_spill] sm:$0xff]  ;;  %v4325_v19 = vsub.f32 1.0, %v8327_v10  ;;  %v8341_v27 = vld [vmem:[#allocation29_spill] sm:$0xff] }
 0x542   : > { %v4419_v0 = vpop.permute.xlu0 %4418  ;;  %4468 = vrot.lane.b32.xlu1 %v5674_v16, %s5740_s7  ;;  %s4774_s7 = sshll.u32 %s5792_s19, 12  ;;  %s8005_s19 = scalar_lea.sflag [#allocation6], %s188_s14 }
 0x543   : > { %4570 = vst.msk [vmem:[%s7838_s10 + $0x20] sm:$0xff] %vm2560_vm4, %v4538_v31  ;;  %v4539_v30 = vadd.f32 %v4507_v38, %v4347_v23  ;;  %v4508_v48 = vmul.f32 %v8309_v3, %v4419_v0  ;;  %v4324_v3 = vsub.f32 1.0, %v8326_v11  ;;  %v8328_v31 = vld [vmem:[#allocation22_spill] sm:$0xff]  ;;  %v4357_v0 = vmul.f32 %v8329_v43, %v4325_v19  ;;  %s7995_s20 = scalar_lea.hbm %s8050_s4, %s4774_s7 }
 0x544   : > { %v4421_v53 = vpop.permute.xlu1 %4420 }
 0x545   : > { %4571 = vst.msk [vmem:[%s7838_s10 + $0x28] sm:$0xff] %vm2560_vm4, %v4539_v30  ;;  %v4540_v51 = vadd.f32 %v4508_v48, %v4348_v1  ;;  %v4509_v55 = vmul.f32 %v8311_v49, %v4421_v53  ;;  %v4356_v37 = vmul.f32 %v8328_v31, %v4324_v3  ;;  %v8330_v1 = vld [vmem:[#allocation68_spill] sm:$0xff] }
 0x546   : > { %v4423_v21 = vpop.permute.xlu0 %4422  ;;  %v4326_v48 = vsub.f32 1.0, %v8330_v1 }
 0x547   : > { %4572 = vst.msk [vmem:[%s7838_s10 + $0x30] sm:$0xff] %vm2560_vm4, %v4540_v51  ;;  %v4541_v59 = vadd.f32 %v4509_v55, %v4349_v25  ;;  %v4510_v7 = vmul.f32 %v8313_v28, %v4423_v21  ;;  %v8331_v28 = vld [vmem:[#allocation70_spill] sm:$0xff]  ;;  %v8332_v51 = vld [vmem:[#allocation24_spill] sm:$0xff] }
 0x548   : > { %v4425_v29 = vpop.permute.xlu1 %4424  ;;  %v4327_v60 = vsub.f32 1.0, %v8331_v28  ;;  %v4358_v45 = vmul.f32 %v8332_v51, %v4326_v48 }
 0x549   : > { %4573 = vst.msk [vmem:[%s7838_s10 + $0x38] sm:$0xff] %vm2560_vm4, %v4541_v59  ;;  %v4542_v62 = vadd.f32 %v4510_v7, %v4350_v18  ;;  %v4511_v13 = vmul.f32 %v8315_v41, %v4425_v29  ;;  %v8334_v18 = vld [vmem:[#allocation67_spill] sm:$0xff] }
 0x54a   : > { %v4427_v12 = vpop.permute.xlu0 %4426  ;;  %v4359_v21 = vmul.f32 %v8333_v20, %v4327_v60  ;;  %v4328_v7 = vsub.f32 1.0, %v8334_v18 }
 0x54b   : > { %4574 = vst.msk [vmem:[%s7838_s10 + $0x40] sm:$0xff] %vm2560_vm4, %v4542_v62  ;;  %v4543_v9 = vadd.f32 %v4511_v13, %v4351_v44  ;;  %v4512_v52 = vmul.f32 %v8317_v24, %v4427_v12  ;;  %v8335_v24 = vld [vmem:[#allocation69_spill] sm:$0xff]  ;;  %v8336_v62 = vld [vmem:[#allocation26_spill] sm:$0xff] }
 0x54c   : > { %v4429_v33 = vpop.permute.xlu1 %4428  ;;  %v4329_v57 = vsub.f32 1.0, %v8335_v24  ;;  %v4360_v47 = vmul.f32 %v8336_v62, %v4328_v7 }
 0x54d   : > { %4575 = vst.msk [vmem:[%s7838_s10 + $0x48] sm:$0xff] %vm2560_vm4, %v4543_v9  ;;  %v4544_v39 = vadd.f32 %v4512_v52, %v4352_v58  ;;  %v4513_v4 = vmul.f32 %v8319_v32, %v4429_v33  ;;  %v8338_v58 = vld [vmem:[#allocation72_spill] sm:$0xff] }
 0x54e   : > { %v4431_v56 = vpop.permute.xlu0 %4430  ;;  %v4361_v12 = vmul.f32 %v8337_v46, %v4329_v57  ;;  %v4330_v52 = vsub.f32 1.0, %v8338_v58 }
 0x54f   : > { %4576 = vst.msk [vmem:[%s7838_s10 + $0x50] sm:$0xff] %vm2560_vm4, %v4544_v39  ;;  %v4545_v5 = vadd.f32 %v4513_v4, %v4353_v26  ;;  %v4514_v17 = vmul.f32 %v8321_v36, %v4431_v56  ;;  %v8339_v36 = vld [vmem:[#allocation74_spill] sm:$0xff]  ;;  %v8340_v39 = vld [vmem:[#allocation28_spill] sm:$0xff] }
 0x550   : > { %v4433_v22 = vpop.permute.xlu1 %4432  ;;  %v4331_v14 = vsub.f32 1.0, %v8339_v36  ;;  %v4362_v54 = vmul.f32 %v8340_v39, %v4330_v52 }
 0x551   : > { %4577 = vst.msk [vmem:[%s7838_s10 + $0x58] sm:$0xff] %vm2560_vm4, %v4545_v5  ;;  %v4546_v15 = vadd.f32 %v4514_v17, %v4354_v8  ;;  %v4515_v34 = vmul.f32 %v8323_v6, %v4433_v22  ;;  %v8342_v8 = vld [vmem:[#allocation71_spill] sm:$0xff]  ;;  %v8343_v22 = vld [vmem:[#allocation73_spill] sm:$0xff] }
 0x552   : > { %v4363_v56 = vmul.f32 %v8341_v27, %v4331_v14  ;;  %v4332_v17 = vsub.f32 1.0, %v8342_v8 }
 0x553   : > { %4578 = vst.msk [vmem:[%s7838_s10 + $0x60] sm:$0xff] %vm2560_vm4, %v4546_v15  ;;  %v4547_v63 = vadd.f32 %v4515_v34, %v4355_v40  ;;  %v4333_v15 = vsub.f32 1.0, %v8343_v22  ;;  %v8344_v40 = vld [vmem:[#allocation30_spill] sm:$0xff] }
 0x554   : > { %v4364_v34 = vmul.f32 %v8344_v40, %v4332_v17 }
 0x555   : > { %4579 = vst.msk [vmem:[%s7838_s10 + $0x68] sm:$0xff] %vm2560_vm4, %v4547_v63 }
 0x55e   : > { %v4435_v16 = vpop.permute.xlu0 %4434 }
 0x55f   : > { %v4516_v23 = vmul.f32 %v8326_v11, %v4435_v16 }
 0x560   : > { %v4437_v38 = vpop.permute.xlu1 %4436 }
 0x561   : > { %v4548_v49 = vadd.f32 %v4516_v23, %v4356_v37  ;;  %v4517_v30 = vmul.f32 %v8327_v10, %v4437_v38  ;;  %v8345_v10 = vld [vmem:[#allocation31_spill] sm:$0xff]  ;;  %v8346_v37 = vld [vmem:[#allocation76_spill] sm:$0xff]  ;;  %v8347_v38 = vld [vmem:[#allocation78_spill] sm:$0xff] }
 0x562   : > { %v4365_v19 = vmul.f32 %v8345_v10, %v4333_v15  ;;  %v4334_v23 = vsub.f32 1.0, %v8346_v37 }
 0x563   : > { %4580 = vst.msk [vmem:[%s7838_s10 + $0x70] sm:$0xff] %vm2560_vm4, %v4548_v49  ;;  %v4549_v61 = vadd.f32 %v4517_v30, %v4357_v0  ;;  %v4335_v49 = vsub.f32 1.0, %v8347_v38  ;;  %v8348_v0 = vld [vmem:[#allocation32_spill] sm:$0xff] }
 0x564   : > { %v4366_v30 = vmul.f32 %v8348_v0, %v4334_v23 }
 0x565   : > { %4581 = vst.msk [vmem:[%s7838_s10 + $0x78] sm:$0xff] %vm2560_vm4, %v4549_v61 }
 0x566   : > { %v4439_v53 = vpop.permute.xlu0 %4438 }
 0x567   : > { %v4518_v25 = vmul.f32 %v8330_v1, %v4439_v53 }
 0x568   : > { %v4441_v55 = vpop.permute.xlu1 %4440 }
 0x569   : > { %v4550_v41 = vadd.f32 %v4518_v25, %v4358_v45  ;;  %v4519_v59 = vmul.f32 %v8331_v28, %v4441_v55  ;;  %v8349_v28 = vld [vmem:[#allocation33_spill] sm:$0xff]  ;;  %v8350_v45 = vld [vmem:[#allocation75_spill] sm:$0xff] }
 0x56a   : > { %v4367_v60 = vmul.f32 %v8349_v28, %v4335_v49  ;;  %v4336_v25 = vsub.f32 1.0, %v8350_v45  ;;  %v8351_v55 = vld [vmem:[#allocation77_spill] sm:$0xff] }
 0x56b   : > { %4582 = vst.msk [vmem:[%s7838_s10 + $0x80] sm:$0xff] %vm2560_vm4, %v4550_v41  ;;  %v4551_v2 = vadd.f32 %v4519_v59, %v4359_v21  ;;  %v4337_v41 = vsub.f32 1.0, %v8351_v55  ;;  %v8352_v21 = vld [vmem:[#allocation34_spill] sm:$0xff] }
 0x56c   : > { %v4368_v59 = vmul.f32 %v8352_v21, %v4336_v25 }
 0x56d   : > { %4583 = vst.msk [vmem:[%s7838_s10 + $0x88] sm:$0xff] %vm2560_vm4, %v4551_v2 }
 0x576   : > { %v4443_v29 = vpop.permute.xlu0 %4442 }
 0x577   : > { %v4520_v44 = vmul.f32 %v8334_v18, %v4443_v29 }
 0x578   : > { %v4445_v13 = vpop.permute.xlu1 %4444 }
 0x579   : > { %v4552_v32 = vadd.f32 %v4520_v44, %v4360_v47  ;;  %v4521_v9 = vmul.f32 %v8335_v24, %v4445_v13  ;;  %v8353_v24 = vld [vmem:[#allocation35_spill] sm:$0xff]  ;;  %v8354_v47 = vld [vmem:[#allocation80_spill] sm:$0xff]  ;;  %v8355_v13 = vld [vmem:[#allocation82_spill] sm:$0xff] }
 0x57a   : > { %v4369_v57 = vmul.f32 %v8353_v24, %v4337_v41  ;;  %v4338_v44 = vsub.f32 1.0, %v8354_v47 }
 0x57b   : > { %4584 = vst.msk [vmem:[%s7838_s10 + $0x90] sm:$0xff] %vm2560_vm4, %v4552_v32  ;;  %v4553_v35 = vadd.f32 %v4521_v9, %v4361_v12  ;;  %v4339_v32 = vsub.f32 1.0, %v8355_v13  ;;  %v8356_v12 = vld [vmem:[#allocation36_spill] sm:$0xff] }
 0x57c   : > { %v4370_v9 = vmul.f32 %v8356_v12, %v4338_v44 }
 0x57d   : > { %4585 = vst.msk [vmem:[%s7838_s10 + $0x98] sm:$0xff] %vm2560_vm4, %v4553_v35 }
 0x57e   : > { %v4447_v33 = vpop.permute.xlu0 %4446 }
 0x57f   : > { %v4522_v26 = vmul.f32 %v8338_v58, %v4447_v33 }
 0x580   : > { %v4449_v4 = vpop.permute.xlu1 %4448 }
 0x581   : > { %v4554_v6 = vadd.f32 %v4522_v26, %v4362_v54  ;;  %v4523_v5 = vmul.f32 %v8339_v36, %v4449_v4  ;;  %v8357_v36 = vld [vmem:[#allocation37_spill] sm:$0xff]  ;;  %v8358_v54 = vld [vmem:[#allocation79_spill] sm:$0xff] }
 0x582   : > { %v4371_v14 = vmul.f32 %v8357_v36, %v4339_v32  ;;  %v4340_v26 = vsub.f32 1.0, %v8358_v54  ;;  %v8359_v4 = vld [vmem:[#allocation81_spill] sm:$0xff] }
 0x583   : > { %4586 = vst.msk [vmem:[%s7838_s10 + $0xa0] sm:$0xff] %vm2560_vm4, %v4554_v6  ;;  %v4555_v50 = vadd.f32 %v4523_v5, %v4363_v56  ;;  %v4341_v6 = vsub.f32 1.0, %v8359_v4  ;;  %v8360_v56 = vld [vmem:[#allocation38_spill] sm:$0xff] }
 0x584   : > { %v4372_v5 = vmul.f32 %v8360_v56, %v4340_v26 }
 0x585   : > { %4587 = vst.msk [vmem:[%s7838_s10 + $0xa8] sm:$0xff] %vm2560_vm4, %v4555_v50 }
 0x58e   : > { %v4451_v42 = vpop.permute.xlu0 %4450 }
 0x58f   : > { %v4524_v63 = vmul.f32 %v8342_v8, %v4451_v42 }
 0x590   : > { %v4453_v11 = vpop.permute.xlu1 %4452 }
 0x591   : > { %v4556_v3 = vadd.f32 %v4524_v63, %v4364_v34  ;;  %v4525_v16 = vmul.f32 %v8343_v22, %v4453_v11  ;;  %v8361_v22 = vld [vmem:[#allocation39_spill] sm:$0xff] }
 0x592   : > { %v4373_v15 = vmul.f32 %v8361_v22, %v4341_v6 }
 0x593   : > { %4588 = vst.msk [vmem:[%s7838_s10 + $0xb0] sm:$0xff] %vm2560_vm4, %v4556_v3  ;;  %v4557_v31 = vadd.f32 %v4525_v16, %v4365_v19 }
 0x595   : > { %4589 = vst.msk [vmem:[%s7838_s10 + $0xb8] sm:$0xff] %vm2560_vm4, %v4557_v31 }
 0x596   : > { %v4455_v43 = vpop.permute.xlu0 %4454 }
 0x597   : > { %v4526_v61 = vmul.f32 %v8346_v37, %v4455_v43 }
 0x598   : > { %v4457_v1 = vpop.permute.xlu1 %4456 }
 0x599   : > { %v4558_v48 = vadd.f32 %v4526_v61, %v4366_v30  ;;  %v4527_v53 = vmul.f32 %v8347_v38, %v4457_v1 }
 0x59b   : > { %4590 = vst.msk [vmem:[%s7838_s10 + $0xc0] sm:$0xff] %vm2560_vm4, %v4558_v48  ;;  %v4559_v51 = vadd.f32 %v4527_v53, %v4367_v60 }
 0x59d   : > { %4591 = vst.msk [vmem:[%s7838_s10 + $0xc8] sm:$0xff] %vm2560_vm4, %v4559_v51 }
 0x5a2   : > { %v4459_v20 = vpop.permute.xlu0 %4458 }
 0x5a3   : > { %v4528_v2 = vmul.f32 %v8350_v45, %v4459_v20 }
 0x5a4   : > { %v4461_v18 = vpop.permute.xlu1 %4460 }
 0x5a5   : > { %v4560_v7 = vadd.f32 %v4528_v2, %v4368_v59  ;;  %v4529_v29 = vmul.f32 %v8351_v55, %v4461_v18 }
 0x5a7   : > { %4592 = vst.msk [vmem:[%s7838_s10 + $0xd0] sm:$0xff] %vm2560_vm4, %v4560_v7  ;;  %v4561_v62 = vadd.f32 %v4529_v29, %v4369_v57 }
 0x5a9   : > { %4593 = vst.msk [vmem:[%s7838_s10 + $0xd8] sm:$0xff] %vm2560_vm4, %v4561_v62 }
 0x5aa   : > { %v4463_v46 = vpop.permute.xlu0 %4462 }
 0x5ab   : > { %v4530_v35 = vmul.f32 %v8354_v47, %v4463_v46 }
 0x5ac   : > { %v4465_v58 = vpop.permute.xlu1 %4464 }
 0x5ad   : > { %v4562_v52 = vadd.f32 %v4530_v35, %v4370_v9  ;;  %v4531_v33 = vmul.f32 %v8355_v13, %v4465_v58 }
 0x5af   : > { %4594 = vst.msk [vmem:[%s7838_s10 + $0xe0] sm:$0xff] %vm2560_vm4, %v4562_v52  ;;  %v4563_v39 = vadd.f32 %v4531_v33, %v4371_v14 }
 0x5b1   : > { %4595 = vst.msk [vmem:[%s7838_s10 + $0xe8] sm:$0xff] %vm2560_vm4, %v4563_v39 }
 0x5b2   : > { %v4467_v27 = vpop.permute.xlu0 %4466 }
 0x5b3   : > { %v4532_v50 = vmul.f32 %v8358_v54, %v4467_v27 }
 0x5b4   : > { %v4469_v8 = vpop.permute.xlu1 %4468 }
 0x5b5   : > { %v4564_v17 = vadd.f32 %v4532_v50, %v4372_v5  ;;  %v4533_v42 = vmul.f32 %v8359_v4, %v4469_v8 }
 0x5b7   : > { %4596 = vst.msk [vmem:[%s7838_s10 + $0xf0] sm:$0xff] %vm2560_vm4, %v4564_v17  ;;  %v4565_v40 = vadd.f32 %v4533_v42, %v4373_v15 }
 0x5b9   : > { %4597 = vst.msk [vmem:[%s7838_s10 + $0xf8] sm:$0xff] %vm2560_vm4, %v4565_v40 }
 0x5ba   : > { %5688 = shalt.err (!%p5685_p3)
}
 0x5bb   : > { %s5689_s30 = scalar_lea.hbm %s7995_s20, 4096  ;;  %s5693_s8 = scalar_lea.hbm %s8050_s4, 8192 }
 0x5bc   : > { %p5690_p4 = scmp.ne.s32.totalorder %s7995_s20, %s5689_s30  ;;  %p5694_p9 = scmp.lt.u32.totalorder %s7995_s20, %s8050_s4 }
 0x5bd   : > { %p5695_p10 = scmp.lt.u32.totalorder %s5693_s8, %s5689_s30  ;;  %p5697_p12 = scmp.lt.u32.totalorder %s5689_s30, %s7995_s20 }
 0x5be   : > { %p5691_p7 = pnand %p5690_p4, %p5809_p5 }
 0x5bf   : > { %p5696_p11 = por %p5695_p10, %p5694_p9 }
 0x5c0   : > { %p5692_p8 = pneg %p5691_p7 }
 0x5c1   : > { %p5698_p13 = por %p5697_p12, %p5696_p11 }
 0x5c3   : > { %p5699_p0 = pnand %p5698_p13, %p5692_p8 }
 0x5c5   : > { %5702 = shalt.err (!%p5699_p0)
}
 0x5c6   : > { %s5744_s23 = smov 128   ;;  %s5745_s10 = smov 8  }
 0x5c7   : > { %5304 = dma.vmem_to_hbm [thread:$0]  (%p5809_p5), %s7997_s11, 4096, %s7995_s20, %s8005_s19, %s5744_s23, %s5744_s23, %s5745_s10  }
 0x5c8 PF: > { %p5310_p1 = scmp.ge.s32.totalorder %s5737_s18, 2  ;;  %s4627_s7 = sand.u32 1, %s5725_s15  }
 0x5c9   : > { %s4628_s12 = scalar_lea.sflag [#allocation6], %s4627_s7 }
 0x5ca   : > { %p5307_p2 = pnand %p5310_p1, %p5813_p6 }
 0x5cc   : > { %5720 = dma.done.wait (!%p5307_p2), %s4628_s12, 4096  }
 0x5cd   : > { %5722 = vsyncadd (!%p5307_p2), %s4628_s12, 4294963200  ;;  %p14_p3 = scmp.ge.s32.totalorder %s5796_s21, 4   ;;  %s8362_s15 = smov %s5729_s16 }
 0x5ce   : > { %s8363_s16 = smov %s5733_s17  ;;  %s8364_s17 = smov %s5807_s24 }
 0x5cf   : > { %s8365_s18 = smov %s5796_s21  ;;  %16 = sbr.rel (!%p14_p3) target bundleno = 3 (0x3), region = 74 }
 0x5d6   :  { %4633 = vsyncpa [#allocation6], 1 }
 0x5d7   :  { %4635 = vsyncpa [#allocation6 + $0x1], 1 }

</bundles_post_ra>
